<compile_context>
chip_gen: v6e
topology: v6e:2x2x1
jax: 0.10.0
libtpu: 0.0.40
codegen_flags: <defaults>
</compile_context>

<pallas_src>
import jax
import jax.numpy as jnp
from jax.experimental import pallas as pl
from jax.experimental.pallas import tpu as pltpu

BN_EPS = 1e-5


def _fullblock(shape):
    """BlockSpec covering the whole array (grid=(1,))."""
    n = len(shape)
    return pl.BlockSpec(shape, lambda *_: (0,) * n)


# ---------------------------------------------------------------------------
# Single fused kernel: encoder -> 4x non-local -> decoder -> branch heads
# ---------------------------------------------------------------------------
def _generator_kernel(
    x_ref,      # (B, E, F)      input
    w_ref,      # (14F, 4F)      packed (Fin, Fout)-layout dense weights
    lb_ref,     # (6, 4F)        packed Linear biases (zero lane-padded rows)
    bn_ref,     # (3, 2, E, 1)   encoder/decoder BatchNorm gamma/beta
    nlw_ref,    # (4, C+2, E)    stacked NL projections [g/L ; wf_t@theta ; wf_p@phi]
    nlb_ref,    # (4, C+2, L)    pre-broadcast projection biases
    zw_ref,     # (4, E, C)      W_z 1x1-conv weights
    zb_ref,     # (4, E, L)      pre-broadcast W_z biases
    nbn_ref,    # (4, 2, E, 1)   NL W_z BatchNorm gamma/beta
    o_ref,      # (B, E, F)      output
):
    B, E, F = x_ref.shape
    L = nlb_ref.shape[2]          # spatial length of the non-local blocks (4F)
    C = zw_ref.shape[2]           # NLBlockND inter_channels (= E // 2)

    def linear(h, r0, fin, fout, brow):
        """h @ W + b, W already (Fin, Fout): native [M,K]x[K,N] MXU matmul."""
        Bh, Eh, _ = h.shape
        out = jax.lax.dot_general(
            h.reshape(Bh * Eh, fin), w_ref[r0:r0 + fin, 0:fout],
            (((1,), (0,)), ((), ())), preferred_element_type=jnp.float32)
        out = out + lb_ref[brow:brow + 1, 0:fout]
        return out.reshape(Bh, Eh, fout)

    def bn(h, gamma, beta):
        """BatchNorm1d(E) on (N, E, L): single-pass batch stats + folded affine."""
        inv_n = 1.0 / (h.shape[0] * h.shape[2])
        s1 = jnp.sum(h, axis=(0, 2), keepdims=True)
        s2 = jnp.sum(h * h, axis=(0, 2), keepdims=True)
        mean = s1 * inv_n
        var = s2 * inv_n - mean * mean                        # biased variance
        scale = gamma * jax.lax.rsqrt(var + BN_EPS)           # (1, E, 1)
        shift = beta - mean * scale
        return h * scale + shift

    def bmm(lhs, rhs, dims):
        """Batched (leading axis) dot_general in transpose-free orientation."""
        return jax.lax.dot_general(lhs, rhs, (dims, ((0,), (0,))),
                                   preferred_element_type=jnp.float32)

    # ------------------------------ encoder --------------------------------
    h = jnp.maximum(bn(linear(x_ref[...], 0, F, 2 * F, 0),
                       bn_ref[0, 0], bn_ref[0, 1]), 0.0)
    h = jnp.maximum(bn(linear(h, F, 2 * F, 4 * F, 1),
                       bn_ref[1, 0], bn_ref[1, 1]), 0.0)
    z = jax.nn.sigmoid(linear(h, 3 * F, 4 * F, 4 * F, 2))     # (B, E, L)

    # ---------------- 4 non-local blocks, statically unrolled ---------------
    # z stays in (B, E, L) layout: E on sublanes, L = 4F = 128 on lanes.
    for i in range(4):
        pw = jnp.broadcast_to(nlw_ref[i], (B, C + 2, E))
        proj = bmm(pw, z, ((2,), (1,))) + nlb_ref[i]           # (B, C+2, L)
        g = proj[:, :C, :].astype(jnp.bfloat16)                # (B, C, L); 1/L folded
        a = proj[:, C, :]                                      # (B, L) theta score (+wf_b)
        d = proj[:, C + 1, :]                                  # (B, L) phi score
        # f_T[b,j,i] = relu(d[b,j] + a[b,i]) -- contraction axis j on sublanes,
        # so the y matmul below is a native [M,K]x[K,N] (no operand transpose).
        f_t = jnp.maximum(d[:, :, None] + a[:, None, :], 0.0).astype(jnp.bfloat16)
        # y[b,c,i] = sum_j g[b,c,j] * f[b,i,j]   (f/N already folded into g)
        y = bmm(g, f_t, ((2,), (1,)))                          # (B, C, L) f32
        # W_z: 1x1 conv back to E channels + BatchNorm1d(E), residual add.
        zw = jnp.broadcast_to(zw_ref[i], (B, E, C))
        wy = bmm(zw, y, ((2,), (1,))) + zb_ref[i]              # (B, E, L)
        z = bn(wy, nbn_ref[i, 0], nbn_ref[i, 1]) + z

    # ----------------------- decoder + fused branch heads -------------------
    h = jnp.maximum(bn(linear(z, 7 * F, 4 * F, 2 * F, 3),
                       bn_ref[2, 0], bn_ref[2, 1]), 0.0)
    h = jnp.maximum(linear(h, 11 * F, 2 * F, F, 4), 0.0)
    o_ref[...] = linear(h, 13 * F, F, F, 5)      # branch_fc1 ++ branch_fc2 fused


# ---------------------------------------------------------------------------
# Wrapper: trace-time parameter folding / packing + single pallas_call
# ---------------------------------------------------------------------------
def generator_forward(params, x):
    p = params
    B, E, F = x.shape
    L = 4 * F
    C = p['nl0']['g_w'].shape[0]

    # ---- pre-transposed (Fin, Fout) weights packed into one sublane slab ----
    wt = [p['enc_fc1_w'].T, p['enc_fc2_w'].T, p['enc_fc3_w'].T,
          p['dec_fc1_w'].T, p['dec_fc2_w'].T,
          jnp.concatenate([p['branch_fc1_w'], p['branch_fc2_w']], 0).T]
    wmax = 4 * F
    w_slab = jnp.concatenate(
        [jnp.pad(w, ((0, 0), (0, wmax - w.shape[1]))) for w in wt], axis=0)
    # row offsets inside the slab: 0, F, 3F, 7F, 11F, 13F (total 14F rows)

    # ---- Linear biases packed into one (6, 4F) lane-padded slab ----
    lb = [p['enc_fc1_b'], p['enc_fc2_b'], p['enc_fc3_b'],
          p['dec_fc1_b'], p['dec_fc2_b'],
          jnp.concatenate([p['branch_fc1_b'], p['branch_fc2_b']], 0)]
    lb_slab = jnp.stack([jnp.pad(b, (0, wmax - b.shape[0])) for b in lb])

    # ---- encoder/decoder BatchNorm affine params: (3, 2, E, 1) ----
    bn_aff = jnp.stack([
        jnp.stack([p['enc_bn1_g'], p['enc_bn1_b']]),
        jnp.stack([p['enc_bn2_g'], p['enc_bn2_b']]),
        jnp.stack([p['dec_bn1_g'], p['dec_bn1_b']]),
    ])[:, :, :, None]

    # ---- fold non-local parameters (cheap, trace-time JAX) ----
    proj_w, proj_b, wz_w, wz_b, nbn = [], [], [], [], []
    for i in range(4):
        q = p[f'nl{i}']
        wft, wfp = q['wf_w'][:C], q['wf_w'][C:]
        av_w = wft @ q['theta_w']                                   # (E,)
        av_b = jnp.dot(wft, q['theta_b']) + q['wf_b'][0]            # scalar
        dv_w = wfp @ q['phi_w']                                     # (E,)
        dv_b = jnp.dot(wfp, q['phi_b'])                             # scalar
        proj_w.append(jnp.concatenate([q['g_w'] / L, av_w[None], dv_w[None]], 0))
        proj_b.append(jnp.concatenate([q['g_b'] / L, av_b[None], dv_b[None]], 0))
        wz_w.append(q['wz_w'])
        wz_b.append(q['wz_b'])
        nbn.append(jnp.stack([q['bn_g'], q['bn_b']]))
    nl_proj_w = jnp.stack(proj_w)                                        # (4, C+2, E)
    nl_proj_b = jnp.broadcast_to(jnp.stack(proj_b)[:, :, None], (4, C + 2, L))
    nl_wz_w = jnp.stack(wz_w)                                            # (4, E, C)
    nl_wz_b = jnp.broadcast_to(jnp.stack(wz_b)[:, :, None], (4, E, L))
    nl_bn = jnp.stack(nbn)[:, :, :, None]                                # (4, 2, E, 1)

    args = (x, w_slab, lb_slab, bn_aff,
            nl_proj_w, nl_proj_b, nl_wz_w, nl_wz_b, nl_bn)
    return pl.pallas_call(
        _generator_kernel,
        grid=(1,),
        in_specs=[_fullblock(a.shape) for a in args],
        out_specs=_fullblock((B, E, F)),
        out_shape=jax.ShapeDtypeStruct((B, E, F), jnp.float32),
        compiler_params=pltpu.CompilerParams(
            dimension_semantics=("arbitrary",)),
    )(*args)


# ---------------------------------------------------------------------------
# Pure-JAX reference (mirrors the PyTorch graph) for correctness checking
# ---------------------------------------------------------------------------
def _ref_linear(x, w, b, g=None, be=None, act=None):
    h = jnp.einsum('bef,gf->beg', x, w) + b[None, None, :]
    if g is not None:
        mean = h.mean(axis=(0, 2), keepdims=True)
        var = ((h - mean) ** 2).mean(axis=(0, 2), keepdims=True)
        h = (h - mean) * jax.lax.rsqrt(var + BN_EPS) * g[None, :, None] + be[None, :, None]
    if act == 'relu':
        h = jax.nn.relu(h)
    elif act == 'sigmoid':
        h = jax.nn.sigmoid(h)
    return h


def _ref_nonlocal(x, p):   # x: (B, E, L), NLBlockND 'concatenate' mode
    B, E, L = x.shape
    C = p['g_w'].shape[0]
    g_x = jnp.einsum('ce,bel->bcl', p['g_w'], x) + p['g_b'][None, :, None]
    g_x = jnp.swapaxes(g_x, 1, 2)
    theta = jnp.einsum('ce,bel->bcl', p['theta_w'], x) + p['theta_b'][None, :, None]
    phi = jnp.einsum('ce,bel->bcl', p['phi_w'], x) + p['phi_b'][None, :, None]
    a = jnp.einsum('c,bcl->bl', p['wf_w'][:C], theta)
    d = jnp.einsum('c,bcl->bl', p['wf_w'][C:], phi)
    f = jax.nn.relu(a[:, :, None] + d[:, None, :] + p['wf_b'][0]) / L
    y = jnp.einsum('bij,bjc->bic', f, g_x)
    y = jnp.swapaxes(y, 1, 2)
    wy = jnp.einsum('ec,bcl->bel', p['wz_w'], y) + p['wz_b'][None, :, None]
    mean = wy.mean(axis=(0, 2), keepdims=True)
    var = ((wy - mean) ** 2).mean(axis=(0, 2), keepdims=True)
    wy = (wy - mean) * jax.lax.rsqrt(var + BN_EPS) * p['bn_g'][None, :, None] + p['bn_b'][None, :, None]
    return wy + x


def reference_forward(p, x):
    out = _ref_linear(x, p['enc_fc1_w'], p['enc_fc1_b'], p['enc_bn1_g'], p['enc_bn1_b'], 'relu')
    out = _ref_linear(out, p['enc_fc2_w'], p['enc_fc2_b'], p['enc_bn2_g'], p['enc_bn2_b'], 'relu')
    h = _ref_linear(out, p['enc_fc3_w'], p['enc_fc3_b'], act='sigmoid')
    for i in range(4):
        h = _ref_nonlocal(h, p[f'nl{i}'])
    out = _ref_linear(h, p['dec_fc1_w'], p['dec_fc1_b'], p['dec_bn1_g'], p['dec_bn1_b'], 'relu')
    out = _ref_linear(out, p['dec_fc2_w'], p['dec_fc2_b'], act='relu')
    cls = _ref_linear(out, p['branch_fc1_w'], p['branch_fc1_b'])
    geo = _ref_linear(out, p['branch_fc2_w'], p['branch_fc2_b'])
    return jnp.concatenate([cls, geo], axis=2)


# ---------------------------------------------------------------------------
# Deterministic synthetic parameter init (shapes from Generator.__init__)
# ---------------------------------------------------------------------------
def init_params(key, F, CLS, E):
    C = max(E // 2, 1)                       # NLBlockND inter_channels
    keys = iter(jax.random.split(key, 128))

    def w(shape, scale=0.1):
        return scale * jax.random.normal(next(keys), shape, dtype=jnp.float32)

    p = {
        'enc_fc1_w': w((2 * F, F)),     'enc_fc1_b': w((2 * F,)),
        'enc_bn1_g': 1.0 + w((E,)),     'enc_bn1_b': w((E,)),
        'enc_fc2_w': w((4 * F, 2 * F)), 'enc_fc2_b': w((4 * F,)),
        'enc_bn2_g': 1.0 + w((E,)),     'enc_bn2_b': w((E,)),
        'enc_fc3_w': w((4 * F, 4 * F)), 'enc_fc3_b': w((4 * F,)),
        'dec_fc1_w': w((2 * F, 4 * F)), 'dec_fc1_b': w((2 * F,)),
        'dec_bn1_g': 1.0 + w((E,)),     'dec_bn1_b': w((E,)),
        'dec_fc2_w': w((F, 2 * F)),     'dec_fc2_b': w((F,)),
        'branch_fc1_w': w((CLS, F)),    'branch_fc1_b': w((CLS,)),
        'branch_fc2_w': w((F - CLS, F)), 'branch_fc2_b': w((F - CLS,)),
    }
    for i in range(4):
        p[f'nl{i}'] = {
            'g_w': w((C, E)),     'g_b': w((C,)),
            'theta_w': w((C, E)), 'theta_b': w((C,)),
            'phi_w': w((C, E)),   'phi_b': w((C,)),
            'wf_w': w((2 * C,)),  'wf_b': w((1,)),
            'wz_w': w((E, C)),    'wz_b': w((E,)),
            # NOTE: original NLBlockND zero-inits the W_z BatchNorm affine params
            # (making the block an identity at init); nonzero deterministic init
            # is used here so the full kernel path is numerically exercised.
            'bn_g': 1.0 + w((E,)), 'bn_b': w((E,)),
        }
    return p


if __name__ == "__main__":
    B, E, F, CLS = 2, 8, 32, 4     # batch, element_num, feature_size, class_num
    root = jax.random.PRNGKey(0)
    pkey, xkey = jax.random.split(root)
    params = init_params(pkey, F, CLS, E)
    x = jax.random.normal(xkey, (B, E, F), dtype=jnp.float32)

    res = jax.jit(generator_forward)(params, x)
    res = jax.block_until_ready(res)

    ref = reference_forward(params, x)
    assert res.shape == (B, E, F), res.shape
    assert bool(jnp.all(jnp.isfinite(res)))
    err = float(jnp.max(jnp.abs(res - ref)))
    # Tolerance covers bf16 MXU operands (both in the kernel and implicitly in
    # the default-precision reference), the W_f / 1-over-L folding reassociation,
    # the single-pass BN variance, and batch-norm small-variance amplification.
    assert err < 2e-2, f"max abs error {err}"
    print("KERNEL_OK")
</pallas_src>

<mosaic_0001>
module attributes {stable_mosaic.version = 11 : i64} {
  func.func @_generator_kernel(%arg0: i32, %arg1: memref<2x8x32xf32, #tpu.memory_space<vmem>>, %arg2: memref<448x128xf32, #tpu.memory_space<vmem>>, %arg3: memref<6x128xf32, #tpu.memory_space<vmem>>, %arg4: memref<3x2x8x1xf32, #tpu.memory_space<vmem>>, %arg5: memref<4x6x8xf32, #tpu.memory_space<vmem>>, %arg6: memref<4x6x128xf32, #tpu.memory_space<vmem>>, %arg7: memref<4x8x4xf32, #tpu.memory_space<vmem>>, %arg8: memref<4x8x128xf32, #tpu.memory_space<vmem>>, %arg9: memref<4x2x8x1xf32, #tpu.memory_space<vmem>>, %arg10: memref<2x8x32xf32, #tpu.memory_space<vmem>>) attributes {dimension_semantics = [#tpu.dimension_semantics<arbitrary>], iteration_bounds = array<i64: 1>, scalar_prefetch = 0 : i64, scratch_operands = 0 : i64, tpu.core_type = #tpu.core_type<tc>, window_params = [{pipeline_mode = #tpu.pipeline_mode<synchronous>, transform_indices = @transform_0, window_bounds = array<i64: 2, 8, 32>}, {pipeline_mode = #tpu.pipeline_mode<synchronous>, transform_indices = @transform_1, window_bounds = array<i64: 448, 128>}, {pipeline_mode = #tpu.pipeline_mode<synchronous>, transform_indices = @transform_2, window_bounds = array<i64: 6, 128>}, {pipeline_mode = #tpu.pipeline_mode<synchronous>, transform_indices = @transform_3, window_bounds = array<i64: 3, 2, 8, 1>}, {pipeline_mode = #tpu.pipeline_mode<synchronous>, transform_indices = @transform_4, window_bounds = array<i64: 4, 6, 8>}, {pipeline_mode = #tpu.pipeline_mode<synchronous>, transform_indices = @transform_5, window_bounds = array<i64: 4, 6, 128>}, {pipeline_mode = #tpu.pipeline_mode<synchronous>, transform_indices = @transform_6, window_bounds = array<i64: 4, 8, 4>}, {pipeline_mode = #tpu.pipeline_mode<synchronous>, transform_indices = @transform_7, window_bounds = array<i64: 4, 8, 128>}, {pipeline_mode = #tpu.pipeline_mode<synchronous>, transform_indices = @transform_8, window_bounds = array<i64: 4, 2, 8, 1>}, {pipeline_mode = #tpu.pipeline_mode<synchronous>, transform_indices = @transform_9, window_bounds = array<i64: 2, 8, 32>}]} {
    %c0 = arith.constant 0 : index
    %c0_0 = arith.constant 0 : index
    %c0_1 = arith.constant 0 : index
    %0 = vector.load %arg1[%c0, %c0_0, %c0_1] : memref<2x8x32xf32, #tpu.memory_space<vmem>>, vector<2x8x32xf32>
    %1 = vector.shape_cast %0 : vector<2x8x32xf32> to vector<16x32xf32>
    %c0_2 = arith.constant 0 : index
    %c0_3 = arith.constant 0 : index
    %2 = vector.load %arg2[%c0_2, %c0_3] : memref<448x128xf32, #tpu.memory_space<vmem>>, vector<32x64xf32>
    %cst = arith.constant dense<0.000000e+00> : vector<16x64xf32>
    %3 = tpu.matmul %1, %2, %cst {dimension_numbers = #tpu.dot_dimension_numbers<[1], [0], [0], [1], [0, 0, 1, 1], [], []>} : vector<16x32xf32>, vector<32x64xf32>, vector<16x64xf32> -> vector<16x64xf32>
    %c0_4 = arith.constant 0 : index
    %c0_5 = arith.constant 0 : index
    %4 = vector.load %arg3[%c0_4, %c0_5] : memref<6x128xf32, #tpu.memory_space<vmem>>, vector<1x64xf32>
    %5 = vector.broadcast %4 : vector<1x64xf32> to vector<16x64xf32>
    %6 = arith.addf %3, %5 : vector<16x64xf32>
    %7 = vector.shape_cast %6 : vector<16x64xf32> to vector<2x8x64xf32>
    %c0_6 = arith.constant 0 : index
    %c0_7 = arith.constant 0 : index
    %c0_8 = arith.constant 0 : index
    %c0_9 = arith.constant 0 : index
    %8 = vector.load %arg4[%c0_6, %c0_7, %c0_8, %c0_9] : memref<3x2x8x1xf32, #tpu.memory_space<vmem>>, vector<1x1x8x1xf32>
    %9 = vector.shape_cast %8 : vector<1x1x8x1xf32> to vector<8x1xf32>
    %c0_10 = arith.constant 0 : index
    %c1 = arith.constant 1 : index
    %c0_11 = arith.constant 0 : index
    %c0_12 = arith.constant 0 : index
    %10 = vector.load %arg4[%c0_10, %c1, %c0_11, %c0_12] : memref<3x2x8x1xf32, #tpu.memory_space<vmem>>, vector<1x1x8x1xf32>
    %11 = vector.shape_cast %10 : vector<1x1x8x1xf32> to vector<8x1xf32>
    %cst_13 = arith.constant dense<0.000000e+00> : vector<8xf32>
    %12 = vector.multi_reduction <add>, %7, %cst_13 [0, 2] : vector<2x8x64xf32> to vector<8xf32>
    %13 = vector.shape_cast %12 : vector<8xf32> to vector<1x8x1xf32>
    %14 = arith.mulf %7, %7 : vector<2x8x64xf32>
    %cst_14 = arith.constant dense<0.000000e+00> : vector<8xf32>
    %15 = vector.multi_reduction <add>, %14, %cst_14 [0, 2] : vector<2x8x64xf32> to vector<8xf32>
    %16 = vector.shape_cast %15 : vector<8xf32> to vector<1x8x1xf32>
    %cst_15 = arith.constant 7.812500e-03 : f32
    %17 = vector.broadcast %cst_15 : f32 to vector<1x8x1xf32>
    %18 = arith.mulf %13, %17 : vector<1x8x1xf32>
    %cst_16 = arith.constant 7.812500e-03 : f32
    %19 = vector.broadcast %cst_16 : f32 to vector<1x8x1xf32>
    %20 = arith.mulf %16, %19 : vector<1x8x1xf32>
    %21 = arith.mulf %18, %18 : vector<1x8x1xf32>
    %22 = arith.subf %20, %21 : vector<1x8x1xf32>
    %cst_17 = arith.constant 9.99999974E-6 : f32
    %23 = vector.broadcast %cst_17 : f32 to vector<1x8x1xf32>
    %24 = arith.addf %22, %23 : vector<1x8x1xf32>
    %25 = math.rsqrt %24 : vector<1x8x1xf32>
    %26 = vector.shape_cast %9 : vector<8x1xf32> to vector<1x8x1xf32>
    %27 = arith.mulf %26, %25 : vector<1x8x1xf32>
    %28 = arith.mulf %18, %27 : vector<1x8x1xf32>
    %29 = vector.shape_cast %11 : vector<8x1xf32> to vector<1x8x1xf32>
    %30 = arith.subf %29, %28 : vector<1x8x1xf32>
    %31 = vector.broadcast %27 : vector<1x8x1xf32> to vector<2x8x64xf32>
    %32 = arith.mulf %7, %31 : vector<2x8x64xf32>
    %33 = vector.broadcast %30 : vector<1x8x1xf32> to vector<2x8x64xf32>
    %34 = arith.addf %32, %33 : vector<2x8x64xf32>
    %cst_18 = arith.constant 0.000000e+00 : f32
    %35 = vector.broadcast %cst_18 : f32 to vector<2x8x64xf32>
    %36 = arith.maximumf %34, %35 : vector<2x8x64xf32>
    %37 = vector.shape_cast %36 : vector<2x8x64xf32> to vector<16x64xf32>
    %c32 = arith.constant 32 : index
    %c0_19 = arith.constant 0 : index
    %38 = vector.load %arg2[%c32, %c0_19] : memref<448x128xf32, #tpu.memory_space<vmem>>, vector<64x128xf32>
    %cst_20 = arith.constant dense<0.000000e+00> : vector<16x128xf32>
    %39 = tpu.matmul %37, %38, %cst_20 {dimension_numbers = #tpu.dot_dimension_numbers<[1], [0], [0], [1], [0, 0, 1, 1], [], []>} : vector<16x64xf32>, vector<64x128xf32>, vector<16x128xf32> -> vector<16x128xf32>
    %c1_21 = arith.constant 1 : index
    %c0_22 = arith.constant 0 : index
    %40 = vector.load %arg3[%c1_21, %c0_22] : memref<6x128xf32, #tpu.memory_space<vmem>>, vector<1x128xf32>
    %41 = vector.broadcast %40 : vector<1x128xf32> to vector<16x128xf32>
    %42 = arith.addf %39, %41 : vector<16x128xf32>
    %43 = vector.shape_cast %42 : vector<16x128xf32> to vector<2x8x128xf32>
    %c1_23 = arith.constant 1 : index
    %c0_24 = arith.constant 0 : index
    %c0_25 = arith.constant 0 : index
    %c0_26 = arith.constant 0 : index
    %44 = vector.load %arg4[%c1_23, %c0_24, %c0_25, %c0_26] : memref<3x2x8x1xf32, #tpu.memory_space<vmem>>, vector<1x1x8x1xf32>
    %45 = vector.shape_cast %44 : vector<1x1x8x1xf32> to vector<8x1xf32>
    %c1_27 = arith.constant 1 : index
    %c1_28 = arith.constant 1 : index
    %c0_29 = arith.constant 0 : index
    %c0_30 = arith.constant 0 : index
    %46 = vector.load %arg4[%c1_27, %c1_28, %c0_29, %c0_30] : memref<3x2x8x1xf32, #tpu.memory_space<vmem>>, vector<1x1x8x1xf32>
    %47 = vector.shape_cast %46 : vector<1x1x8x1xf32> to vector<8x1xf32>
    %cst_31 = arith.constant dense<0.000000e+00> : vector<8xf32>
    %48 = vector.multi_reduction <add>, %43, %cst_31 [0, 2] : vector<2x8x128xf32> to vector<8xf32>
    %49 = vector.shape_cast %48 : vector<8xf32> to vector<1x8x1xf32>
    %50 = arith.mulf %43, %43 : vector<2x8x128xf32>
    %cst_32 = arith.constant dense<0.000000e+00> : vector<8xf32>
    %51 = vector.multi_reduction <add>, %50, %cst_32 [0, 2] : vector<2x8x128xf32> to vector<8xf32>
    %52 = vector.shape_cast %51 : vector<8xf32> to vector<1x8x1xf32>
    %cst_33 = arith.constant 3.906250e-03 : f32
    %53 = vector.broadcast %cst_33 : f32 to vector<1x8x1xf32>
    %54 = arith.mulf %49, %53 : vector<1x8x1xf32>
    %cst_34 = arith.constant 3.906250e-03 : f32
    %55 = vector.broadcast %cst_34 : f32 to vector<1x8x1xf32>
    %56 = arith.mulf %52, %55 : vector<1x8x1xf32>
    %57 = arith.mulf %54, %54 : vector<1x8x1xf32>
    %58 = arith.subf %56, %57 : vector<1x8x1xf32>
    %cst_35 = arith.constant 9.99999974E-6 : f32
    %59 = vector.broadcast %cst_35 : f32 to vector<1x8x1xf32>
    %60 = arith.addf %58, %59 : vector<1x8x1xf32>
    %61 = math.rsqrt %60 : vector<1x8x1xf32>
    %62 = vector.shape_cast %45 : vector<8x1xf32> to vector<1x8x1xf32>
    %63 = arith.mulf %62, %61 : vector<1x8x1xf32>
    %64 = arith.mulf %54, %63 : vector<1x8x1xf32>
    %65 = vector.shape_cast %47 : vector<8x1xf32> to vector<1x8x1xf32>
    %66 = arith.subf %65, %64 : vector<1x8x1xf32>
    %67 = vector.broadcast %63 : vector<1x8x1xf32> to vector<2x8x128xf32>
    %68 = arith.mulf %43, %67 : vector<2x8x128xf32>
    %69 = vector.broadcast %66 : vector<1x8x1xf32> to vector<2x8x128xf32>
    %70 = arith.addf %68, %69 : vector<2x8x128xf32>
    %cst_36 = arith.constant 0.000000e+00 : f32
    %71 = vector.broadcast %cst_36 : f32 to vector<2x8x128xf32>
    %72 = arith.maximumf %70, %71 : vector<2x8x128xf32>
    %73 = vector.shape_cast %72 : vector<2x8x128xf32> to vector<16x128xf32>
    %c96 = arith.constant 96 : index
    %c0_37 = arith.constant 0 : index
    %74 = vector.load %arg2[%c96, %c0_37] : memref<448x128xf32, #tpu.memory_space<vmem>>, vector<128x128xf32>
    %cst_38 = arith.constant dense<0.000000e+00> : vector<16x128xf32>
    %75 = tpu.matmul %73, %74, %cst_38 {dimension_numbers = #tpu.dot_dimension_numbers<[1], [0], [0], [1], [0, 0, 1, 1], [], []>} : vector<16x128xf32>, vector<128x128xf32>, vector<16x128xf32> -> vector<16x128xf32>
    %c2 = arith.constant 2 : index
    %c0_39 = arith.constant 0 : index
    %76 = vector.load %arg3[%c2, %c0_39] : memref<6x128xf32, #tpu.memory_space<vmem>>, vector<1x128xf32>
    %77 = vector.broadcast %76 : vector<1x128xf32> to vector<16x128xf32>
    %78 = arith.addf %75, %77 : vector<16x128xf32>
    %79 = vector.shape_cast %78 : vector<16x128xf32> to vector<2x8x128xf32>
    %80 = arith.negf %79 : vector<2x8x128xf32>
    %81 = math.exp %80 : vector<2x8x128xf32>
    %cst_40 = arith.constant 1.000000e+00 : f32
    %82 = vector.broadcast %cst_40 : f32 to vector<2x8x128xf32>
    %83 = arith.addf %82, %81 : vector<2x8x128xf32>
    %84 = arith.divf %82, %83 : vector<2x8x128xf32>
    %c0_41 = arith.constant 0 : index
    %c0_42 = arith.constant 0 : index
    %c0_43 = arith.constant 0 : index
    %85 = vector.load %arg5[%c0_41, %c0_42, %c0_43] : memref<4x6x8xf32, #tpu.memory_space<vmem>>, vector<1x6x8xf32>
    %86 = vector.shape_cast %85 : vector<1x6x8xf32> to vector<6x8xf32>
    %87 = vector.shape_cast %86 : vector<6x8xf32> to vector<1x6x8xf32>
    %88 = vector.broadcast %87 : vector<1x6x8xf32> to vector<2x6x8xf32>
    %cst_44 = arith.constant dense<0.000000e+00> : vector<2x6x128xf32>
    %89 = tpu.matmul %88, %84, %cst_44 {dimension_numbers = #tpu.dot_dimension_numbers<[2], [1], [1], [2], [0, 0, 0, 1, 1, 2], [0], [0]>} : vector<2x6x8xf32>, vector<2x8x128xf32>, vector<2x6x128xf32> -> vector<2x6x128xf32>
    %c0_45 = arith.constant 0 : index
    %c0_46 = arith.constant 0 : index
    %c0_47 = arith.constant 0 : index
    %90 = vector.load %arg6[%c0_45, %c0_46, %c0_47] : memref<4x6x128xf32, #tpu.memory_space<vmem>>, vector<1x6x128xf32>
    %91 = vector.shape_cast %90 : vector<1x6x128xf32> to vector<6x128xf32>
    %92 = vector.shape_cast %91 : vector<6x128xf32> to vector<1x6x128xf32>
    %93 = vector.broadcast %92 : vector<1x6x128xf32> to vector<2x6x128xf32>
    %94 = arith.addf %89, %93 : vector<2x6x128xf32>
    %95 = vector.extract_strided_slice %94 {offsets = [0, 0, 0], sizes = [2, 4, 128], strides = [1, 1, 1]} : vector<2x6x128xf32> to vector<2x4x128xf32>
    %96 = arith.truncf %95 : vector<2x4x128xf32> to vector<2x4x128xbf16>
    %97 = vector.extract_strided_slice %94 {offsets = [0, 4, 0], sizes = [2, 1, 128], strides = [1, 1, 1]} : vector<2x6x128xf32> to vector<2x1x128xf32>
    %98 = vector.shape_cast %97 : vector<2x1x128xf32> to vector<2x128xf32>
    %99 = vector.extract_strided_slice %94 {offsets = [0, 5, 0], sizes = [2, 1, 128], strides = [1, 1, 1]} : vector<2x6x128xf32> to vector<2x1x128xf32>
    %100 = vector.shape_cast %99 : vector<2x1x128xf32> to vector<2x128xf32>
    %101 = vector.shape_cast %100 : vector<2x128xf32> to vector<2x128x1xf32>
    %102 = vector.shape_cast %98 : vector<2x128xf32> to vector<2x1x128xf32>
    %103 = vector.broadcast %101 : vector<2x128x1xf32> to vector<2x128x128xf32>
    %104 = vector.broadcast %102 : vector<2x1x128xf32> to vector<2x128x128xf32>
    %105 = arith.addf %103, %104 : vector<2x128x128xf32>
    %cst_48 = arith.constant 0.000000e+00 : f32
    %106 = vector.broadcast %cst_48 : f32 to vector<2x128x128xf32>
    %107 = arith.maximumf %105, %106 : vector<2x128x128xf32>
    %108 = arith.truncf %107 : vector<2x128x128xf32> to vector<2x128x128xbf16>
    %cst_49 = arith.constant dense<0.000000e+00> : vector<2x4x128xf32>
    %109 = tpu.matmul %96, %108, %cst_49 {dimension_numbers = #tpu.dot_dimension_numbers<[2], [1], [1], [2], [0, 0, 0, 1, 1, 2], [0], [0]>} : vector<2x4x128xbf16>, vector<2x128x128xbf16>, vector<2x4x128xf32> -> vector<2x4x128xf32>
    %c0_50 = arith.constant 0 : index
    %c0_51 = arith.constant 0 : index
    %c0_52 = arith.constant 0 : index
    %110 = vector.load %arg7[%c0_50, %c0_51, %c0_52] : memref<4x8x4xf32, #tpu.memory_space<vmem>>, vector<1x8x4xf32>
    %111 = vector.shape_cast %110 : vector<1x8x4xf32> to vector<8x4xf32>
    %112 = vector.shape_cast %111 : vector<8x4xf32> to vector<1x8x4xf32>
    %113 = vector.broadcast %112 : vector<1x8x4xf32> to vector<2x8x4xf32>
    %cst_53 = arith.constant dense<0.000000e+00> : vector<2x8x128xf32>
    %114 = tpu.matmul %113, %109, %cst_53 {dimension_numbers = #tpu.dot_dimension_numbers<[2], [1], [1], [2], [0, 0, 0, 1, 1, 2], [0], [0]>} : vector<2x8x4xf32>, vector<2x4x128xf32>, vector<2x8x128xf32> -> vector<2x8x128xf32>
    %c0_54 = arith.constant 0 : index
    %c0_55 = arith.constant 0 : index
    %c0_56 = arith.constant 0 : index
    %115 = vector.load %arg8[%c0_54, %c0_55, %c0_56] : memref<4x8x128xf32, #tpu.memory_space<vmem>>, vector<1x8x128xf32>
    %116 = vector.shape_cast %115 : vector<1x8x128xf32> to vector<8x128xf32>
    %117 = vector.shape_cast %116 : vector<8x128xf32> to vector<1x8x128xf32>
    %118 = vector.broadcast %117 : vector<1x8x128xf32> to vector<2x8x128xf32>
    %119 = arith.addf %114, %118 : vector<2x8x128xf32>
    %c0_57 = arith.constant 0 : index
    %c0_58 = arith.constant 0 : index
    %c0_59 = arith.constant 0 : index
    %c0_60 = arith.constant 0 : index
    %120 = vector.load %arg9[%c0_57, %c0_58, %c0_59, %c0_60] : memref<4x2x8x1xf32, #tpu.memory_space<vmem>>, vector<1x1x8x1xf32>
    %121 = vector.shape_cast %120 : vector<1x1x8x1xf32> to vector<8x1xf32>
    %c0_61 = arith.constant 0 : index
    %c1_62 = arith.constant 1 : index
    %c0_63 = arith.constant 0 : index
    %c0_64 = arith.constant 0 : index
    %122 = vector.load %arg9[%c0_61, %c1_62, %c0_63, %c0_64] : memref<4x2x8x1xf32, #tpu.memory_space<vmem>>, vector<1x1x8x1xf32>
    %123 = vector.shape_cast %122 : vector<1x1x8x1xf32> to vector<8x1xf32>
    %cst_65 = arith.constant dense<0.000000e+00> : vector<8xf32>
    %124 = vector.multi_reduction <add>, %119, %cst_65 [0, 2] : vector<2x8x128xf32> to vector<8xf32>
    %125 = vector.shape_cast %124 : vector<8xf32> to vector<1x8x1xf32>
    %126 = arith.mulf %119, %119 : vector<2x8x128xf32>
    %cst_66 = arith.constant dense<0.000000e+00> : vector<8xf32>
    %127 = vector.multi_reduction <add>, %126, %cst_66 [0, 2] : vector<2x8x128xf32> to vector<8xf32>
    %128 = vector.shape_cast %127 : vector<8xf32> to vector<1x8x1xf32>
    %cst_67 = arith.constant 3.906250e-03 : f32
    %129 = vector.broadcast %cst_67 : f32 to vector<1x8x1xf32>
    %130 = arith.mulf %125, %129 : vector<1x8x1xf32>
    %cst_68 = arith.constant 3.906250e-03 : f32
    %131 = vector.broadcast %cst_68 : f32 to vector<1x8x1xf32>
    %132 = arith.mulf %128, %131 : vector<1x8x1xf32>
    %133 = arith.mulf %130, %130 : vector<1x8x1xf32>
    %134 = arith.subf %132, %133 : vector<1x8x1xf32>
    %cst_69 = arith.constant 9.99999974E-6 : f32
    %135 = vector.broadcast %cst_69 : f32 to vector<1x8x1xf32>
    %136 = arith.addf %134, %135 : vector<1x8x1xf32>
    %137 = math.rsqrt %136 : vector<1x8x1xf32>
    %138 = vector.shape_cast %121 : vector<8x1xf32> to vector<1x8x1xf32>
    %139 = arith.mulf %138, %137 : vector<1x8x1xf32>
    %140 = arith.mulf %130, %139 : vector<1x8x1xf32>
    %141 = vector.shape_cast %123 : vector<8x1xf32> to vector<1x8x1xf32>
    %142 = arith.subf %141, %140 : vector<1x8x1xf32>
    %143 = vector.broadcast %139 : vector<1x8x1xf32> to vector<2x8x128xf32>
    %144 = arith.mulf %119, %143 : vector<2x8x128xf32>
    %145 = vector.broadcast %142 : vector<1x8x1xf32> to vector<2x8x128xf32>
    %146 = arith.addf %144, %145 : vector<2x8x128xf32>
    %147 = arith.addf %146, %84 : vector<2x8x128xf32>
    %c1_70 = arith.constant 1 : index
    %c0_71 = arith.constant 0 : index
    %c0_72 = arith.constant 0 : index
    %148 = vector.load %arg5[%c1_70, %c0_71, %c0_72] : memref<4x6x8xf32, #tpu.memory_space<vmem>>, vector<1x6x8xf32>
    %149 = vector.shape_cast %148 : vector<1x6x8xf32> to vector<6x8xf32>
    %150 = vector.shape_cast %149 : vector<6x8xf32> to vector<1x6x8xf32>
    %151 = vector.broadcast %150 : vector<1x6x8xf32> to vector<2x6x8xf32>
    %cst_73 = arith.constant dense<0.000000e+00> : vector<2x6x128xf32>
    %152 = tpu.matmul %151, %147, %cst_73 {dimension_numbers = #tpu.dot_dimension_numbers<[2], [1], [1], [2], [0, 0, 0, 1, 1, 2], [0], [0]>} : vector<2x6x8xf32>, vector<2x8x128xf32>, vector<2x6x128xf32> -> vector<2x6x128xf32>
    %c1_74 = arith.constant 1 : index
    %c0_75 = arith.constant 0 : index
    %c0_76 = arith.constant 0 : index
    %153 = vector.load %arg6[%c1_74, %c0_75, %c0_76] : memref<4x6x128xf32, #tpu.memory_space<vmem>>, vector<1x6x128xf32>
    %154 = vector.shape_cast %153 : vector<1x6x128xf32> to vector<6x128xf32>
    %155 = vector.shape_cast %154 : vector<6x128xf32> to vector<1x6x128xf32>
    %156 = vector.broadcast %155 : vector<1x6x128xf32> to vector<2x6x128xf32>
    %157 = arith.addf %152, %156 : vector<2x6x128xf32>
    %158 = vector.extract_strided_slice %157 {offsets = [0, 0, 0], sizes = [2, 4, 128], strides = [1, 1, 1]} : vector<2x6x128xf32> to vector<2x4x128xf32>
    %159 = arith.truncf %158 : vector<2x4x128xf32> to vector<2x4x128xbf16>
    %160 = vector.extract_strided_slice %157 {offsets = [0, 4, 0], sizes = [2, 1, 128], strides = [1, 1, 1]} : vector<2x6x128xf32> to vector<2x1x128xf32>
    %161 = vector.shape_cast %160 : vector<2x1x128xf32> to vector<2x128xf32>
    %162 = vector.extract_strided_slice %157 {offsets = [0, 5, 0], sizes = [2, 1, 128], strides = [1, 1, 1]} : vector<2x6x128xf32> to vector<2x1x128xf32>
    %163 = vector.shape_cast %162 : vector<2x1x128xf32> to vector<2x128xf32>
    %164 = vector.shape_cast %163 : vector<2x128xf32> to vector<2x128x1xf32>
    %165 = vector.shape_cast %161 : vector<2x128xf32> to vector<2x1x128xf32>
    %166 = vector.broadcast %164 : vector<2x128x1xf32> to vector<2x128x128xf32>
    %167 = vector.broadcast %165 : vector<2x1x128xf32> to vector<2x128x128xf32>
    %168 = arith.addf %166, %167 : vector<2x128x128xf32>
    %cst_77 = arith.constant 0.000000e+00 : f32
    %169 = vector.broadcast %cst_77 : f32 to vector<2x128x128xf32>
    %170 = arith.maximumf %168, %169 : vector<2x128x128xf32>
    %171 = arith.truncf %170 : vector<2x128x128xf32> to vector<2x128x128xbf16>
    %cst_78 = arith.constant dense<0.000000e+00> : vector<2x4x128xf32>
    %172 = tpu.matmul %159, %171, %cst_78 {dimension_numbers = #tpu.dot_dimension_numbers<[2], [1], [1], [2], [0, 0, 0, 1, 1, 2], [0], [0]>} : vector<2x4x128xbf16>, vector<2x128x128xbf16>, vector<2x4x128xf32> -> vector<2x4x128xf32>
    %c1_79 = arith.constant 1 : index
    %c0_80 = arith.constant 0 : index
    %c0_81 = arith.constant 0 : index
    %173 = vector.load %arg7[%c1_79, %c0_80, %c0_81] : memref<4x8x4xf32, #tpu.memory_space<vmem>>, vector<1x8x4xf32>
    %174 = vector.shape_cast %173 : vector<1x8x4xf32> to vector<8x4xf32>
    %175 = vector.shape_cast %174 : vector<8x4xf32> to vector<1x8x4xf32>
    %176 = vector.broadcast %175 : vector<1x8x4xf32> to vector<2x8x4xf32>
    %cst_82 = arith.constant dense<0.000000e+00> : vector<2x8x128xf32>
    %177 = tpu.matmul %176, %172, %cst_82 {dimension_numbers = #tpu.dot_dimension_numbers<[2], [1], [1], [2], [0, 0, 0, 1, 1, 2], [0], [0]>} : vector<2x8x4xf32>, vector<2x4x128xf32>, vector<2x8x128xf32> -> vector<2x8x128xf32>
    %c1_83 = arith.constant 1 : index
    %c0_84 = arith.constant 0 : index
    %c0_85 = arith.constant 0 : index
    %178 = vector.load %arg8[%c1_83, %c0_84, %c0_85] : memref<4x8x128xf32, #tpu.memory_space<vmem>>, vector<1x8x128xf32>
    %179 = vector.shape_cast %178 : vector<1x8x128xf32> to vector<8x128xf32>
    %180 = vector.shape_cast %179 : vector<8x128xf32> to vector<1x8x128xf32>
    %181 = vector.broadcast %180 : vector<1x8x128xf32> to vector<2x8x128xf32>
    %182 = arith.addf %177, %181 : vector<2x8x128xf32>
    %c1_86 = arith.constant 1 : index
    %c0_87 = arith.constant 0 : index
    %c0_88 = arith.constant 0 : index
    %c0_89 = arith.constant 0 : index
    %183 = vector.load %arg9[%c1_86, %c0_87, %c0_88, %c0_89] : memref<4x2x8x1xf32, #tpu.memory_space<vmem>>, vector<1x1x8x1xf32>
    %184 = vector.shape_cast %183 : vector<1x1x8x1xf32> to vector<8x1xf32>
    %c1_90 = arith.constant 1 : index
    %c1_91 = arith.constant 1 : index
    %c0_92 = arith.constant 0 : index
    %c0_93 = arith.constant 0 : index
    %185 = vector.load %arg9[%c1_90, %c1_91, %c0_92, %c0_93] : memref<4x2x8x1xf32, #tpu.memory_space<vmem>>, vector<1x1x8x1xf32>
    %186 = vector.shape_cast %185 : vector<1x1x8x1xf32> to vector<8x1xf32>
    %cst_94 = arith.constant dense<0.000000e+00> : vector<8xf32>
    %187 = vector.multi_reduction <add>, %182, %cst_94 [0, 2] : vector<2x8x128xf32> to vector<8xf32>
    %188 = vector.shape_cast %187 : vector<8xf32> to vector<1x8x1xf32>
    %189 = arith.mulf %182, %182 : vector<2x8x128xf32>
    %cst_95 = arith.constant dense<0.000000e+00> : vector<8xf32>
    %190 = vector.multi_reduction <add>, %189, %cst_95 [0, 2] : vector<2x8x128xf32> to vector<8xf32>
    %191 = vector.shape_cast %190 : vector<8xf32> to vector<1x8x1xf32>
    %cst_96 = arith.constant 3.906250e-03 : f32
    %192 = vector.broadcast %cst_96 : f32 to vector<1x8x1xf32>
    %193 = arith.mulf %188, %192 : vector<1x8x1xf32>
    %cst_97 = arith.constant 3.906250e-03 : f32
    %194 = vector.broadcast %cst_97 : f32 to vector<1x8x1xf32>
    %195 = arith.mulf %191, %194 : vector<1x8x1xf32>
    %196 = arith.mulf %193, %193 : vector<1x8x1xf32>
    %197 = arith.subf %195, %196 : vector<1x8x1xf32>
    %cst_98 = arith.constant 9.99999974E-6 : f32
    %198 = vector.broadcast %cst_98 : f32 to vector<1x8x1xf32>
    %199 = arith.addf %197, %198 : vector<1x8x1xf32>
    %200 = math.rsqrt %199 : vector<1x8x1xf32>
    %201 = vector.shape_cast %184 : vector<8x1xf32> to vector<1x8x1xf32>
    %202 = arith.mulf %201, %200 : vector<1x8x1xf32>
    %203 = arith.mulf %193, %202 : vector<1x8x1xf32>
    %204 = vector.shape_cast %186 : vector<8x1xf32> to vector<1x8x1xf32>
    %205 = arith.subf %204, %203 : vector<1x8x1xf32>
    %206 = vector.broadcast %202 : vector<1x8x1xf32> to vector<2x8x128xf32>
    %207 = arith.mulf %182, %206 : vector<2x8x128xf32>
    %208 = vector.broadcast %205 : vector<1x8x1xf32> to vector<2x8x128xf32>
    %209 = arith.addf %207, %208 : vector<2x8x128xf32>
    %210 = arith.addf %209, %147 : vector<2x8x128xf32>
    %c2_99 = arith.constant 2 : index
    %c0_100 = arith.constant 0 : index
    %c0_101 = arith.constant 0 : index
    %211 = vector.load %arg5[%c2_99, %c0_100, %c0_101] : memref<4x6x8xf32, #tpu.memory_space<vmem>>, vector<1x6x8xf32>
    %212 = vector.shape_cast %211 : vector<1x6x8xf32> to vector<6x8xf32>
    %213 = vector.shape_cast %212 : vector<6x8xf32> to vector<1x6x8xf32>
    %214 = vector.broadcast %213 : vector<1x6x8xf32> to vector<2x6x8xf32>
    %cst_102 = arith.constant dense<0.000000e+00> : vector<2x6x128xf32>
    %215 = tpu.matmul %214, %210, %cst_102 {dimension_numbers = #tpu.dot_dimension_numbers<[2], [1], [1], [2], [0, 0, 0, 1, 1, 2], [0], [0]>} : vector<2x6x8xf32>, vector<2x8x128xf32>, vector<2x6x128xf32> -> vector<2x6x128xf32>
    %c2_103 = arith.constant 2 : index
    %c0_104 = arith.constant 0 : index
    %c0_105 = arith.constant 0 : index
    %216 = vector.load %arg6[%c2_103, %c0_104, %c0_105] : memref<4x6x128xf32, #tpu.memory_space<vmem>>, vector<1x6x128xf32>
    %217 = vector.shape_cast %216 : vector<1x6x128xf32> to vector<6x128xf32>
    %218 = vector.shape_cast %217 : vector<6x128xf32> to vector<1x6x128xf32>
    %219 = vector.broadcast %218 : vector<1x6x128xf32> to vector<2x6x128xf32>
    %220 = arith.addf %215, %219 : vector<2x6x128xf32>
    %221 = vector.extract_strided_slice %220 {offsets = [0, 0, 0], sizes = [2, 4, 128], strides = [1, 1, 1]} : vector<2x6x128xf32> to vector<2x4x128xf32>
    %222 = arith.truncf %221 : vector<2x4x128xf32> to vector<2x4x128xbf16>
    %223 = vector.extract_strided_slice %220 {offsets = [0, 4, 0], sizes = [2, 1, 128], strides = [1, 1, 1]} : vector<2x6x128xf32> to vector<2x1x128xf32>
    %224 = vector.shape_cast %223 : vector<2x1x128xf32> to vector<2x128xf32>
    %225 = vector.extract_strided_slice %220 {offsets = [0, 5, 0], sizes = [2, 1, 128], strides = [1, 1, 1]} : vector<2x6x128xf32> to vector<2x1x128xf32>
    %226 = vector.shape_cast %225 : vector<2x1x128xf32> to vector<2x128xf32>
    %227 = vector.shape_cast %226 : vector<2x128xf32> to vector<2x128x1xf32>
    %228 = vector.shape_cast %224 : vector<2x128xf32> to vector<2x1x128xf32>
    %229 = vector.broadcast %227 : vector<2x128x1xf32> to vector<2x128x128xf32>
    %230 = vector.broadcast %228 : vector<2x1x128xf32> to vector<2x128x128xf32>
    %231 = arith.addf %229, %230 : vector<2x128x128xf32>
    %cst_106 = arith.constant 0.000000e+00 : f32
    %232 = vector.broadcast %cst_106 : f32 to vector<2x128x128xf32>
    %233 = arith.maximumf %231, %232 : vector<2x128x128xf32>
    %234 = arith.truncf %233 : vector<2x128x128xf32> to vector<2x128x128xbf16>
    %cst_107 = arith.constant dense<0.000000e+00> : vector<2x4x128xf32>
    %235 = tpu.matmul %222, %234, %cst_107 {dimension_numbers = #tpu.dot_dimension_numbers<[2], [1], [1], [2], [0, 0, 0, 1, 1, 2], [0], [0]>} : vector<2x4x128xbf16>, vector<2x128x128xbf16>, vector<2x4x128xf32> -> vector<2x4x128xf32>
    %c2_108 = arith.constant 2 : index
    %c0_109 = arith.constant 0 : index
    %c0_110 = arith.constant 0 : index
    %236 = vector.load %arg7[%c2_108, %c0_109, %c0_110] : memref<4x8x4xf32, #tpu.memory_space<vmem>>, vector<1x8x4xf32>
    %237 = vector.shape_cast %236 : vector<1x8x4xf32> to vector<8x4xf32>
    %238 = vector.shape_cast %237 : vector<8x4xf32> to vector<1x8x4xf32>
    %239 = vector.broadcast %238 : vector<1x8x4xf32> to vector<2x8x4xf32>
    %cst_111 = arith.constant dense<0.000000e+00> : vector<2x8x128xf32>
    %240 = tpu.matmul %239, %235, %cst_111 {dimension_numbers = #tpu.dot_dimension_numbers<[2], [1], [1], [2], [0, 0, 0, 1, 1, 2], [0], [0]>} : vector<2x8x4xf32>, vector<2x4x128xf32>, vector<2x8x128xf32> -> vector<2x8x128xf32>
    %c2_112 = arith.constant 2 : index
    %c0_113 = arith.constant 0 : index
    %c0_114 = arith.constant 0 : index
    %241 = vector.load %arg8[%c2_112, %c0_113, %c0_114] : memref<4x8x128xf32, #tpu.memory_space<vmem>>, vector<1x8x128xf32>
    %242 = vector.shape_cast %241 : vector<1x8x128xf32> to vector<8x128xf32>
    %243 = vector.shape_cast %242 : vector<8x128xf32> to vector<1x8x128xf32>
    %244 = vector.broadcast %243 : vector<1x8x128xf32> to vector<2x8x128xf32>
    %245 = arith.addf %240, %244 : vector<2x8x128xf32>
    %c2_115 = arith.constant 2 : index
    %c0_116 = arith.constant 0 : index
    %c0_117 = arith.constant 0 : index
    %c0_118 = arith.constant 0 : index
    %246 = vector.load %arg9[%c2_115, %c0_116, %c0_117, %c0_118] : memref<4x2x8x1xf32, #tpu.memory_space<vmem>>, vector<1x1x8x1xf32>
    %247 = vector.shape_cast %246 : vector<1x1x8x1xf32> to vector<8x1xf32>
    %c2_119 = arith.constant 2 : index
    %c1_120 = arith.constant 1 : index
    %c0_121 = arith.constant 0 : index
    %c0_122 = arith.constant 0 : index
    %248 = vector.load %arg9[%c2_119, %c1_120, %c0_121, %c0_122] : memref<4x2x8x1xf32, #tpu.memory_space<vmem>>, vector<1x1x8x1xf32>
    %249 = vector.shape_cast %248 : vector<1x1x8x1xf32> to vector<8x1xf32>
    %cst_123 = arith.constant dense<0.000000e+00> : vector<8xf32>
    %250 = vector.multi_reduction <add>, %245, %cst_123 [0, 2] : vector<2x8x128xf32> to vector<8xf32>
    %251 = vector.shape_cast %250 : vector<8xf32> to vector<1x8x1xf32>
    %252 = arith.mulf %245, %245 : vector<2x8x128xf32>
    %cst_124 = arith.constant dense<0.000000e+00> : vector<8xf32>
    %253 = vector.multi_reduction <add>, %252, %cst_124 [0, 2] : vector<2x8x128xf32> to vector<8xf32>
    %254 = vector.shape_cast %253 : vector<8xf32> to vector<1x8x1xf32>
    %cst_125 = arith.constant 3.906250e-03 : f32
    %255 = vector.broadcast %cst_125 : f32 to vector<1x8x1xf32>
    %256 = arith.mulf %251, %255 : vector<1x8x1xf32>
    %cst_126 = arith.constant 3.906250e-03 : f32
    %257 = vector.broadcast %cst_126 : f32 to vector<1x8x1xf32>
    %258 = arith.mulf %254, %257 : vector<1x8x1xf32>
    %259 = arith.mulf %256, %256 : vector<1x8x1xf32>
    %260 = arith.subf %258, %259 : vector<1x8x1xf32>
    %cst_127 = arith.constant 9.99999974E-6 : f32
    %261 = vector.broadcast %cst_127 : f32 to vector<1x8x1xf32>
    %262 = arith.addf %260, %261 : vector<1x8x1xf32>
    %263 = math.rsqrt %262 : vector<1x8x1xf32>
    %264 = vector.shape_cast %247 : vector<8x1xf32> to vector<1x8x1xf32>
    %265 = arith.mulf %264, %263 : vector<1x8x1xf32>
    %266 = arith.mulf %256, %265 : vector<1x8x1xf32>
    %267 = vector.shape_cast %249 : vector<8x1xf32> to vector<1x8x1xf32>
    %268 = arith.subf %267, %266 : vector<1x8x1xf32>
    %269 = vector.broadcast %265 : vector<1x8x1xf32> to vector<2x8x128xf32>
    %270 = arith.mulf %245, %269 : vector<2x8x128xf32>
    %271 = vector.broadcast %268 : vector<1x8x1xf32> to vector<2x8x128xf32>
    %272 = arith.addf %270, %271 : vector<2x8x128xf32>
    %273 = arith.addf %272, %210 : vector<2x8x128xf32>
    %c3 = arith.constant 3 : index
    %c0_128 = arith.constant 0 : index
    %c0_129 = arith.constant 0 : index
    %274 = vector.load %arg5[%c3, %c0_128, %c0_129] : memref<4x6x8xf32, #tpu.memory_space<vmem>>, vector<1x6x8xf32>
    %275 = vector.shape_cast %274 : vector<1x6x8xf32> to vector<6x8xf32>
    %276 = vector.shape_cast %275 : vector<6x8xf32> to vector<1x6x8xf32>
    %277 = vector.broadcast %276 : vector<1x6x8xf32> to vector<2x6x8xf32>
    %cst_130 = arith.constant dense<0.000000e+00> : vector<2x6x128xf32>
    %278 = tpu.matmul %277, %273, %cst_130 {dimension_numbers = #tpu.dot_dimension_numbers<[2], [1], [1], [2], [0, 0, 0, 1, 1, 2], [0], [0]>} : vector<2x6x8xf32>, vector<2x8x128xf32>, vector<2x6x128xf32> -> vector<2x6x128xf32>
    %c3_131 = arith.constant 3 : index
    %c0_132 = arith.constant 0 : index
    %c0_133 = arith.constant 0 : index
    %279 = vector.load %arg6[%c3_131, %c0_132, %c0_133] : memref<4x6x128xf32, #tpu.memory_space<vmem>>, vector<1x6x128xf32>
    %280 = vector.shape_cast %279 : vector<1x6x128xf32> to vector<6x128xf32>
    %281 = vector.shape_cast %280 : vector<6x128xf32> to vector<1x6x128xf32>
    %282 = vector.broadcast %281 : vector<1x6x128xf32> to vector<2x6x128xf32>
    %283 = arith.addf %278, %282 : vector<2x6x128xf32>
    %284 = vector.extract_strided_slice %283 {offsets = [0, 0, 0], sizes = [2, 4, 128], strides = [1, 1, 1]} : vector<2x6x128xf32> to vector<2x4x128xf32>
    %285 = arith.truncf %284 : vector<2x4x128xf32> to vector<2x4x128xbf16>
    %286 = vector.extract_strided_slice %283 {offsets = [0, 4, 0], sizes = [2, 1, 128], strides = [1, 1, 1]} : vector<2x6x128xf32> to vector<2x1x128xf32>
    %287 = vector.shape_cast %286 : vector<2x1x128xf32> to vector<2x128xf32>
    %288 = vector.extract_strided_slice %283 {offsets = [0, 5, 0], sizes = [2, 1, 128], strides = [1, 1, 1]} : vector<2x6x128xf32> to vector<2x1x128xf32>
    %289 = vector.shape_cast %288 : vector<2x1x128xf32> to vector<2x128xf32>
    %290 = vector.shape_cast %289 : vector<2x128xf32> to vector<2x128x1xf32>
    %291 = vector.shape_cast %287 : vector<2x128xf32> to vector<2x1x128xf32>
    %292 = vector.broadcast %290 : vector<2x128x1xf32> to vector<2x128x128xf32>
    %293 = vector.broadcast %291 : vector<2x1x128xf32> to vector<2x128x128xf32>
    %294 = arith.addf %292, %293 : vector<2x128x128xf32>
    %cst_134 = arith.constant 0.000000e+00 : f32
    %295 = vector.broadcast %cst_134 : f32 to vector<2x128x128xf32>
    %296 = arith.maximumf %294, %295 : vector<2x128x128xf32>
    %297 = arith.truncf %296 : vector<2x128x128xf32> to vector<2x128x128xbf16>
    %cst_135 = arith.constant dense<0.000000e+00> : vector<2x4x128xf32>
    %298 = tpu.matmul %285, %297, %cst_135 {dimension_numbers = #tpu.dot_dimension_numbers<[2], [1], [1], [2], [0, 0, 0, 1, 1, 2], [0], [0]>} : vector<2x4x128xbf16>, vector<2x128x128xbf16>, vector<2x4x128xf32> -> vector<2x4x128xf32>
    %c3_136 = arith.constant 3 : index
    %c0_137 = arith.constant 0 : index
    %c0_138 = arith.constant 0 : index
    %299 = vector.load %arg7[%c3_136, %c0_137, %c0_138] : memref<4x8x4xf32, #tpu.memory_space<vmem>>, vector<1x8x4xf32>
    %300 = vector.shape_cast %299 : vector<1x8x4xf32> to vector<8x4xf32>
    %301 = vector.shape_cast %300 : vector<8x4xf32> to vector<1x8x4xf32>
    %302 = vector.broadcast %301 : vector<1x8x4xf32> to vector<2x8x4xf32>
    %cst_139 = arith.constant dense<0.000000e+00> : vector<2x8x128xf32>
    %303 = tpu.matmul %302, %298, %cst_139 {dimension_numbers = #tpu.dot_dimension_numbers<[2], [1], [1], [2], [0, 0, 0, 1, 1, 2], [0], [0]>} : vector<2x8x4xf32>, vector<2x4x128xf32>, vector<2x8x128xf32> -> vector<2x8x128xf32>
    %c3_140 = arith.constant 3 : index
    %c0_141 = arith.constant 0 : index
    %c0_142 = arith.constant 0 : index
    %304 = vector.load %arg8[%c3_140, %c0_141, %c0_142] : memref<4x8x128xf32, #tpu.memory_space<vmem>>, vector<1x8x128xf32>
    %305 = vector.shape_cast %304 : vector<1x8x128xf32> to vector<8x128xf32>
    %306 = vector.shape_cast %305 : vector<8x128xf32> to vector<1x8x128xf32>
    %307 = vector.broadcast %306 : vector<1x8x128xf32> to vector<2x8x128xf32>
    %308 = arith.addf %303, %307 : vector<2x8x128xf32>
    %c3_143 = arith.constant 3 : index
    %c0_144 = arith.constant 0 : index
    %c0_145 = arith.constant 0 : index
    %c0_146 = arith.constant 0 : index
    %309 = vector.load %arg9[%c3_143, %c0_144, %c0_145, %c0_146] : memref<4x2x8x1xf32, #tpu.memory_space<vmem>>, vector<1x1x8x1xf32>
    %310 = vector.shape_cast %309 : vector<1x1x8x1xf32> to vector<8x1xf32>
    %c3_147 = arith.constant 3 : index
    %c1_148 = arith.constant 1 : index
    %c0_149 = arith.constant 0 : index
    %c0_150 = arith.constant 0 : index
    %311 = vector.load %arg9[%c3_147, %c1_148, %c0_149, %c0_150] : memref<4x2x8x1xf32, #tpu.memory_space<vmem>>, vector<1x1x8x1xf32>
    %312 = vector.shape_cast %311 : vector<1x1x8x1xf32> to vector<8x1xf32>
    %cst_151 = arith.constant dense<0.000000e+00> : vector<8xf32>
    %313 = vector.multi_reduction <add>, %308, %cst_151 [0, 2] : vector<2x8x128xf32> to vector<8xf32>
    %314 = vector.shape_cast %313 : vector<8xf32> to vector<1x8x1xf32>
    %315 = arith.mulf %308, %308 : vector<2x8x128xf32>
    %cst_152 = arith.constant dense<0.000000e+00> : vector<8xf32>
    %316 = vector.multi_reduction <add>, %315, %cst_152 [0, 2] : vector<2x8x128xf32> to vector<8xf32>
    %317 = vector.shape_cast %316 : vector<8xf32> to vector<1x8x1xf32>
    %cst_153 = arith.constant 3.906250e-03 : f32
    %318 = vector.broadcast %cst_153 : f32 to vector<1x8x1xf32>
    %319 = arith.mulf %314, %318 : vector<1x8x1xf32>
    %cst_154 = arith.constant 3.906250e-03 : f32
    %320 = vector.broadcast %cst_154 : f32 to vector<1x8x1xf32>
    %321 = arith.mulf %317, %320 : vector<1x8x1xf32>
    %322 = arith.mulf %319, %319 : vector<1x8x1xf32>
    %323 = arith.subf %321, %322 : vector<1x8x1xf32>
    %cst_155 = arith.constant 9.99999974E-6 : f32
    %324 = vector.broadcast %cst_155 : f32 to vector<1x8x1xf32>
    %325 = arith.addf %323, %324 : vector<1x8x1xf32>
    %326 = math.rsqrt %325 : vector<1x8x1xf32>
    %327 = vector.shape_cast %310 : vector<8x1xf32> to vector<1x8x1xf32>
    %328 = arith.mulf %327, %326 : vector<1x8x1xf32>
    %329 = arith.mulf %319, %328 : vector<1x8x1xf32>
    %330 = vector.shape_cast %312 : vector<8x1xf32> to vector<1x8x1xf32>
    %331 = arith.subf %330, %329 : vector<1x8x1xf32>
    %332 = vector.broadcast %328 : vector<1x8x1xf32> to vector<2x8x128xf32>
    %333 = arith.mulf %308, %332 : vector<2x8x128xf32>
    %334 = vector.broadcast %331 : vector<1x8x1xf32> to vector<2x8x128xf32>
    %335 = arith.addf %333, %334 : vector<2x8x128xf32>
    %336 = arith.addf %335, %273 : vector<2x8x128xf32>
    %337 = vector.shape_cast %336 : vector<2x8x128xf32> to vector<16x128xf32>
    %c224 = arith.constant 224 : index
    %c0_156 = arith.constant 0 : index
    %338 = vector.load %arg2[%c224, %c0_156] : memref<448x128xf32, #tpu.memory_space<vmem>>, vector<128x64xf32>
    %cst_157 = arith.constant dense<0.000000e+00> : vector<16x64xf32>
    %339 = tpu.matmul %337, %338, %cst_157 {dimension_numbers = #tpu.dot_dimension_numbers<[1], [0], [0], [1], [0, 0, 1, 1], [], []>} : vector<16x128xf32>, vector<128x64xf32>, vector<16x64xf32> -> vector<16x64xf32>
    %c3_158 = arith.constant 3 : index
    %c0_159 = arith.constant 0 : index
    %340 = vector.load %arg3[%c3_158, %c0_159] : memref<6x128xf32, #tpu.memory_space<vmem>>, vector<1x64xf32>
    %341 = vector.broadcast %340 : vector<1x64xf32> to vector<16x64xf32>
    %342 = arith.addf %339, %341 : vector<16x64xf32>
    %343 = vector.shape_cast %342 : vector<16x64xf32> to vector<2x8x64xf32>
    %c2_160 = arith.constant 2 : index
    %c0_161 = arith.constant 0 : index
    %c0_162 = arith.constant 0 : index
    %c0_163 = arith.constant 0 : index
    %344 = vector.load %arg4[%c2_160, %c0_161, %c0_162, %c0_163] : memref<3x2x8x1xf32, #tpu.memory_space<vmem>>, vector<1x1x8x1xf32>
    %345 = vector.shape_cast %344 : vector<1x1x8x1xf32> to vector<8x1xf32>
    %c2_164 = arith.constant 2 : index
    %c1_165 = arith.constant 1 : index
    %c0_166 = arith.constant 0 : index
    %c0_167 = arith.constant 0 : index
    %346 = vector.load %arg4[%c2_164, %c1_165, %c0_166, %c0_167] : memref<3x2x8x1xf32, #tpu.memory_space<vmem>>, vector<1x1x8x1xf32>
    %347 = vector.shape_cast %346 : vector<1x1x8x1xf32> to vector<8x1xf32>
    %cst_168 = arith.constant dense<0.000000e+00> : vector<8xf32>
    %348 = vector.multi_reduction <add>, %343, %cst_168 [0, 2] : vector<2x8x64xf32> to vector<8xf32>
    %349 = vector.shape_cast %348 : vector<8xf32> to vector<1x8x1xf32>
    %350 = arith.mulf %343, %343 : vector<2x8x64xf32>
    %cst_169 = arith.constant dense<0.000000e+00> : vector<8xf32>
    %351 = vector.multi_reduction <add>, %350, %cst_169 [0, 2] : vector<2x8x64xf32> to vector<8xf32>
    %352 = vector.shape_cast %351 : vector<8xf32> to vector<1x8x1xf32>
    %cst_170 = arith.constant 7.812500e-03 : f32
    %353 = vector.broadcast %cst_170 : f32 to vector<1x8x1xf32>
    %354 = arith.mulf %349, %353 : vector<1x8x1xf32>
    %cst_171 = arith.constant 7.812500e-03 : f32
    %355 = vector.broadcast %cst_171 : f32 to vector<1x8x1xf32>
    %356 = arith.mulf %352, %355 : vector<1x8x1xf32>
    %357 = arith.mulf %354, %354 : vector<1x8x1xf32>
    %358 = arith.subf %356, %357 : vector<1x8x1xf32>
    %cst_172 = arith.constant 9.99999974E-6 : f32
    %359 = vector.broadcast %cst_172 : f32 to vector<1x8x1xf32>
    %360 = arith.addf %358, %359 : vector<1x8x1xf32>
    %361 = math.rsqrt %360 : vector<1x8x1xf32>
    %362 = vector.shape_cast %345 : vector<8x1xf32> to vector<1x8x1xf32>
    %363 = arith.mulf %362, %361 : vector<1x8x1xf32>
    %364 = arith.mulf %354, %363 : vector<1x8x1xf32>
    %365 = vector.shape_cast %347 : vector<8x1xf32> to vector<1x8x1xf32>
    %366 = arith.subf %365, %364 : vector<1x8x1xf32>
    %367 = vector.broadcast %363 : vector<1x8x1xf32> to vector<2x8x64xf32>
    %368 = arith.mulf %343, %367 : vector<2x8x64xf32>
    %369 = vector.broadcast %366 : vector<1x8x1xf32> to vector<2x8x64xf32>
    %370 = arith.addf %368, %369 : vector<2x8x64xf32>
    %cst_173 = arith.constant 0.000000e+00 : f32
    %371 = vector.broadcast %cst_173 : f32 to vector<2x8x64xf32>
    %372 = arith.maximumf %370, %371 : vector<2x8x64xf32>
    %373 = vector.shape_cast %372 : vector<2x8x64xf32> to vector<16x64xf32>
    %c352 = arith.constant 352 : index
    %c0_174 = arith.constant 0 : index
    %374 = vector.load %arg2[%c352, %c0_174] : memref<448x128xf32, #tpu.memory_space<vmem>>, vector<64x32xf32>
    %cst_175 = arith.constant dense<0.000000e+00> : vector<16x32xf32>
    %375 = tpu.matmul %373, %374, %cst_175 {dimension_numbers = #tpu.dot_dimension_numbers<[1], [0], [0], [1], [0, 0, 1, 1], [], []>} : vector<16x64xf32>, vector<64x32xf32>, vector<16x32xf32> -> vector<16x32xf32>
    %c4 = arith.constant 4 : index
    %c0_176 = arith.constant 0 : index
    %376 = vector.load %arg3[%c4, %c0_176] : memref<6x128xf32, #tpu.memory_space<vmem>>, vector<1x32xf32>
    %377 = vector.broadcast %376 : vector<1x32xf32> to vector<16x32xf32>
    %378 = arith.addf %375, %377 : vector<16x32xf32>
    %379 = vector.shape_cast %378 : vector<16x32xf32> to vector<2x8x32xf32>
    %cst_177 = arith.constant 0.000000e+00 : f32
    %380 = vector.broadcast %cst_177 : f32 to vector<2x8x32xf32>
    %381 = arith.maximumf %379, %380 : vector<2x8x32xf32>
    %382 = vector.shape_cast %381 : vector<2x8x32xf32> to vector<16x32xf32>
    %c416 = arith.constant 416 : index
    %c0_178 = arith.constant 0 : index
    %383 = vector.load %arg2[%c416, %c0_178] : memref<448x128xf32, #tpu.memory_space<vmem>>, vector<32x32xf32>
    %cst_179 = arith.constant dense<0.000000e+00> : vector<16x32xf32>
    %384 = tpu.matmul %382, %383, %cst_179 {dimension_numbers = #tpu.dot_dimension_numbers<[1], [0], [0], [1], [0, 0, 1, 1], [], []>} : vector<16x32xf32>, vector<32x32xf32>, vector<16x32xf32> -> vector<16x32xf32>
    %c5 = arith.constant 5 : index
    %c0_180 = arith.constant 0 : index
    %385 = vector.load %arg3[%c5, %c0_180] : memref<6x128xf32, #tpu.memory_space<vmem>>, vector<1x32xf32>
    %386 = vector.broadcast %385 : vector<1x32xf32> to vector<16x32xf32>
    %387 = arith.addf %384, %386 : vector<16x32xf32>
    %388 = vector.shape_cast %387 : vector<16x32xf32> to vector<2x8x32xf32>
    %c0_181 = arith.constant 0 : index
    %c0_182 = arith.constant 0 : index
    %c0_183 = arith.constant 0 : index
    %389 = vector.load %arg10[%c0_181, %c0_182, %c0_183] : memref<2x8x32xf32, #tpu.memory_space<vmem>>, vector<2x8x32xf32>
    tpu.vector_store %arg10[%c0_181, %c0_182, %c0_183], %388 {strides = array<i32>} : memref<2x8x32xf32, #tpu.memory_space<vmem>>, vector<2x8x32xf32>,
    return
  }
  func.func @transform_0(%arg0: i32) -> (i32, i32, i32) {
    %c0_i32 = arith.constant 0 : i32
    %c0_i32_0 = arith.constant 0 : i32
    %c0_i32_1 = arith.constant 0 : i32
    %c0_i32_2 = arith.constant 0 : i32
    return %c0_i32, %c0_i32_0, %c0_i32_1 : i32, i32, i32
  }
  func.func @transform_1(%arg0: i32) -> (i32, i32) {
    %c0_i32 = arith.constant 0 : i32
    %c0_i32_0 = arith.constant 0 : i32
    %c0_i32_1 = arith.constant 0 : i32
    return %c0_i32, %c0_i32_0 : i32, i32
  }
  func.func @transform_2(%arg0: i32) -> (i32, i32) {
    %c0_i32 = arith.constant 0 : i32
    %c0_i32_0 = arith.constant 0 : i32
    %c0_i32_1 = arith.constant 0 : i32
    return %c0_i32, %c0_i32_0 : i32, i32
  }
  func.func @transform_3(%arg0: i32) -> (i32, i32, i32, i32) {
    %c0_i32 = arith.constant 0 : i32
    %c0_i32_0 = arith.constant 0 : i32
    %c0_i32_1 = arith.constant 0 : i32
    %c0_i32_2 = arith.constant 0 : i32
    %c0_i32_3 = arith.constant 0 : i32
    return %c0_i32, %c0_i32_0, %c0_i32_1, %c0_i32_2 : i32, i32, i32, i32
  }
  func.func @transform_4(%arg0: i32) -> (i32, i32, i32) {
    %c0_i32 = arith.constant 0 : i32
    %c0_i32_0 = arith.constant 0 : i32
    %c0_i32_1 = arith.constant 0 : i32
    %c0_i32_2 = arith.constant 0 : i32
    return %c0_i32, %c0_i32_0, %c0_i32_1 : i32, i32, i32
  }
  func.func @transform_5(%arg0: i32) -> (i32, i32, i32) {
    %c0_i32 = arith.constant 0 : i32
    %c0_i32_0 = arith.constant 0 : i32
    %c0_i32_1 = arith.constant 0 : i32
    %c0_i32_2 = arith.constant 0 : i32
    return %c0_i32, %c0_i32_0, %c0_i32_1 : i32, i32, i32
  }
  func.func @transform_6(%arg0: i32) -> (i32, i32, i32) {
    %c0_i32 = arith.constant 0 : i32
    %c0_i32_0 = arith.constant 0 : i32
    %c0_i32_1 = arith.constant 0 : i32
    %c0_i32_2 = arith.constant 0 : i32
    return %c0_i32, %c0_i32_0, %c0_i32_1 : i32, i32, i32
  }
  func.func @transform_7(%arg0: i32) -> (i32, i32, i32) {
    %c0_i32 = arith.constant 0 : i32
    %c0_i32_0 = arith.constant 0 : i32
    %c0_i32_1 = arith.constant 0 : i32
    %c0_i32_2 = arith.constant 0 : i32
    return %c0_i32, %c0_i32_0, %c0_i32_1 : i32, i32, i32
  }
  func.func @transform_8(%arg0: i32) -> (i32, i32, i32, i32) {
    %c0_i32 = arith.constant 0 : i32
    %c0_i32_0 = arith.constant 0 : i32
    %c0_i32_1 = arith.constant 0 : i32
    %c0_i32_2 = arith.constant 0 : i32
    %c0_i32_3 = arith.constant 0 : i32
    return %c0_i32, %c0_i32_0, %c0_i32_1, %c0_i32_2 : i32, i32, i32, i32
  }
  func.func @transform_9(%arg0: i32) -> (i32, i32, i32) {
    %c0_i32 = arith.constant 0 : i32
    %c0_i32_0 = arith.constant 0 : i32
    %c0_i32_1 = arith.constant 0 : i32
    %c0_i32_2 = arith.constant 0 : i32
    return %c0_i32, %c0_i32_0, %c0_i32_1 : i32, i32, i32
  }
}

</mosaic_0001>

<bundles_post_ra>
// kernel: generator_forward.1
= control target key start
LH: loop header
LB: loop body
LE: loop exit
PB: predicated region body
PF: predicated region fallthrough
CT: control target
= control target key end

     0   :  { %vm45_vm0 = vcmask 261120   ;;  %s4747_s0 = inlined_call_operand.vmem [shape: f32[2,8,32], index: 0, kind: input, shape index: {}]   ;;  %s4748_s1 = inlined_call_operand.vmem [shape: f32[448,128], index: 1, kind: input, shape index: {}]   ;;  %s4749_s2 = inlined_call_operand.vmem [shape: f32[6,128], index: 2, kind: input, shape index: {}]   ;;  %s4750_s3 = inlined_call_operand.vmem [shape: f32[3,2,8,1], index: 3, kind: input, shape index: {}]   ;;  %s4751_s4 = inlined_call_operand.vmem [shape: f32[4,6,8], index: 4, kind: input, shape index: {}]   ;;  %s4752_s5 = inlined_call_operand.vmem [shape: f32[4,6,128], index: 5, kind: input, shape index: {}]   ;;  %s4753_s6 = inlined_call_operand.vmem [shape: f32[4,8,4], index: 6, kind: input, shape index: {}]   ;;  %s4754_s7 = inlined_call_operand.vmem [shape: f32[4,8,128], index: 7, kind: input, shape index: {}]   ;;  %s4755_s8 = inlined_call_operand.vmem [shape: f32[4,2,8,1], index: 8, kind: input, shape index: {}]   ;;  %s4756_s9 = inlined_call_operand.hbm [shape: f32[2,8,32], index: 9, kind: output, shape index: {}]  }
   0x1   :  { %v39_v0 = vld [vmem:[%s4748_s1 + $0x18] sm:$0xff]  ;;  %v38_v1 = vld [vmem:[%s4748_s1 + $0x10] sm:$0xff]  ;;  %v34_v2 = vld [vmem:[%s4747_s0] sm:$0xff] }
   0x2   :  { %3546 = vmatprep.subr.mxu0 %v39_v0  ;;  %v37_v3 = vld [vmem:[%s4748_s1 + $0x8] sm:$0xff]  ;;  %3554 = vmatprep.mubr.msk.f32.mxu0 %vm45_vm0, %v34_v2 }
   0x3   :  { %3547 = vmatpush3.msra.mxu0 %v39_v0 }
   0x4   :  { %14 = vsyncpa [#allocation3], 0  ;;  %3548 = vmatprep.subr.mxu0 %v38_v1  ;;  %v36_v4 = vld [vmem:[%s4748_s1] sm:$0xff]  ;;  %v35_v5 = vld [vmem:[%s4747_s0 + $0x8] sm:$0xff]  ;;  %vm130_vm1 = vcmask 523264   ;;  %v3968_v19 = vmov 0  }
   0x5   :  { %3549 = vmatpush3.msra.mxu0 %v38_v1  ;;  %v3310_v6 = vld [vmem:[%s4749_s2] ss:$0 sm:$0xff]  ;;  %3922 = vset.pattern.permute.xlu1 %v3968_v19  ;;  %v175_v20 = vld [vmem:[%s4748_s1 + $0x58] sm:$0xff]  ;;  %v174_v21 = vld [vmem:[%s4748_s1 + $0x50] sm:$0xff]  ;;  %vm3970_vm2 = vmmov 0   ;;  %vm409_vm3 = vcmask 64512  }
   0x6   :  { %3550 = vmatprep.subr.mxu0 %v37_v3  ;;  %3923 = vset.pattern.permute.xlu0 %v3968_v19  ;;  %v173_v22 = vld [vmem:[%s4748_s1 + $0x48] sm:$0xff]  ;;  %v172_v23 = vld [vmem:[%s4748_s1 + $0x40] sm:$0xff]  ;;  %v171_v32 = vld [vmem:[%s4748_s1 + $0x38] sm:$0xff]  ;;  %vm863_vm4 = vcmask 1043456   ;;  %vm859_vm5 = vcmask 31744  }
   0x7   :  { %3551 = vmatpush3.msra.mxu0 %v37_v3  ;;  %3557 = vmatprep.subr.mxu1 %v175_v20  ;;  %v127_v31 = vld [vmem:[%s4750_s3] sm:$0xff]  ;;  %v170_v33 = vld [vmem:[%s4748_s1 + $0x30] sm:$0xff]  ;;  %v3313_v36 = vld [vmem:[%s4750_s3 + $0x8] sm:$0xff] }
   0x8   :  { %3552 = vmatprep.subr.mxu0 %v36_v4  ;;  %3558 = vmatpush3.msra.mxu1 %v175_v20  ;;  %v169_v38 = vld [vmem:[%s4748_s1 + $0x28] sm:$0xff]  ;;  %v168_v40 = vld [vmem:[%s4748_s1 + $0x20] sm:$0xff]  ;;  %v314_v58 = vld [vmem:[%s4748_s1 + $0xd8] sm:$0xff] }
   0x9   :  { %3553 = vmatpush3.msra.mxu0 %v36_v4  ;;  %3559 = vmatprep.subr.mxu1 %v174_v21  ;;  %v3314_v49 = vld [vmem:[%s4749_s2 + $0x1] ss:$0 sm:$0xff]  ;;  %v313_v59 = vld [vmem:[%s4748_s1 + $0xd0] sm:$0xff]  ;;  %v312_v60 = vld [vmem:[%s4748_s1 + $0xc8] sm:$0xff] }
   0xa   :  { %3555 = vmatmul.mubr.msk.f32.vlgmr.msra.gmra.mxu0 %vm45_vm0, %v35_v5  ;;  %3560 = vmatpush3.msra.mxu1 %v174_v21  ;;  %v311_v61 = vld [vmem:[%s4748_s1 + $0xc0] sm:$0xff]  ;;  %v310_v62 = vld [vmem:[%s4748_s1 + $0xb8] sm:$0xff]  ;;  %v309_v63 = vld [vmem:[%s4748_s1 + $0xb0] sm:$0xff] }
   0xb   :  { %3561 = vmatprep.subr.mxu1 %v173_v22  ;;  %3576 = vmatprep.subr.mxu0 %v314_v58  ;;  %v308_v0 = vld [vmem:[%s4748_s1 + $0xa8] sm:$0xff]  ;;  %v307_v1 = vld [vmem:[%s4748_s1 + $0xa0] sm:$0xff]  ;;  %v306_v2 = vld [vmem:[%s4748_s1 + $0x98] sm:$0xff] }
   0xc   :  { %3562 = vmatpush3.msra.mxu1 %v173_v22  ;;  %3577 = vmatpush3.msra.mxu0 %v314_v58  ;;  %v305_v3 = vld [vmem:[%s4748_s1 + $0x90] sm:$0xff]  ;;  %v304_v4 = vld [vmem:[%s4748_s1 + $0x88] sm:$0xff]  ;;  %v303_v5 = vld [vmem:[%s4748_s1 + $0x80] sm:$0xff] }
   0xd   :  { %3563 = vmatprep.subr.mxu1 %v172_v23  ;;  %3578 = vmatprep.subr.mxu0 %v313_v59  ;;  %v300_v20 = vld [vmem:[%s4748_s1 + $0x68] sm:$0xff]  ;;  %v299_v22 = vld [vmem:[%s4748_s1 + $0x60] sm:$0xff] }
   0xe   :  { %3564 = vmatpush3.msra.mxu1 %v172_v23  ;;  %3579 = vmatpush3.msra.mxu0 %v313_v59 }
   0xf   :  { %3565 = vmatprep.subr.mxu1 %v171_v32  ;;  %3580 = vmatprep.subr.mxu0 %v312_v60 }
  0x10   :  { %3566 = vmatpush3.msra.mxu1 %v171_v32  ;;  %3581 = vmatpush3.msra.mxu0 %v312_v60  ;;  %v3319_v32 = vld [vmem:[%s4749_s2 + $0x2] ss:$0 sm:$0xff] }
  0x11   :  { %3567 = vmatprep.subr.mxu1 %v170_v33  ;;  %3582 = vmatprep.subr.mxu0 %v311_v61 }
  0x12   :  { %3568 = vmatpush3.msra.mxu1 %v170_v33  ;;  %3583 = vmatpush3.msra.mxu0 %v311_v61 }
  0x13   :  { %3569 = vmatprep.subr.mxu1 %v169_v38  ;;  %3584 = vmatprep.subr.mxu0 %v310_v62 }
  0x14   :  { %3570 = vmatpush3.msra.mxu1 %v169_v38  ;;  %3585 = vmatpush3.msra.mxu0 %v310_v62 }
  0x15   :  { %3571 = vmatprep.subr.mxu1 %v168_v40  ;;  %3586 = vmatprep.subr.mxu0 %v309_v63 }
  0x16   :  { %3572 = vmatpush3.msra.mxu1 %v168_v40  ;;  %3587 = vmatpush3.msra.mxu0 %v309_v63 }
  0x17   :  { %3588 = vmatprep.subr.mxu0 %v308_v0 }
  0x18   :  { %3589 = vmatpush3.msra.mxu0 %v308_v0 }
  0x19   :  { %3590 = vmatprep.subr.mxu0 %v307_v1 }
  0x1a   :  { %3591 = vmatpush3.msra.mxu0 %v307_v1 }
  0x1b   :  { %3592 = vmatprep.subr.mxu0 %v306_v2 }
  0x1c   :  { %3593 = vmatpush3.msra.mxu0 %v306_v2 }
  0x1d   :  { %3594 = vmatprep.subr.mxu0 %v305_v3 }
  0x1e   :  { %3595 = vmatpush3.msra.mxu0 %v305_v3 }
  0x1f   :  { %3596 = vmatprep.subr.mxu0 %v304_v4 }
  0x20   :  { %3597 = vmatpush3.msra.mxu0 %v304_v4 }
  0x21   :  { %3598 = vmatprep.subr.mxu0 %v303_v5 }
  0x22   :  { %3599 = vmatpush3.msra.mxu0 %v303_v5 }
  0xca   :  { %v3556_v7 = vpop.f32.mrf.mxu0 }
  0xcb   :  { %v124_v8 = vadd.f32 %v3556_v7, %v3310_v6 }
  0xcc   :  { %v118_v9 = vpop.f32.mrf.mxu0 }
  0xcd   :  { %v119_v10 = vadd.f32 %v3310_v6, %v118_v9  ;;  %v132_v12 = vsel %vm130_vm1, %v124_v8, 0.0  ;;  %v137_v14 = vmul.f32 %v124_v8, %v124_v8 }
  0xcf   :  { %v131_v11 = vsel %vm130_vm1, %v119_v10, 0.0  ;;  %v136_v13 = vmul.f32 %v119_v10, %v119_v10  ;;  %v139_v17 = vsel %vm130_vm1, %v137_v14, 0.0  ;;  %v302_v14 = vld [vmem:[%s4748_s1 + $0x78] sm:$0xff] }
  0xd0   :  { %v133_v15 = vadd.f32 %v132_v12, %v131_v11  ;;  %3600 = vmatprep.subr.mxu0 %v302_v14 }
  0xd1   :  { %v138_v16 = vsel %vm130_vm1, %v136_v13, 0.0  ;;  %v3317_v13 = vld [vmem:[%s4750_s3 + $0x10] sm:$0xff]  ;;  %3601 = vmatpush3.msra.mxu0 %v302_v14 }
  0xd2   :  { %134 = vadd.xlane.f32.xlu0 %v133_v15  ;;  %v140_v18 = vadd.f32 %v139_v17, %v138_v16  ;;  %v301_v15 = vld [vmem:[%s4748_s1 + $0x70] sm:$0xff] }
  0xd3   :  { %3602 = vmatprep.subr.mxu0 %v301_v15 }
  0xd4   :  { %3603 = vmatpush3.msra.mxu0 %v301_v15 }
  0xd5   :  { %3604 = vmatprep.subr.mxu0 %v300_v20 }
  0xd6   :  { %141 = vadd.xlane.f32.xlu0 %v140_v18  ;;  %v3318_v18 = vld [vmem:[%s4750_s3 + $0x18] sm:$0xff]  ;;  %3605 = vmatpush3.msra.mxu0 %v300_v20 }
  0xd7   :  { %3606 = vmatprep.subr.mxu0 %v299_v22 }
  0xd8   :  { %3607 = vmatpush3.msra.mxu0 %v299_v22 }
 0x15b   :  { %v135_v24 = vpop.xlane.xlu0 %134 }
 0x15c   :  { %v143_v25 = vmul.f32 0.0078125, %v135_v24 }
 0x15e   :  { %v145_v27 = vmul.f32 %v143_v25, %v143_v25 }
 0x15f   :  { %v142_v26 = vpop.xlane.xlu0 %141 }
 0x160   :  { %v144_v28 = vmul.f32 0.0078125, %v142_v26 }
 0x162   :  { %v146_v29 = vsub.f32 %v144_v28, %v145_v27 }
 0x164   :  { %v147_v30 = vadd.f32 1e-05, %v146_v29 }
 0x166   :  { %3924 = vrsqrt.f32 %v147_v30 }
 0x173   :  { %v3925_v34 = vpop.eup %3924 }
 0x174   :  { %v149_v35 = vmul.f32 %v3925_v34, %v127_v31  ;;  %v3969_v31 = vmov 0.0  }
 0x175   :  { %3611 = vmatprep.subr.mxu1 %v3969_v31  ;;  %3641 = vmatprep.subr.bf16.mxu0 %v3969_v31 }
 0x176   :  { %154 = vperm.xlu1 %3922, %v149_v35   ;;  %v150_v37 = vmul.f32 %v149_v35, %v143_v25 }
 0x178   :  { %v151_v39 = vsub.f32 %v3313_v36, %v150_v37 }
 0x17a   :  { %161 = vperm.xlu1 %3922, %v151_v39  }
 0x1f1   :  { %v155_v41 = vpop.permute.xlu1 %154 }
 0x1f2   :  { %v157_v42 = vmul.f32 %v155_v41, %v119_v10  ;;  %v158_v43 = vmul.f32 %v155_v41, %v124_v8 }
 0x1f5   :  { %v162_v44 = vpop.permute.xlu1 %161 }
 0x1f6   :  { %v165_v45 = vadd.f32 %v162_v44, %v158_v43  ;;  %v164_v46 = vadd.f32 %v162_v44, %v157_v42  ;;  %v407_v43 = vld [vmem:[%s4751_s4] sm:$0x3f] }
 0x1f8   :  { %v167_v47 = vmax.f32 %v165_v45, 0.0  ;;  %v166_v48 = vmax.f32 %v164_v46, 0.0  ;;  %v555_v46 = vlaneseq }
 0x1fa   :  { %3573 = vmatprep.mubr.msk.f32.mxu1 %vm130_vm1, %v166_v48  ;;  %v408_v48 = vld [vmem:[%s4752_s5] sm:$0x3f] }
 0x1fb   :  { %3574 = vmatmul.mubr.msk.f32.vlgmr.msra.gmra.mxu1 %vm130_vm1, %v167_v47  ;;  %v556_v47 = vshrl.u32 %v555_v46, 7 }
 0x1fc   :  { %3613 = vmatprep.mubr.msk.f32.mxu1 %vm3970_vm2, %v3969_v31 }
 0x1fd   :  { %v4191_v58 = vsub.s32 4, %v556_v47 }
 0x2bb   :  { %v3575_v50 = vpop.f32.mrf.mxu1 }
 0x2bc   :  { %v4086_v51 = vadd.f32 %v3575_v50, %v3314_v49 }
 0x2bd   :  { %v253_v52 = vpop.f32.mrf.mxu1 }
 0x2be   :  { %v4088_v53 = vadd.f32 %v3314_v49, %v253_v52  ;;  %v270_v56 = vmul.f32 %v4086_v51, %v4086_v51  ;;  %v4181_v49 = vsub.s32 5, %v556_v47 }
 0x2c0   :  { %v266_v54 = vadd.f32 %v4086_v51, %v4088_v53  ;;  %v269_v55 = vmul.f32 %v4088_v53, %v4088_v53 }
 0x2c2   :  { %267 = vadd.xlane.f32.xlu0 %v266_v54  ;;  %v271_v57 = vadd.f32 %v270_v56, %v269_v55 }
 0x2c4   :  { %272 = vadd.xlane.f32.xlu1 %v271_v57 }
 0x34b   :  { %v268_v6 = vpop.xlane.xlu0 %267 }
 0x34c   :  { %v274_v7 = vmul.f32 0.00390625, %v268_v6 }
 0x34d   :  { %v273_v8 = vpop.xlane.xlu1 %272 }
 0x34e   :  { %v276_v9 = vmul.f32 %v274_v7, %v274_v7  ;;  %v275_v10 = vmul.f32 0.00390625, %v273_v8 }
 0x350   :  { %v277_v11 = vsub.f32 %v275_v10, %v276_v9 }
 0x352   :  { %v278_v12 = vadd.f32 1e-05, %v277_v11 }
 0x354   :  { %3926 = vrsqrt.f32 %v278_v12 }
 0x361   :  { %v3927_v16 = vpop.eup %3926 }
 0x362   :  { %v280_v17 = vmul.f32 %v3927_v16, %v3317_v13 }
 0x364   :  { %285 = vperm.xlu0 %3923, %v280_v17   ;;  %v281_v19 = vmul.f32 %v280_v17, %v274_v7 }
 0x366   :  { %v282_v21 = vsub.f32 %v3318_v18, %v281_v19 }
 0x368   :  { %292 = vperm.xlu1 %3922, %v282_v21  }
 0x3df   :  { %v286_v23 = vpop.permute.xlu0 %285 }
 0x3e0   :  { %v288_v24 = vmul.f32 %v286_v23, %v4088_v53  ;;  %v289_v25 = vmul.f32 %v286_v23, %v4086_v51 }
 0x3e3   :  { %v293_v26 = vpop.permute.xlu1 %292 }
 0x3e4   :  { %v295_v27 = vadd.f32 %v293_v26, %v288_v24  ;;  %v296_v28 = vadd.f32 %v293_v26, %v289_v25 }
 0x3e6   :  { %v298_v29 = vmax.f32 %v296_v28, 0.0  ;;  %v297_v30 = vmax.f32 %v295_v27, 0.0 }
 0x3e8   :  { %3608 = vmatprep.mubr.f32.mxu0 %v297_v30 }
 0x3e9   :  { %3609 = vmatmul.mubr.f32.vlgmr.msra.gmra.mxu0 %v298_v29 }
 0x3ea   :  { %3657 = vmatprep.mubr.msk.bf16.mxu0 %vm3970_vm2, %v3969_v31 }
 0x4a9   :  { %v3610_v33 = vpop.f32.mrf.mxu0 }
 0x4aa   :  { %v392_v34 = vadd.f32 %v3610_v33, %v3319_v32 }
 0x4ab   :  { %v386_v35 = vpop.f32.mrf.mxu0 }
 0x4ac   :  { %v3321_v36 = vmul.f32 -1.442695, %v392_v34  ;;  %v387_v37 = vadd.f32 %v3319_v32, %v386_v35 }
 0x4ae   :  { %3928 = vpow2.f32 %v3321_v36  ;;  %v3320_v38 = vmul.f32 -1.442695, %v387_v37 }
 0x4b0   :  { %3930 = vpow2.f32 %v3320_v38 }
 0x4bb   :  { %v3929_v39 = vpop.eup %3928 }
 0x4bc   :  { %v402_v41 = vadd.f32 1.0, %v3929_v39 }
 0x4bd   :  { %v3931_v40 = vpop.eup %3930 }
 0x4be   :  { %v401_v42 = vadd.f32 1.0, %v3931_v40 }
 0x4c0   :  { %3932 = vrcp.f32 %v401_v42 }
 0x4c1   :  { %3934 = vrcp.f32 %v402_v41 }
 0x4cd   :  { %v4164_v44 = vpop.eup %3932 }
 0x4ce   :  { %3612 = vmatpush3.msra.mxu1 %v4164_v44  ;;  %v4167_v45 = vpop.eup %3934 }
 0x4cf   :  { %3614 = vmatmul.mubr.msk.f32.vlgmr.msra.gmra.mxu1 %vm409_vm3, %v407_v43  ;;  %3616 = vmatprep.subr.mxu1 %v3969_v31 }
 0x4d0   :  { %3617 = vmatpush3.msra.mxu1 %v4167_v45  ;;  %3618 = vmatprep.mubr.msk.f32.mxu1 %vm3970_vm2, %v3969_v31 }
 0x4d1   :  { %3621 = vmatprep.subr.bf16.mxu1 %v3969_v31 }
 0x4d3   :  { %3619 = vmatmul.mubr.msk.f32.vlgmr.msra.gmra.mxu1 %vm409_vm3, %v407_v43 }
 0x4d4   :  { %3637 = vmatprep.mubr.msk.bf16.mxu1 %vm3970_vm2, %v3969_v31 }
 0x58f   :  { %v479_v50 = vpop.f32.mrf.mxu1 }
 0x590   :  { %v4183_v51 = vadd.f32 %v479_v50, %v408_v48 }
 0x591   :  { %v3615_v52 = vpop.f32.mrf.mxu1 }
 0x592   :  { %v558_v53 = vrot.slane %v4183_v51, %v4181_v49  ;;  %v4195_v61 = vrot.slane %v4183_v51, %v4191_v58 }
 0x593   :  { %v549_v54 = vpop.f32.mrf.mxu1 }
 0x594   :  { %608 = vbcast.lane.b32.xlu1 %v558_v53, 352  ;;  %616 = vbcast.lane.b32.xlu0 %v558_v53, 368  ;;  %v4187_v56 = vadd.f32 %v549_v54, %v408_v48 }
 0x595   :  { %v3620_v55 = vpop.f32.mrf.mxu1 }
 0x596   :  { %v625_v57 = vrot.slane %v4187_v56, %v4181_v49  ;;  %v4220_v54 = vrot.slane %v4187_v56, %v4191_v58 }
 0x598   :  { %600 = vbcast.lane.b32.xlu1 %v558_v53, 336  ;;  %620 = vbcast.lane.b32.xlu0 %v558_v53, 376 }
 0x59c   :  { %592 = vbcast.lane.b32.xlu1 %v558_v53, 320  ;;  %612 = vbcast.lane.b32.xlu0 %v558_v53, 360 }
 0x5a0   :  { %584 = vbcast.lane.b32.xlu1 %v558_v53, 304  ;;  %604 = vbcast.lane.b32.xlu0 %v558_v53, 344 }
 0x5a4   :  { %576 = vbcast.lane.b32.xlu1 %v558_v53, 288  ;;  %596 = vbcast.lane.b32.xlu0 %v558_v53, 328 }
 0x5a8   :  { %568 = vbcast.lane.b32.xlu1 %v558_v53, 272  ;;  %588 = vbcast.lane.b32.xlu0 %v558_v53, 312 }
 0x5ac   :  { %560 = vbcast.lane.b32.xlu1 %v558_v53, 256  ;;  %580 = vbcast.lane.b32.xlu0 %v558_v53, 296 }
 0x5b0   :  { %572 = vbcast.lane.b32.xlu0 %v558_v53, 280  ;;  %683 = vbcast.lane.b32.xlu1 %v625_v57, 368 }
 0x5b4   :  { %564 = vbcast.lane.b32.xlu0 %v558_v53, 264  ;;  %675 = vbcast.lane.b32.xlu1 %v625_v57, 352 }
 0x5b8   :  { %687 = vbcast.lane.b32.xlu0 %v625_v57, 376  ;;  %667 = vbcast.lane.b32.xlu1 %v625_v57, 336 }
 0x5bc   :  { %679 = vbcast.lane.b32.xlu0 %v625_v57, 360  ;;  %659 = vbcast.lane.b32.xlu1 %v625_v57, 320 }
 0x5c0   :  { %671 = vbcast.lane.b32.xlu0 %v625_v57, 344  ;;  %651 = vbcast.lane.b32.xlu1 %v625_v57, 304 }
 0x5c4   :  { %663 = vbcast.lane.b32.xlu0 %v625_v57, 328  ;;  %643 = vbcast.lane.b32.xlu1 %v625_v57, 288 }
 0x5c8   :  { %655 = vbcast.lane.b32.xlu0 %v625_v57, 312  ;;  %635 = vbcast.lane.b32.xlu1 %v625_v57, 272 }
 0x5cc   :  { %647 = vbcast.lane.b32.xlu0 %v625_v57, 296  ;;  %627 = vbcast.lane.b32.xlu1 %v625_v57, 256 }
 0x5d0   :  { %639 = vbcast.lane.b32.xlu0 %v625_v57, 280 }
 0x5d4   :  { %631 = vbcast.lane.b32.xlu0 %v625_v57, 264 }
 0x606   :  { %v609_v59 = vpop.permute.xlu1 %608  ;;  %v617_v60 = vpop.permute.xlu0 %616 }
 0x607   :  { %v711_v62 = vadd.f32 %v4195_v61, %v617_v60  ;;  %v709_v2 = vadd.f32 %v4195_v61, %v609_v59 }
 0x609   :  { %v743_v3 = vmax.f32 %v711_v62, 0.0  ;;  %v741_v9 = vmax.f32 %v709_v2, 0.0 }
 0x60a   :  { %v601_v63 = vpop.permute.xlu1 %600  ;;  %v621_v0 = vpop.permute.xlu0 %620 }
 0x60b   :  { %v712_v1 = vadd.f32 %v4195_v61, %v621_v0  ;;  %v707_v10 = vadd.f32 %v4195_v61, %v601_v63 }
 0x60d   :  { %v744_v4 = vmax.f32 %v712_v1, 0.0  ;;  %v739_v16 = vmax.f32 %v707_v10, 0.0 }
 0x60e   :  { %v593_v5 = vpop.permute.xlu1 %592  ;;  %v613_v6 = vpop.permute.xlu0 %612 }
 0x60f   :  { %v768_v7 = vpack.c.bf16 %v744_v4, %v743_v3  ;;  %v710_v8 = vadd.f32 %v4195_v61, %v613_v6  ;;  %v705_v17 = vadd.f32 %v4195_v61, %v593_v5 }
 0x611   :  { %v742_v11 = vmax.f32 %v710_v8, 0.0  ;;  %3622 = vmatpush3.bf16.msra.mxu1 %v768_v7  ;;  %v737_v23 = vmax.f32 %v705_v17, 0.0 }
 0x612   :  { %v585_v12 = vpop.permute.xlu1 %584  ;;  %v605_v13 = vpop.permute.xlu0 %604  ;;  %3623 = vmatprep.subr.bf16.mxu1 %v3969_v31 }
 0x613   :  { %v767_v14 = vpack.c.bf16 %v742_v11, %v741_v9  ;;  %v708_v15 = vadd.f32 %v4195_v61, %v605_v13  ;;  %v703_v24 = vadd.f32 %v4195_v61, %v585_v12 }
 0x615   :  { %v740_v18 = vmax.f32 %v708_v15, 0.0  ;;  %3624 = vmatpush3.bf16.msra.mxu1 %v767_v14  ;;  %v735_v30 = vmax.f32 %v703_v24, 0.0 }
 0x616   :  { %v577_v19 = vpop.permute.xlu1 %576  ;;  %v597_v20 = vpop.permute.xlu0 %596  ;;  %3625 = vmatprep.subr.bf16.mxu1 %v3969_v31 }
 0x617   :  { %v766_v21 = vpack.c.bf16 %v740_v18, %v739_v16  ;;  %v706_v22 = vadd.f32 %v4195_v61, %v597_v20  ;;  %v701_v32 = vadd.f32 %v4195_v61, %v577_v19 }
 0x619   :  { %v738_v25 = vmax.f32 %v706_v22, 0.0  ;;  %3626 = vmatpush3.bf16.msra.mxu1 %v766_v21  ;;  %v733_v38 = vmax.f32 %v701_v32, 0.0 }
 0x61a   :  { %v569_v26 = vpop.permute.xlu1 %568  ;;  %v589_v27 = vpop.permute.xlu0 %588  ;;  %3627 = vmatprep.subr.bf16.mxu1 %v3969_v31 }
 0x61b   :  { %v765_v28 = vpack.c.bf16 %v738_v25, %v737_v23  ;;  %v704_v29 = vadd.f32 %v4195_v61, %v589_v27  ;;  %v699_v39 = vadd.f32 %v4195_v61, %v569_v26 }
 0x61d   :  { %v736_v33 = vmax.f32 %v704_v29, 0.0  ;;  %3628 = vmatpush3.bf16.msra.mxu1 %v765_v28  ;;  %v731_v47 = vmax.f32 %v699_v39, 0.0 }
 0x61e   :  { %v561_v34 = vpop.permute.xlu1 %560  ;;  %v581_v35 = vpop.permute.xlu0 %580  ;;  %3629 = vmatprep.subr.bf16.mxu1 %v3969_v31 }
 0x61f   :  { %v764_v36 = vpack.c.bf16 %v736_v33, %v735_v30  ;;  %v702_v37 = vadd.f32 %v4195_v61, %v581_v35  ;;  %v697_v48 = vadd.f32 %v4195_v61, %v561_v34 }
 0x621   :  { %v734_v40 = vmax.f32 %v702_v37, 0.0  ;;  %3630 = vmatpush3.bf16.msra.mxu1 %v764_v36  ;;  %v729_v59 = vmax.f32 %v697_v48, 0.0 }
 0x622   :  { %v573_v41 = vpop.permute.xlu0 %572  ;;  %v684_v42 = vpop.permute.xlu1 %683  ;;  %3631 = vmatprep.subr.bf16.mxu1 %v3969_v31 }
 0x623   :  { %v763_v43 = vpack.c.bf16 %v734_v40, %v733_v38  ;;  %v700_v46 = vadd.f32 %v4195_v61, %v573_v41  ;;  %v727_v60 = vadd.f32 %v4220_v54, %v684_v42 }
 0x625   :  { %v732_v50 = vmax.f32 %v700_v46, 0.0  ;;  %3632 = vmatpush3.bf16.msra.mxu1 %v763_v43  ;;  %v759_v3 = vmax.f32 %v727_v60, 0.0  ;;  %v554_v60 = vpack.c.bf16 %v4187_v56, %v4187_v56 }
 0x626   :  { %v565_v52 = vpop.permute.xlu0 %564  ;;  %v676_v53 = vpop.permute.xlu1 %675  ;;  %3633 = vmatprep.subr.bf16.mxu1 %v3969_v31 }
 0x627   :  { %v762_v55 = vpack.c.bf16 %v732_v50, %v731_v47  ;;  %v698_v57 = vadd.f32 %v4195_v61, %v565_v52  ;;  %v725_v4 = vadd.f32 %v4220_v54, %v676_v53  ;;  %v553_v61 = vpack.c.bf16 %v4183_v51, %v4183_v51 }
 0x629   :  { %v730_v62 = vmax.f32 %v698_v57, 0.0  ;;  %3634 = vmatpush3.bf16.msra.mxu1 %v762_v55  ;;  %v757_v10 = vmax.f32 %v725_v4, 0.0 }
 0x62a   :  { %v688_v63 = vpop.permute.xlu0 %687  ;;  %v668_v0 = vpop.permute.xlu1 %667  ;;  %3635 = vmatprep.subr.bf16.mxu1 %v3969_v31 }
 0x62b   :  { %v761_v1 = vpack.c.bf16 %v730_v62, %v729_v59  ;;  %v728_v2 = vadd.f32 %v4220_v54, %v688_v63  ;;  %v723_v11 = vadd.f32 %v4220_v54, %v668_v0 }
 0x62d   :  { %v760_v5 = vmax.f32 %v728_v2, 0.0  ;;  %3636 = vmatpush3.bf16.msra.mxu1 %v761_v1  ;;  %v755_v16 = vmax.f32 %v723_v11, 0.0 }
 0x62e   :  { %v680_v6 = vpop.permute.xlu0 %679  ;;  %v660_v7 = vpop.permute.xlu1 %659  ;;  %3661 = vmatprep.subr.mxu1 %v3969_v31 }
 0x62f   :  { %v776_v8 = vpack.c.bf16 %v760_v5, %v759_v3  ;;  %v726_v9 = vadd.f32 %v4220_v54, %v680_v6  ;;  %v721_v17 = vadd.f32 %v4220_v54, %v660_v7  ;;  %v858_v6 = vld [vmem:[%s4754_s7] sm:$0xff] }
 0x630   :  { %3638 = vmatmul.mubr.bf16.vlgmr.msra.gmra.mxu1 %v553_v61 }
 0x631   :  { %v758_v12 = vmax.f32 %v726_v9, 0.0  ;;  %3642 = vmatpush3.bf16.msra.mxu0 %v776_v8  ;;  %3663 = vmatprep.mubr.msk.f32.mxu1 %vm3970_vm2, %v3969_v31  ;;  %v753_v23 = vmax.f32 %v721_v17, 0.0 }
 0x632   :  { %v672_v13 = vpop.permute.xlu0 %671  ;;  %v652_v14 = vpop.permute.xlu1 %651  ;;  %3643 = vmatprep.subr.bf16.mxu0 %v3969_v31 }
 0x633   :  { %v775_v51 = vpack.c.bf16 %v758_v12, %v757_v10  ;;  %v724_v15 = vadd.f32 %v4220_v54, %v672_v13  ;;  %v719_v24 = vadd.f32 %v4220_v54, %v652_v14 }
 0x635   :  { %v756_v18 = vmax.f32 %v724_v15, 0.0  ;;  %3644 = vmatpush3.bf16.msra.mxu0 %v775_v51  ;;  %v751_v30 = vmax.f32 %v719_v24, 0.0  ;;  %v3328_v24 = vld [vmem:[%s4755_s8 + $0x8] sm:$0xff] }
 0x636   :  { %v664_v19 = vpop.permute.xlu0 %663  ;;  %v644_v20 = vpop.permute.xlu1 %643  ;;  %3645 = vmatprep.subr.bf16.mxu0 %v3969_v31 }
 0x637   :  { %v774_v21 = vpack.c.bf16 %v756_v18, %v755_v16  ;;  %v722_v22 = vadd.f32 %v4220_v54, %v664_v19  ;;  %v717_v32 = vadd.f32 %v4220_v54, %v644_v20 }
 0x639   :  { %v754_v25 = vmax.f32 %v722_v22, 0.0  ;;  %3646 = vmatpush3.bf16.msra.mxu0 %v774_v21  ;;  %v749_v37 = vmax.f32 %v717_v32, 0.0  ;;  %v1010_v21 = vld [vmem:[%s4755_s8] sm:$0xff] }
 0x63a   :  { %v656_v26 = vpop.permute.xlu0 %655  ;;  %3647 = vmatprep.subr.bf16.mxu0 %v3969_v31  ;;  %v636_v29 = vpop.permute.xlu1 %635 }
 0x63b   :  { %v773_v27 = vpack.c.bf16 %v754_v25, %v753_v23  ;;  %v720_v28 = vadd.f32 %v4220_v54, %v656_v26  ;;  %v715_v38 = vadd.f32 %v4220_v54, %v636_v29 }
 0x63d   :  { %v752_v33 = vmax.f32 %v720_v28, 0.0  ;;  %3648 = vmatpush3.bf16.msra.mxu0 %v773_v27  ;;  %v747_v46 = vmax.f32 %v715_v38, 0.0 }
 0x63e   :  { %v648_v34 = vpop.permute.xlu0 %647  ;;  %3649 = vmatprep.subr.bf16.mxu0 %v3969_v31  ;;  %v628_v40 = vpop.permute.xlu1 %627 }
 0x63f   :  { %v772_v35 = vpack.c.bf16 %v752_v33, %v751_v30  ;;  %v718_v36 = vadd.f32 %v4220_v54, %v648_v34  ;;  %v713_v47 = vadd.f32 %v4220_v54, %v628_v40 }
 0x641   :  { %v750_v39 = vmax.f32 %v718_v36, 0.0  ;;  %3650 = vmatpush3.bf16.msra.mxu0 %v772_v35  ;;  %v745_v55 = vmax.f32 %v713_v47, 0.0  ;;  %v3329_v35 = vld [vmem:[%s4751_s4 + $0x8] sm:$0x3f] }
 0x642   :  { %v640_v41 = vpop.permute.xlu0 %639  ;;  %3651 = vmatprep.subr.bf16.mxu0 %v3969_v31 }
 0x643   :  { %v771_v42 = vpack.c.bf16 %v750_v39, %v749_v37  ;;  %v716_v43 = vadd.f32 %v4220_v54, %v640_v41 }
 0x645   :  { %v748_v48 = vmax.f32 %v716_v43, 0.0  ;;  %3652 = vmatpush3.bf16.msra.mxu0 %v771_v42 }
 0x646   :  { %v632_v50 = vpop.permute.xlu0 %631  ;;  %3653 = vmatprep.subr.bf16.mxu0 %v3969_v31 }
 0x647   :  { %v770_v52 = vpack.c.bf16 %v748_v48, %v747_v46  ;;  %v714_v53 = vadd.f32 %v4220_v54, %v632_v50  ;;  %v857_v54 = vld [vmem:[%s4753_s6] sm:$0xff] }
 0x649   :  { %v746_v57 = vmax.f32 %v714_v53, 0.0  ;;  %3654 = vmatpush3.bf16.msra.mxu0 %v770_v52 }
 0x64a   :  { %3655 = vmatprep.subr.bf16.mxu0 %v3969_v31 }
 0x64b   :  { %v769_v59 = vpack.c.bf16 %v746_v57, %v745_v55 }
 0x64d   :  { %3656 = vmatpush3.bf16.msra.mxu0 %v769_v59 }
 0x64e   :  { %3681 = vmatprep.subr.bf16.mxu0 %v3969_v31 }
 0x650   :  { %3658 = vmatmul.mubr.bf16.vlgmr.msra.gmra.mxu0 %v554_v60 }
 0x651   :  { %3697 = vmatprep.mubr.msk.bf16.mxu0 %vm3970_vm2, %v3969_v31 }
 0x6f0   :  { %v811_v62 = vpop.f32.mrf.mxu1 }
 0x6f1   :  { %3662 = vmatpush3.msk.msra.mxu1 %vm863_vm4, %v811_v62 }
 0x6f2   :  { %v3639_v63 = vpop.f32.mrf.mxu1  ;;  %3664 = vmatmul.mubr.msk.f32.vlgmr.msra.gmra.mxu1 %vm859_vm5, %v857_v54  ;;  %3666 = vmatprep.subr.mxu1 %v3969_v31 }
 0x6f3   :  { %3668 = vmatprep.mubr.msk.f32.mxu1 %vm3970_vm2, %v3969_v31 }
 0x6f4   :  { %v814_v56 = vpop.f32.mrf.mxu1 }
 0x6f6   :  { %v3640_v0 = vpop.f32.mrf.mxu1 }
 0x710   :  { %v851_v1 = vpop.f32.mrf.mxu0 }
 0x711   :  { %3667 = vmatpush3.msk.msra.mxu1 %vm863_vm4, %v851_v1 }
 0x712   :  { %v3659_v2 = vpop.f32.mrf.mxu0  ;;  %3669 = vmatmul.mubr.msk.f32.vlgmr.msra.gmra.mxu1 %vm859_vm5, %v857_v54  ;;  %3671 = vmatprep.subr.mxu1 %v3969_v31 }
 0x713   :  { %3673 = vmatprep.mubr.msk.f32.mxu1 %vm3970_vm2, %v3969_v31 }
 0x714   :  { %v854_v3 = vpop.f32.mrf.mxu0 }
 0x716   :  { %v3660_v4 = vpop.f32.mrf.mxu0 }
 0x7b2   :  { %v933_v5 = vpop.f32.mrf.mxu1 }
 0x7b3   :  { %v934_v7 = vadd.f32 %v933_v5, %v858_v6 }
 0x7b4   :  { %v3665_v61 = vpop.f32.mrf.mxu1 }
 0x7b5   :  { %v1016_v12 = vmul.f32 %v934_v7, %v934_v7 }
 0x7d2   :  { %v1006_v8 = vpop.f32.mrf.mxu1 }
 0x7d3   :  { %v1007_v9 = vadd.f32 %v1006_v8, %v858_v6 }
 0x7d4   :  { %v3670_v10 = vpop.f32.mrf.mxu1 }
 0x7d5   :  { %v1013_v11 = vadd.f32 %v1007_v9, %v934_v7  ;;  %v1017_v13 = vmul.f32 %v1007_v9, %v1007_v9 }
 0x7d7   :  { %1014 = vadd.xlane.f32.xlu1 %v1013_v11  ;;  %v1018_v14 = vadd.f32 %v1017_v13, %v1016_v12 }
 0x7d9   :  { %1019 = vadd.xlane.f32.xlu0 %v1018_v14 }
 0x860   :  { %v1015_v51 = vpop.xlane.xlu1 %1014 }
 0x861   :  { %v1021_v15 = vmul.f32 0.00390625, %v1015_v51 }
 0x862   :  { %v1020_v16 = vpop.xlane.xlu0 %1019 }
 0x863   :  { %v1023_v17 = vmul.f32 %v1021_v15, %v1021_v15  ;;  %v1022_v18 = vmul.f32 0.00390625, %v1020_v16 }
 0x865   :  { %v1024_v19 = vsub.f32 %v1022_v18, %v1023_v17 }
 0x867   :  { %v1025_v20 = vadd.f32 1e-05, %v1024_v19 }
 0x869   :  { %3936 = vrsqrt.f32 %v1025_v20 }
 0x876   :  { %v3937_v22 = vpop.eup %3936 }
 0x877   :  { %v1027_v23 = vmul.f32 %v3937_v22, %v1010_v21 }
 0x879   :  { %1032 = vperm.xlu0 %3923, %v1027_v23   ;;  %v1028_v25 = vmul.f32 %v1027_v23, %v1021_v15 }
 0x87b   :  { %v1029_v26 = vsub.f32 %v3328_v24, %v1028_v25 }
 0x87d   :  { %1039 = vperm.xlu1 %3922, %v1029_v26  }
 0x8f4   :  { %v1033_v27 = vpop.permute.xlu0 %1032 }
 0x8f5   :  { %v1035_v28 = vmul.f32 %v1033_v27, %v934_v7  ;;  %v1036_v29 = vmul.f32 %v1033_v27, %v1007_v9 }
 0x8f8   :  { %v1040_v30 = vpop.permute.xlu1 %1039 }
 0x8f9   :  { %v1042_v32 = vadd.f32 %v1040_v30, %v1035_v28  ;;  %v1043_v33 = vadd.f32 %v1040_v30, %v1036_v29 }
 0x8fb   :  { %v4280_v34 = vadd.f32 %v4164_v44, %v1042_v32  ;;  %v4286_v36 = vadd.f32 %v4167_v45, %v1043_v33  ;;  %v3330_v44 = vld [vmem:[%s4752_s5 + $0x8] sm:$0x3f] }
 0x8fd   :  { %3672 = vmatpush3.msra.mxu1 %v4280_v34 }
 0x8fe   :  { %3674 = vmatmul.mubr.msk.f32.vlgmr.msra.gmra.mxu1 %vm409_vm3, %v3329_v35  ;;  %3676 = vmatprep.subr.mxu1 %v3969_v31 }
 0x8ff   :  { %3677 = vmatpush3.msra.mxu1 %v4286_v36  ;;  %3678 = vmatprep.mubr.msk.f32.mxu1 %vm3970_vm2, %v3969_v31 }
 0x900   :  { %3701 = vmatprep.subr.bf16.mxu1 %v3969_v31 }
 0x902   :  { %3679 = vmatmul.mubr.msk.f32.vlgmr.msra.gmra.mxu1 %vm409_vm3, %v3329_v35 }
 0x903   :  { %3717 = vmatprep.mubr.msk.bf16.mxu1 %vm3970_vm2, %v3969_v31 }
 0x9be   :  { %v1119_v45 = vpop.f32.mrf.mxu1 }
 0x9bf   :  { %v4301_v37 = vadd.f32 %v3330_v44, %v1119_v45 }
 0x9c0   :  { %v3675_v38 = vpop.f32.mrf.mxu1 }
 0x9c1   :  { %v1198_v39 = vrot.slane %v4301_v37, %v4181_v49  ;;  %v4311_v46 = vrot.slane %v4301_v37, %v4191_v58 }
 0x9c2   :  { %v1189_v40 = vpop.f32.mrf.mxu1 }
 0x9c3   :  { %1260 = vbcast.lane.b32.xlu0 %v1198_v39, 376  ;;  %1256 = vbcast.lane.b32.xlu1 %v1198_v39, 368  ;;  %v4305_v42 = vadd.f32 %v3330_v44, %v1189_v40 }
 0x9c4   :  { %v3680_v41 = vpop.f32.mrf.mxu1 }
 0x9c5   :  { %v1265_v43 = vrot.slane %v4305_v42, %v4181_v49  ;;  %v4337_v40 = vrot.slane %v4305_v42, %v4191_v58 }
 0x9c7   :  { %1252 = vbcast.lane.b32.xlu0 %v1198_v39, 360  ;;  %1248 = vbcast.lane.b32.xlu1 %v1198_v39, 352 }
 0x9cb   :  { %1244 = vbcast.lane.b32.xlu0 %v1198_v39, 344  ;;  %1240 = vbcast.lane.b32.xlu1 %v1198_v39, 336 }
 0x9cf   :  { %1236 = vbcast.lane.b32.xlu0 %v1198_v39, 328  ;;  %1232 = vbcast.lane.b32.xlu1 %v1198_v39, 320 }
 0x9d3   :  { %1228 = vbcast.lane.b32.xlu0 %v1198_v39, 312  ;;  %1224 = vbcast.lane.b32.xlu1 %v1198_v39, 304 }
 0x9d7   :  { %1220 = vbcast.lane.b32.xlu0 %v1198_v39, 296  ;;  %1216 = vbcast.lane.b32.xlu1 %v1198_v39, 288 }
 0x9db   :  { %1212 = vbcast.lane.b32.xlu0 %v1198_v39, 280  ;;  %1208 = vbcast.lane.b32.xlu1 %v1198_v39, 272 }
 0x9df   :  { %1204 = vbcast.lane.b32.xlu0 %v1198_v39, 264  ;;  %1200 = vbcast.lane.b32.xlu1 %v1198_v39, 256 }
 0x9e3   :  { %1327 = vbcast.lane.b32.xlu0 %v1265_v43, 376  ;;  %1323 = vbcast.lane.b32.xlu1 %v1265_v43, 368 }
 0x9e7   :  { %1319 = vbcast.lane.b32.xlu0 %v1265_v43, 360  ;;  %1315 = vbcast.lane.b32.xlu1 %v1265_v43, 352 }
 0x9eb   :  { %1311 = vbcast.lane.b32.xlu0 %v1265_v43, 344  ;;  %1307 = vbcast.lane.b32.xlu1 %v1265_v43, 336 }
 0x9ef   :  { %1303 = vbcast.lane.b32.xlu0 %v1265_v43, 328  ;;  %1299 = vbcast.lane.b32.xlu1 %v1265_v43, 320 }
 0x9f3   :  { %1295 = vbcast.lane.b32.xlu0 %v1265_v43, 312  ;;  %1291 = vbcast.lane.b32.xlu1 %v1265_v43, 304 }
 0x9f7   :  { %1287 = vbcast.lane.b32.xlu0 %v1265_v43, 296  ;;  %1283 = vbcast.lane.b32.xlu1 %v1265_v43, 288 }
 0x9fb   :  { %1279 = vbcast.lane.b32.xlu0 %v1265_v43, 280  ;;  %1275 = vbcast.lane.b32.xlu1 %v1265_v43, 272 }
 0x9ff   :  { %1271 = vbcast.lane.b32.xlu0 %v1265_v43, 264  ;;  %1267 = vbcast.lane.b32.xlu1 %v1265_v43, 256 }
 0xa35   :  { %v1261_v47 = vpop.permute.xlu0 %1260  ;;  %v1257_v48 = vpop.permute.xlu1 %1256 }
 0xa36   :  { %v1352_v50 = vadd.f32 %v4311_v46, %v1261_v47  ;;  %v1351_v52 = vadd.f32 %v4311_v46, %v1257_v48 }
 0xa38   :  { %v1384_v53 = vmax.f32 %v1352_v50, 0.0  ;;  %v1383_v55 = vmax.f32 %v1351_v52, 0.0 }
 0xa39   :  { %v1253_v57 = vpop.permute.xlu0 %1252  ;;  %v1249_v59 = vpop.permute.xlu1 %1248 }
 0xa3a   :  { %v1408_v60 = vpack.c.bf16 %v1384_v53, %v1383_v55  ;;  %v1350_v54 = vadd.f32 %v4311_v46, %v1253_v57  ;;  %v1349_v62 = vadd.f32 %v4311_v46, %v1249_v59 }
 0xa3c   :  { %v1382_v63 = vmax.f32 %v1350_v54, 0.0  ;;  %v1381_v56 = vmax.f32 %v1349_v62, 0.0  ;;  %3682 = vmatpush3.bf16.msra.mxu0 %v1408_v60 }
 0xa3d   :  { %v1245_v0 = vpop.permute.xlu0 %1244  ;;  %v1241_v1 = vpop.permute.xlu1 %1240  ;;  %3683 = vmatprep.subr.bf16.mxu0 %v3969_v31 }
 0xa3e   :  { %v1407_v2 = vpack.c.bf16 %v1382_v63, %v1381_v56  ;;  %v1348_v3 = vadd.f32 %v4311_v46, %v1245_v0  ;;  %v1347_v4 = vadd.f32 %v4311_v46, %v1241_v1 }
 0xa40   :  { %v1380_v5 = vmax.f32 %v1348_v3, 0.0  ;;  %v1379_v61 = vmax.f32 %v1347_v4, 0.0  ;;  %3684 = vmatpush3.bf16.msra.mxu0 %v1407_v2 }
 0xa41   :  { %v1237_v6 = vpop.permute.xlu0 %1236  ;;  %v1233_v7 = vpop.permute.xlu1 %1232  ;;  %3685 = vmatprep.subr.bf16.mxu0 %v3969_v31 }
 0xa42   :  { %v1406_v8 = vpack.c.bf16 %v1380_v5, %v1379_v61  ;;  %v1346_v9 = vadd.f32 %v4311_v46, %v1237_v6  ;;  %v1345_v10 = vadd.f32 %v4311_v46, %v1233_v7 }
 0xa44   :  { %v1378_v11 = vmax.f32 %v1346_v9, 0.0  ;;  %v1377_v12 = vmax.f32 %v1345_v10, 0.0  ;;  %3686 = vmatpush3.bf16.msra.mxu0 %v1406_v8 }
 0xa45   :  { %v1229_v13 = vpop.permute.xlu0 %1228  ;;  %v1225_v14 = vpop.permute.xlu1 %1224  ;;  %3687 = vmatprep.subr.bf16.mxu0 %v3969_v31 }
 0xa46   :  { %v1405_v51 = vpack.c.bf16 %v1378_v11, %v1377_v12  ;;  %v1344_v15 = vadd.f32 %v4311_v46, %v1229_v13  ;;  %v1343_v16 = vadd.f32 %v4311_v46, %v1225_v14 }
 0xa48   :  { %v1376_v17 = vmax.f32 %v1344_v15, 0.0  ;;  %v1375_v18 = vmax.f32 %v1343_v16, 0.0  ;;  %3688 = vmatpush3.bf16.msra.mxu0 %v1405_v51 }
 0xa49   :  { %v1221_v19 = vpop.permute.xlu0 %1220  ;;  %v1217_v20 = vpop.permute.xlu1 %1216  ;;  %3689 = vmatprep.subr.bf16.mxu0 %v3969_v31 }
 0xa4a   :  { %v1404_v21 = vpack.c.bf16 %v1376_v17, %v1375_v18  ;;  %v1342_v22 = vadd.f32 %v4311_v46, %v1221_v19  ;;  %v1341_v23 = vadd.f32 %v4311_v46, %v1217_v20 }
 0xa4c   :  { %v1374_v24 = vmax.f32 %v1342_v22, 0.0  ;;  %v1373_v25 = vmax.f32 %v1341_v23, 0.0  ;;  %3690 = vmatpush3.bf16.msra.mxu0 %v1404_v21 }
 0xa4d   :  { %v1213_v26 = vpop.permute.xlu0 %1212  ;;  %v1209_v27 = vpop.permute.xlu1 %1208  ;;  %3691 = vmatprep.subr.bf16.mxu0 %v3969_v31 }
 0xa4e   :  { %v1403_v28 = vpack.c.bf16 %v1374_v24, %v1373_v25  ;;  %v1340_v29 = vadd.f32 %v4311_v46, %v1213_v26  ;;  %v1339_v30 = vadd.f32 %v4311_v46, %v1209_v27 }
 0xa50   :  { %v1372_v32 = vmax.f32 %v1340_v29, 0.0  ;;  %v1371_v33 = vmax.f32 %v1339_v30, 0.0  ;;  %3692 = vmatpush3.bf16.msra.mxu0 %v1403_v28 }
 0xa51   :  { %v1205_v35 = vpop.permute.xlu0 %1204  ;;  %v1201_v44 = vpop.permute.xlu1 %1200  ;;  %3693 = vmatprep.subr.bf16.mxu0 %v3969_v31 }
 0xa52   :  { %v1402_v45 = vpack.c.bf16 %v1372_v32, %v1371_v33  ;;  %v1338_v38 = vadd.f32 %v4311_v46, %v1205_v35  ;;  %v1337_v39 = vadd.f32 %v4311_v46, %v1201_v44  ;;  %v1193_v46 = vpack.c.bf16 %v4301_v37, %v4301_v37 }
 0xa54   :  { %v1370_v41 = vmax.f32 %v1338_v38, 0.0  ;;  %v1369_v43 = vmax.f32 %v1337_v39, 0.0  ;;  %3694 = vmatpush3.bf16.msra.mxu0 %v1402_v45 }
 0xa55   :  { %v1328_v47 = vpop.permute.xlu0 %1327  ;;  %v1324_v48 = vpop.permute.xlu1 %1323  ;;  %3695 = vmatprep.subr.bf16.mxu0 %v3969_v31 }
 0xa56   :  { %v1401_v50 = vpack.c.bf16 %v1370_v41, %v1369_v43  ;;  %v1368_v52 = vadd.f32 %v4337_v40, %v1328_v47  ;;  %v1367_v53 = vadd.f32 %v4337_v40, %v1324_v48  ;;  %v1194_v48 = vpack.c.bf16 %v4305_v42, %v4305_v42 }
 0xa58   :  { %v1400_v55 = vmax.f32 %v1368_v52, 0.0  ;;  %v1399_v57 = vmax.f32 %v1367_v53, 0.0  ;;  %3696 = vmatpush3.bf16.msra.mxu0 %v1401_v50 }
 0xa59   :  { %v1320_v59 = vpop.permute.xlu0 %1319  ;;  %v1316_v60 = vpop.permute.xlu1 %1315  ;;  %3721 = vmatprep.subr.mxu0 %v3969_v31 }
 0xa5a   :  { %v1416_v54 = vpack.c.bf16 %v1400_v55, %v1399_v57  ;;  %v1366_v62 = vadd.f32 %v4337_v40, %v1320_v59  ;;  %v1365_v63 = vadd.f32 %v4337_v40, %v1316_v60 }
 0xa5b   :  { %3698 = vmatmul.mubr.bf16.vlgmr.msra.gmra.mxu0 %v1193_v46 }
 0xa5c   :  { %v1398_v56 = vmax.f32 %v1366_v62, 0.0  ;;  %v1397_v0 = vmax.f32 %v1365_v63, 0.0  ;;  %3702 = vmatpush3.bf16.msra.mxu1 %v1416_v54  ;;  %3723 = vmatprep.mubr.msk.f32.mxu0 %vm3970_vm2, %v3969_v31  ;;  %v3334_v62 = vld [vmem:[%s4754_s7 + $0x8] sm:$0xff] }
 0xa5d   :  { %v1312_v1 = vpop.permute.xlu0 %1311  ;;  %v1308_v2 = vpop.permute.xlu1 %1307  ;;  %3703 = vmatprep.subr.bf16.mxu1 %v3969_v31 }
 0xa5e   :  { %v1415_v37 = vpack.c.bf16 %v1398_v56, %v1397_v0  ;;  %v1364_v3 = vadd.f32 %v4337_v40, %v1312_v1  ;;  %v1363_v4 = vadd.f32 %v4337_v40, %v1308_v2 }
 0xa60   :  { %v1396_v5 = vmax.f32 %v1364_v3, 0.0  ;;  %v1395_v61 = vmax.f32 %v1363_v4, 0.0  ;;  %3704 = vmatpush3.bf16.msra.mxu1 %v1415_v37 }
 0xa61   :  { %v1304_v6 = vpop.permute.xlu0 %1303  ;;  %v1300_v7 = vpop.permute.xlu1 %1299  ;;  %3705 = vmatprep.subr.bf16.mxu1 %v3969_v31 }
 0xa62   :  { %v1414_v8 = vpack.c.bf16 %v1396_v5, %v1395_v61  ;;  %v1362_v9 = vadd.f32 %v4337_v40, %v1304_v6  ;;  %v1361_v10 = vadd.f32 %v4337_v40, %v1300_v7 }
 0xa64   :  { %v1394_v11 = vmax.f32 %v1362_v9, 0.0  ;;  %v1393_v12 = vmax.f32 %v1361_v10, 0.0  ;;  %3706 = vmatpush3.bf16.msra.mxu1 %v1414_v8 }
 0xa65   :  { %v1296_v13 = vpop.permute.xlu0 %1295  ;;  %v1292_v14 = vpop.permute.xlu1 %1291  ;;  %3707 = vmatprep.subr.bf16.mxu1 %v3969_v31 }
 0xa66   :  { %v1413_v51 = vpack.c.bf16 %v1394_v11, %v1393_v12  ;;  %v1360_v15 = vadd.f32 %v4337_v40, %v1296_v13  ;;  %v1359_v16 = vadd.f32 %v4337_v40, %v1292_v14  ;;  %v3339_v11 = vld [vmem:[%s4755_s8 + $0x10] sm:$0xff]  ;;  %v3340_v14 = vld [vmem:[%s4755_s8 + $0x18] sm:$0xff] }
 0xa68   :  { %v1392_v17 = vmax.f32 %v1360_v15, 0.0  ;;  %v1391_v18 = vmax.f32 %v1359_v16, 0.0  ;;  %3708 = vmatpush3.bf16.msra.mxu1 %v1413_v51 }
 0xa69   :  { %v1288_v19 = vpop.permute.xlu0 %1287  ;;  %v1284_v20 = vpop.permute.xlu1 %1283  ;;  %3709 = vmatprep.subr.bf16.mxu1 %v3969_v31 }
 0xa6a   :  { %v1412_v21 = vpack.c.bf16 %v1392_v17, %v1391_v18  ;;  %v1358_v22 = vadd.f32 %v4337_v40, %v1288_v19  ;;  %v1357_v23 = vadd.f32 %v4337_v40, %v1284_v20 }
 0xa6c   :  { %v1390_v24 = vmax.f32 %v1358_v22, 0.0  ;;  %v1389_v25 = vmax.f32 %v1357_v23, 0.0  ;;  %3710 = vmatpush3.bf16.msra.mxu1 %v1412_v21 }
 0xa6d   :  { %v1280_v26 = vpop.permute.xlu0 %1279  ;;  %v1276_v27 = vpop.permute.xlu1 %1275  ;;  %3711 = vmatprep.subr.bf16.mxu1 %v3969_v31 }
 0xa6e   :  { %v1411_v28 = vpack.c.bf16 %v1390_v24, %v1389_v25  ;;  %v1356_v29 = vadd.f32 %v4337_v40, %v1280_v26  ;;  %v1355_v30 = vadd.f32 %v4337_v40, %v1276_v27  ;;  %v3341_v24 = vld [vmem:[%s4751_s4 + $0x10] sm:$0x3f] }
 0xa70   :  { %v1388_v32 = vmax.f32 %v1356_v29, 0.0  ;;  %v1387_v33 = vmax.f32 %v1355_v30, 0.0  ;;  %3712 = vmatpush3.bf16.msra.mxu1 %v1411_v28 }
 0xa71   :  { %v1272_v35 = vpop.permute.xlu0 %1271  ;;  %v1268_v44 = vpop.permute.xlu1 %1267  ;;  %3713 = vmatprep.subr.bf16.mxu1 %v3969_v31 }
 0xa72   :  { %v1410_v45 = vpack.c.bf16 %v1388_v32, %v1387_v33  ;;  %v1354_v38 = vadd.f32 %v4337_v40, %v1272_v35  ;;  %v1353_v39 = vadd.f32 %v4337_v40, %v1268_v44  ;;  %v3333_v40 = vld [vmem:[%s4753_s6 + $0x8] sm:$0xff] }
 0xa74   :  { %v1386_v41 = vmax.f32 %v1354_v38, 0.0  ;;  %v1385_v43 = vmax.f32 %v1353_v39, 0.0  ;;  %3714 = vmatpush3.bf16.msra.mxu1 %v1410_v45 }
 0xa75   :  { %3715 = vmatprep.subr.bf16.mxu1 %v3969_v31 }
 0xa76   :  { %v1409_v47 = vpack.c.bf16 %v1386_v41, %v1385_v43 }
 0xa78   :  { %3716 = vmatpush3.bf16.msra.mxu1 %v1409_v47 }
 0xa79   :  { %3731 = vmatprep.subr.mxu1 %v3969_v31 }
 0xa7b   :  { %3718 = vmatmul.mubr.bf16.vlgmr.msra.gmra.mxu1 %v1194_v48 }
 0xa7c   :  { %3733 = vmatprep.mubr.msk.f32.mxu1 %vm3970_vm2, %v3969_v31 }
 0xb1b   :  { %v1451_v50 = vpop.f32.mrf.mxu0 }
 0xb1c   :  { %3722 = vmatpush3.msk.msra.mxu0 %vm863_vm4, %v1451_v50 }
 0xb1d   :  { %v3699_v52 = vpop.f32.mrf.mxu0  ;;  %3724 = vmatmul.mubr.msk.f32.vlgmr.msra.gmra.mxu0 %vm859_vm5, %v3333_v40  ;;  %3726 = vmatprep.subr.mxu0 %v3969_v31 }
 0xb1e   :  { %3728 = vmatprep.mubr.msk.f32.mxu0 %vm3970_vm2, %v3969_v31 }
 0xb1f   :  { %v1454_v42 = vpop.f32.mrf.mxu0 }
 0xb21   :  { %v3700_v53 = vpop.f32.mrf.mxu0 }
 0xb3b   :  { %v1491_v55 = vpop.f32.mrf.mxu1 }
 0xb3c   :  { %3727 = vmatpush3.msk.msra.mxu0 %vm863_vm4, %v1491_v55 }
 0xb3d   :  { %v3719_v57 = vpop.f32.mrf.mxu1  ;;  %3729 = vmatmul.mubr.msk.f32.vlgmr.msra.gmra.mxu0 %vm859_vm5, %v3333_v40  ;;  %3736 = vmatprep.subr.mxu0 %v3969_v31 }
 0xb3e   :  { %3738 = vmatprep.mubr.msk.f32.mxu0 %vm3970_vm2, %v3969_v31 }
 0xb3f   :  { %v1494_v46 = vpop.f32.mrf.mxu1 }
 0xb41   :  { %v3720_v59 = vpop.f32.mrf.mxu1 }
 0xbdd   :  { %v1573_v60 = vpop.f32.mrf.mxu0 }
 0xbde   :  { %v1574_v63 = vadd.f32 %v3334_v62, %v1573_v60 }
 0xbdf   :  { %v3725_v54 = vpop.f32.mrf.mxu0 }
 0xbe0   :  { %v1657_v37 = vmul.f32 %v1574_v63, %v1574_v63 }
 0xbfd   :  { %v1646_v56 = vpop.f32.mrf.mxu0 }
 0xbfe   :  { %v1647_v0 = vadd.f32 %v3334_v62, %v1646_v56 }
 0xbff   :  { %v3730_v1 = vpop.f32.mrf.mxu0 }
 0xc00   :  { %v1654_v2 = vadd.f32 %v1647_v0, %v1574_v63  ;;  %v1658_v3 = vmul.f32 %v1647_v0, %v1647_v0 }
 0xc02   :  { %1655 = vadd.xlane.f32.xlu1 %v1654_v2  ;;  %v1659_v4 = vadd.f32 %v1658_v3, %v1657_v37 }
 0xc04   :  { %1660 = vadd.xlane.f32.xlu0 %v1659_v4 }
 0xc8b   :  { %v1656_v5 = vpop.xlane.xlu1 %1655 }
 0xc8c   :  { %v1662_v61 = vmul.f32 0.00390625, %v1656_v5 }
 0xc8d   :  { %v1661_v6 = vpop.xlane.xlu0 %1660 }
 0xc8e   :  { %v1664_v7 = vmul.f32 %v1662_v61, %v1662_v61  ;;  %v1663_v8 = vmul.f32 0.00390625, %v1661_v6 }
 0xc90   :  { %v1665_v9 = vsub.f32 %v1663_v8, %v1664_v7 }
 0xc92   :  { %v1666_v10 = vadd.f32 1e-05, %v1665_v9 }
 0xc94   :  { %3938 = vrsqrt.f32 %v1666_v10 }
 0xca1   :  { %v3939_v12 = vpop.eup %3938 }
 0xca2   :  { %v1668_v13 = vmul.f32 %v3939_v12, %v3339_v11 }
 0xca4   :  { %1673 = vperm.xlu0 %3923, %v1668_v13   ;;  %v1669_v51 = vmul.f32 %v1668_v13, %v1662_v61 }
 0xca6   :  { %v1670_v15 = vsub.f32 %v3340_v14, %v1669_v51 }
 0xca8   :  { %1680 = vperm.xlu1 %3922, %v1670_v15  }
 0xd1f   :  { %v1674_v16 = vpop.permute.xlu0 %1673 }
 0xd20   :  { %v1676_v17 = vmul.f32 %v1674_v16, %v1574_v63  ;;  %v1677_v18 = vmul.f32 %v1674_v16, %v1647_v0 }
 0xd23   :  { %v1681_v19 = vpop.permute.xlu1 %1680 }
 0xd24   :  { %v1683_v20 = vadd.f32 %v1681_v19, %v1676_v17  ;;  %v1684_v21 = vadd.f32 %v1681_v19, %v1677_v18 }
 0xd26   :  { %v4396_v22 = vadd.f32 %v1683_v20, %v4280_v34  ;;  %v4399_v23 = vadd.f32 %v1684_v21, %v4286_v36  ;;  %v3342_v34 = vld [vmem:[%s4752_s5 + $0x10] sm:$0x3f] }
 0xd28   :  { %3732 = vmatpush3.msra.mxu1 %v4396_v22  ;;  %3737 = vmatpush3.msra.mxu0 %v4399_v23 }
 0xd29   :  { %3734 = vmatmul.mubr.msk.f32.vlgmr.msra.gmra.mxu1 %vm409_vm3, %v3341_v24  ;;  %3739 = vmatmul.mubr.msk.f32.vlgmr.msra.gmra.mxu0 %vm409_vm3, %v3341_v24 }
 0xd2a   :  { %3741 = vmatprep.subr.bf16.mxu1 %v3969_v31  ;;  %3761 = vmatprep.subr.bf16.mxu0 %v3969_v31 }
 0xd2b   :  { %3757 = vmatprep.mubr.msk.bf16.mxu1 %vm3970_vm2, %v3969_v31  ;;  %3777 = vmatprep.mubr.msk.bf16.mxu0 %vm3970_vm2, %v3969_v31 }
 0xde9   :  { %v1760_v36 = vpop.f32.mrf.mxu1  ;;  %v1830_v25 = vpop.f32.mrf.mxu0 }
 0xdea   :  { %v4417_v26 = vadd.f32 %v3342_v34, %v1760_v36  ;;  %v4419_v27 = vadd.f32 %v3342_v34, %v1830_v25 }
 0xdeb   :  { %v3735_v28 = vpop.f32.mrf.mxu1  ;;  %v3740_v29 = vpop.f32.mrf.mxu0 }
 0xdec   :  { %v1839_v30 = vrot.slane %v4417_v26, %v4181_v49  ;;  %v1906_v32 = vrot.slane %v4419_v27, %v4181_v49  ;;  %v4427_v33 = vrot.slane %v4417_v26, %v4191_v58  ;;  %v4433_v39 = vrot.slane %v4419_v27, %v4191_v58 }
 0xdee   :  { %1901 = vbcast.lane.b32.xlu0 %v1839_v30, 376  ;;  %1897 = vbcast.lane.b32.xlu1 %v1839_v30, 368 }
 0xdf2   :  { %1968 = vbcast.lane.b32.xlu0 %v1906_v32, 376  ;;  %1964 = vbcast.lane.b32.xlu1 %v1906_v32, 368 }
 0xdf6   :  { %1893 = vbcast.lane.b32.xlu0 %v1839_v30, 360  ;;  %1889 = vbcast.lane.b32.xlu1 %v1839_v30, 352 }
 0xdfa   :  { %1960 = vbcast.lane.b32.xlu0 %v1906_v32, 360  ;;  %1956 = vbcast.lane.b32.xlu1 %v1906_v32, 352 }
 0xdfe   :  { %1885 = vbcast.lane.b32.xlu0 %v1839_v30, 344  ;;  %1881 = vbcast.lane.b32.xlu1 %v1839_v30, 336 }
 0xe02   :  { %1952 = vbcast.lane.b32.xlu0 %v1906_v32, 344  ;;  %1948 = vbcast.lane.b32.xlu1 %v1906_v32, 336 }
 0xe06   :  { %1877 = vbcast.lane.b32.xlu0 %v1839_v30, 328  ;;  %1873 = vbcast.lane.b32.xlu1 %v1839_v30, 320 }
 0xe0a   :  { %1944 = vbcast.lane.b32.xlu0 %v1906_v32, 328  ;;  %1940 = vbcast.lane.b32.xlu1 %v1906_v32, 320 }
 0xe0e   :  { %1869 = vbcast.lane.b32.xlu0 %v1839_v30, 312  ;;  %1865 = vbcast.lane.b32.xlu1 %v1839_v30, 304 }
 0xe12   :  { %1936 = vbcast.lane.b32.xlu0 %v1906_v32, 312  ;;  %1932 = vbcast.lane.b32.xlu1 %v1906_v32, 304 }
 0xe16   :  { %1861 = vbcast.lane.b32.xlu0 %v1839_v30, 296  ;;  %1857 = vbcast.lane.b32.xlu1 %v1839_v30, 288 }
 0xe1a   :  { %1928 = vbcast.lane.b32.xlu0 %v1906_v32, 296  ;;  %1924 = vbcast.lane.b32.xlu1 %v1906_v32, 288 }
 0xe1e   :  { %1853 = vbcast.lane.b32.xlu0 %v1839_v30, 280  ;;  %1849 = vbcast.lane.b32.xlu1 %v1839_v30, 272 }
 0xe22   :  { %1920 = vbcast.lane.b32.xlu0 %v1906_v32, 280  ;;  %1916 = vbcast.lane.b32.xlu1 %v1906_v32, 272 }
 0xe26   :  { %1845 = vbcast.lane.b32.xlu0 %v1839_v30, 264  ;;  %1841 = vbcast.lane.b32.xlu1 %v1839_v30, 256 }
 0xe2a   :  { %1912 = vbcast.lane.b32.xlu0 %v1906_v32, 264  ;;  %1908 = vbcast.lane.b32.xlu1 %v1906_v32, 256 }
 0xe60   :  { %v1902_v35 = vpop.permute.xlu0 %1901  ;;  %v1898_v44 = vpop.permute.xlu1 %1897 }
 0xe61   :  { %v1993_v45 = vadd.f32 %v4427_v33, %v1902_v35  ;;  %v1992_v38 = vadd.f32 %v4427_v33, %v1898_v44 }
 0xe63   :  { %v2025_v41 = vmax.f32 %v1993_v45, 0.0  ;;  %v2024_v43 = vmax.f32 %v1992_v38, 0.0 }
 0xe64   :  { %v1969_v47 = vpop.permute.xlu0 %1968  ;;  %v1965_v48 = vpop.permute.xlu1 %1964 }
 0xe65   :  { %v2049_v40 = vpack.c.bf16 %v2025_v41, %v2024_v43  ;;  %v2009_v50 = vadd.f32 %v4433_v39, %v1969_v47  ;;  %v2008_v52 = vadd.f32 %v4433_v39, %v1965_v48 }
 0xe67   :  { %v2041_v42 = vmax.f32 %v2009_v50, 0.0  ;;  %v2040_v53 = vmax.f32 %v2008_v52, 0.0  ;;  %3742 = vmatpush3.bf16.msra.mxu1 %v2049_v40 }
 0xe68   :  { %v1894_v55 = vpop.permute.xlu0 %1893  ;;  %v1890_v57 = vpop.permute.xlu1 %1889  ;;  %3743 = vmatprep.subr.bf16.mxu1 %v3969_v31 }
 0xe69   :  { %v2057_v46 = vpack.c.bf16 %v2041_v42, %v2040_v53  ;;  %v1991_v59 = vadd.f32 %v4427_v33, %v1894_v55  ;;  %v1990_v60 = vadd.f32 %v4427_v33, %v1890_v57 }
 0xe6b   :  { %v2023_v54 = vmax.f32 %v1991_v59, 0.0  ;;  %v2022_v62 = vmax.f32 %v1990_v60, 0.0  ;;  %3762 = vmatpush3.bf16.msra.mxu0 %v2057_v46 }
 0xe6c   :  { %v1961_v63 = vpop.permute.xlu0 %1960  ;;  %v1957_v56 = vpop.permute.xlu1 %1956  ;;  %3763 = vmatprep.subr.bf16.mxu0 %v3969_v31 }
 0xe6d   :  { %v2048_v0 = vpack.c.bf16 %v2023_v54, %v2022_v62  ;;  %v2007_v1 = vadd.f32 %v4433_v39, %v1961_v63  ;;  %v2006_v2 = vadd.f32 %v4433_v39, %v1957_v56 }
 0xe6f   :  { %v2039_v37 = vmax.f32 %v2007_v1, 0.0  ;;  %v2038_v3 = vmax.f32 %v2006_v2, 0.0  ;;  %3744 = vmatpush3.bf16.msra.mxu1 %v2048_v0 }
 0xe70   :  { %v1886_v4 = vpop.permute.xlu0 %1885  ;;  %v1882_v5 = vpop.permute.xlu1 %1881  ;;  %3745 = vmatprep.subr.bf16.mxu1 %v3969_v31 }
 0xe71   :  { %v2056_v61 = vpack.c.bf16 %v2039_v37, %v2038_v3  ;;  %v1989_v6 = vadd.f32 %v4427_v33, %v1886_v4  ;;  %v1988_v7 = vadd.f32 %v4427_v33, %v1882_v5 }
 0xe73   :  { %v2021_v8 = vmax.f32 %v1989_v6, 0.0  ;;  %v2020_v9 = vmax.f32 %v1988_v7, 0.0  ;;  %3764 = vmatpush3.bf16.msra.mxu0 %v2056_v61 }
 0xe74   :  { %v1953_v10 = vpop.permute.xlu0 %1952  ;;  %v1949_v11 = vpop.permute.xlu1 %1948  ;;  %3765 = vmatprep.subr.bf16.mxu0 %v3969_v31 }
 0xe75   :  { %v2047_v12 = vpack.c.bf16 %v2021_v8, %v2020_v9  ;;  %v2005_v13 = vadd.f32 %v4433_v39, %v1953_v10  ;;  %v2004_v14 = vadd.f32 %v4433_v39, %v1949_v11 }
 0xe77   :  { %v2037_v51 = vmax.f32 %v2005_v13, 0.0  ;;  %v2036_v15 = vmax.f32 %v2004_v14, 0.0  ;;  %3746 = vmatpush3.bf16.msra.mxu1 %v2047_v12 }
 0xe78   :  { %v1878_v16 = vpop.permute.xlu0 %1877  ;;  %v1874_v17 = vpop.permute.xlu1 %1873  ;;  %3747 = vmatprep.subr.bf16.mxu1 %v3969_v31 }
 0xe79   :  { %v2055_v18 = vpack.c.bf16 %v2037_v51, %v2036_v15  ;;  %v1987_v19 = vadd.f32 %v4427_v33, %v1878_v16  ;;  %v1986_v20 = vadd.f32 %v4427_v33, %v1874_v17 }
 0xe7b   :  { %v2019_v21 = vmax.f32 %v1987_v19, 0.0  ;;  %v2018_v24 = vmax.f32 %v1986_v20, 0.0  ;;  %3766 = vmatpush3.bf16.msra.mxu0 %v2055_v18 }
 0xe7c   :  { %v1945_v34 = vpop.permute.xlu0 %1944  ;;  %v1941_v36 = vpop.permute.xlu1 %1940  ;;  %3767 = vmatprep.subr.bf16.mxu0 %v3969_v31 }
 0xe7d   :  { %v2046_v25 = vpack.c.bf16 %v2019_v21, %v2018_v24  ;;  %v2003_v28 = vadd.f32 %v4433_v39, %v1945_v34  ;;  %v2002_v29 = vadd.f32 %v4433_v39, %v1941_v36 }
 0xe7f   :  { %v2035_v30 = vmax.f32 %v2003_v28, 0.0  ;;  %v2034_v32 = vmax.f32 %v2002_v29, 0.0  ;;  %3748 = vmatpush3.bf16.msra.mxu1 %v2046_v25 }
 0xe80   :  { %v1870_v35 = vpop.permute.xlu0 %1869  ;;  %v1866_v44 = vpop.permute.xlu1 %1865  ;;  %3749 = vmatprep.subr.bf16.mxu1 %v3969_v31 }
 0xe81   :  { %v2054_v45 = vpack.c.bf16 %v2035_v30, %v2034_v32  ;;  %v1985_v38 = vadd.f32 %v4427_v33, %v1870_v35  ;;  %v1984_v41 = vadd.f32 %v4427_v33, %v1866_v44  ;;  %v1834_v44 = vpack.c.bf16 %v4417_v26, %v4417_v26  ;;  %v3345_v26 = vld [vmem:[%s4753_s6 + $0x10] sm:$0xff] }
 0xe83   :  { %v2017_v43 = vmax.f32 %v1985_v38, 0.0  ;;  %v2016_v47 = vmax.f32 %v1984_v41, 0.0  ;;  %3768 = vmatpush3.bf16.msra.mxu0 %v2054_v45  ;;  %v1835_v45 = vpack.c.bf16 %v4419_v27, %v4419_v27 }
 0xe84   :  { %v1937_v48 = vpop.permute.xlu0 %1936  ;;  %v1933_v40 = vpop.permute.xlu1 %1932  ;;  %3769 = vmatprep.subr.bf16.mxu0 %v3969_v31 }
 0xe85   :  { %v2045_v50 = vpack.c.bf16 %v2017_v43, %v2016_v47  ;;  %v2001_v52 = vadd.f32 %v4433_v39, %v1937_v48  ;;  %v2000_v42 = vadd.f32 %v4433_v39, %v1933_v40 }
 0xe87   :  { %v2033_v53 = vmax.f32 %v2001_v52, 0.0  ;;  %v2032_v55 = vmax.f32 %v2000_v42, 0.0  ;;  %3750 = vmatpush3.bf16.msra.mxu1 %v2045_v50  ;;  %v3346_v50 = vld [vmem:[%s4754_s7 + $0x10] sm:$0xff] }
 0xe88   :  { %v1862_v57 = vpop.permute.xlu0 %1861  ;;  %v1858_v46 = vpop.permute.xlu1 %1857  ;;  %3751 = vmatprep.subr.bf16.mxu1 %v3969_v31 }
 0xe89   :  { %v2053_v59 = vpack.c.bf16 %v2033_v53, %v2032_v55  ;;  %v1983_v60 = vadd.f32 %v4427_v33, %v1862_v57  ;;  %v1982_v54 = vadd.f32 %v4427_v33, %v1858_v46 }
 0xe8b   :  { %v2015_v62 = vmax.f32 %v1983_v60, 0.0  ;;  %v2014_v63 = vmax.f32 %v1982_v54, 0.0  ;;  %3770 = vmatpush3.bf16.msra.mxu0 %v2053_v59 }
 0xe8c   :  { %v1929_v56 = vpop.permute.xlu0 %1928  ;;  %v1925_v0 = vpop.permute.xlu1 %1924  ;;  %3771 = vmatprep.subr.bf16.mxu0 %v3969_v31 }
 0xe8d   :  { %v2044_v1 = vpack.c.bf16 %v2015_v62, %v2014_v63  ;;  %v1999_v2 = vadd.f32 %v4433_v39, %v1929_v56  ;;  %v1998_v37 = vadd.f32 %v4433_v39, %v1925_v0 }
 0xe8f   :  { %v2031_v3 = vmax.f32 %v1999_v2, 0.0  ;;  %v2030_v4 = vmax.f32 %v1998_v37, 0.0  ;;  %3752 = vmatpush3.bf16.msra.mxu1 %v2044_v1 }
 0xe90   :  { %v1854_v5 = vpop.permute.xlu0 %1853  ;;  %v1850_v61 = vpop.permute.xlu1 %1849  ;;  %3753 = vmatprep.subr.bf16.mxu1 %v3969_v31 }
 0xe91   :  { %v2052_v6 = vpack.c.bf16 %v2031_v3, %v2030_v4  ;;  %v1981_v7 = vadd.f32 %v4427_v33, %v1854_v5  ;;  %v1980_v8 = vadd.f32 %v4427_v33, %v1850_v61  ;;  %v3351_v4 = vld [vmem:[%s4755_s8 + $0x20] sm:$0xff] }
 0xe93   :  { %v2013_v9 = vmax.f32 %v1981_v7, 0.0  ;;  %v2012_v10 = vmax.f32 %v1980_v8, 0.0  ;;  %3772 = vmatpush3.bf16.msra.mxu0 %v2052_v6  ;;  %v3352_v6 = vld [vmem:[%s4755_s8 + $0x28] sm:$0xff] }
 0xe94   :  { %v1921_v11 = vpop.permute.xlu0 %1920  ;;  %v1917_v12 = vpop.permute.xlu1 %1916  ;;  %3773 = vmatprep.subr.bf16.mxu0 %v3969_v31 }
 0xe95   :  { %v2043_v13 = vpack.c.bf16 %v2013_v9, %v2012_v10  ;;  %v1997_v14 = vadd.f32 %v4433_v39, %v1921_v11  ;;  %v1996_v51 = vadd.f32 %v4433_v39, %v1917_v12 }
 0xe97   :  { %v2029_v15 = vmax.f32 %v1997_v14, 0.0  ;;  %v2028_v16 = vmax.f32 %v1996_v51, 0.0  ;;  %3754 = vmatpush3.bf16.msra.mxu1 %v2043_v13 }
 0xe98   :  { %v1846_v17 = vpop.permute.xlu0 %1845  ;;  %v1842_v18 = vpop.permute.xlu1 %1841  ;;  %3755 = vmatprep.subr.bf16.mxu1 %v3969_v31 }
 0xe99   :  { %v2051_v19 = vpack.c.bf16 %v2029_v15, %v2028_v16  ;;  %v1979_v20 = vadd.f32 %v4427_v33, %v1846_v17  ;;  %v1978_v21 = vadd.f32 %v4427_v33, %v1842_v18  ;;  %v3353_v16 = vld [vmem:[%s4751_s4 + $0x18] sm:$0x3f] }
 0xe9b   :  { %v2011_v24 = vmax.f32 %v1979_v20, 0.0  ;;  %v2010_v34 = vmax.f32 %v1978_v21, 0.0  ;;  %3774 = vmatpush3.bf16.msra.mxu0 %v2051_v19 }
 0xe9c   :  { %v1913_v36 = vpop.permute.xlu0 %1912  ;;  %v1909_v25 = vpop.permute.xlu1 %1908  ;;  %3775 = vmatprep.subr.bf16.mxu0 %v3969_v31 }
 0xe9d   :  { %v2042_v28 = vpack.c.bf16 %v2011_v24, %v2010_v34  ;;  %v1995_v29 = vadd.f32 %v4433_v39, %v1913_v36  ;;  %v1994_v30 = vadd.f32 %v4433_v39, %v1909_v25 }
 0xe9f   :  { %v2027_v32 = vmax.f32 %v1995_v29, 0.0  ;;  %v2026_v35 = vmax.f32 %v1994_v30, 0.0  ;;  %3756 = vmatpush3.bf16.msra.mxu1 %v2042_v28 }
 0xea0   :  { %3781 = vmatprep.subr.mxu1 %v3969_v31 }
 0xea1   :  { %v2050_v33 = vpack.c.bf16 %v2027_v32, %v2026_v35 }
 0xea2   :  { %3758 = vmatmul.mubr.bf16.vlgmr.msra.gmra.mxu1 %v1834_v44 }
 0xea3   :  { %3776 = vmatpush3.bf16.msra.mxu0 %v2050_v33  ;;  %3783 = vmatprep.mubr.msk.f32.mxu1 %vm3970_vm2, %v3969_v31 }
 0xea4   :  { %3786 = vmatprep.subr.mxu0 %v3969_v31 }
 0xea6   :  { %3778 = vmatmul.mubr.bf16.vlgmr.msra.gmra.mxu0 %v1835_v45 }
 0xea7   :  { %3788 = vmatprep.mubr.msk.f32.mxu0 %vm3970_vm2, %v3969_v31 }
 0xf62   :  { %v2092_v39 = vpop.f32.mrf.mxu1 }
 0xf63   :  { %3782 = vmatpush3.msk.msra.mxu1 %vm863_vm4, %v2092_v39 }
 0xf64   :  { %v3759_v38 = vpop.f32.mrf.mxu1  ;;  %3784 = vmatmul.mubr.msk.f32.vlgmr.msra.gmra.mxu1 %vm859_vm5, %v3345_v26  ;;  %3791 = vmatprep.subr.mxu1 %v3969_v31 }
 0xf65   :  { %3793 = vmatprep.mubr.msk.f32.mxu1 %vm3970_vm2, %v3969_v31 }
 0xf66   :  { %v2095_v27 = vpop.f32.mrf.mxu1  ;;  %v2132_v41 = vpop.f32.mrf.mxu0 }
 0xf67   :  { %3787 = vmatpush3.msk.msra.mxu0 %vm863_vm4, %v2132_v41 }
 0xf68   :  { %v3760_v43 = vpop.f32.mrf.mxu1  ;;  %v3779_v47 = vpop.f32.mrf.mxu0  ;;  %3789 = vmatmul.mubr.msk.f32.vlgmr.msra.gmra.mxu0 %vm859_vm5, %v3345_v26  ;;  %3796 = vmatprep.subr.mxu0 %v3969_v31 }
 0xf69   :  { %3798 = vmatprep.mubr.msk.f32.mxu0 %vm3970_vm2, %v3969_v31 }
 0xf6a   :  { %v2135_v48 = vpop.f32.mrf.mxu0 }
 0xf6c   :  { %v3780_v40 = vpop.f32.mrf.mxu0 }
0x1024   :  { %v2214_v52 = vpop.f32.mrf.mxu1 }
0x1025   :  { %v2215_v42 = vadd.f32 %v3346_v50, %v2214_v52 }
0x1026   :  { %v3785_v53 = vpop.f32.mrf.mxu1 }
0x1027   :  { %v2298_v57 = vmul.f32 %v2215_v42, %v2215_v42 }
0x1028   :  { %v2287_v55 = vpop.f32.mrf.mxu0 }
0x1029   :  { %v2288_v46 = vadd.f32 %v3346_v50, %v2287_v55 }
0x102a   :  { %v3790_v59 = vpop.f32.mrf.mxu0 }
0x102b   :  { %v2299_v60 = vmul.f32 %v2288_v46, %v2288_v46  ;;  %v2295_v54 = vadd.f32 %v2288_v46, %v2215_v42 }
0x102d   :  { %2296 = vadd.xlane.f32.xlu1 %v2295_v54  ;;  %v2300_v62 = vadd.f32 %v2299_v60, %v2298_v57 }
0x102f   :  { %2301 = vadd.xlane.f32.xlu0 %v2300_v62 }
0x10b6   :  { %v2297_v63 = vpop.xlane.xlu1 %2296 }
0x10b7   :  { %v2303_v56 = vmul.f32 0.00390625, %v2297_v63 }
0x10b8   :  { %v2302_v0 = vpop.xlane.xlu0 %2301 }
0x10b9   :  { %v2305_v1 = vmul.f32 %v2303_v56, %v2303_v56  ;;  %v2304_v2 = vmul.f32 0.00390625, %v2302_v0 }
0x10bb   :  { %v2306_v37 = vsub.f32 %v2304_v2, %v2305_v1 }
0x10bd   :  { %v2307_v3 = vadd.f32 1e-05, %v2306_v37 }
0x10bf   :  { %3940 = vrsqrt.f32 %v2307_v3 }
0x10cc   :  { %v3941_v5 = vpop.eup %3940 }
0x10cd   :  { %v2309_v61 = vmul.f32 %v3941_v5, %v3351_v4 }
0x10cf   :  { %2314 = vperm.xlu0 %3923, %v2309_v61   ;;  %v2310_v7 = vmul.f32 %v2309_v61, %v2303_v56 }
0x10d1   :  { %v2311_v8 = vsub.f32 %v3352_v6, %v2310_v7 }
0x10d3   :  { %2321 = vperm.xlu1 %3922, %v2311_v8  }
0x114a   :  { %v2315_v9 = vpop.permute.xlu0 %2314 }
0x114b   :  { %v2317_v10 = vmul.f32 %v2315_v9, %v2215_v42  ;;  %v2318_v11 = vmul.f32 %v2315_v9, %v2288_v46 }
0x114e   :  { %v2322_v12 = vpop.permute.xlu1 %2321 }
0x114f   :  { %v2324_v13 = vadd.f32 %v2322_v12, %v2317_v10  ;;  %v2325_v14 = vadd.f32 %v2322_v12, %v2318_v11 }
0x1151   :  { %v4512_v51 = vadd.f32 %v2324_v13, %v4396_v22  ;;  %v4515_v15 = vadd.f32 %v2325_v14, %v4399_v23  ;;  %v3354_v22 = vld [vmem:[%s4752_s5 + $0x18] sm:$0x3f] }
0x1153   :  { %3792 = vmatpush3.msra.mxu1 %v4512_v51  ;;  %3797 = vmatpush3.msra.mxu0 %v4515_v15 }
0x1154   :  { %3794 = vmatmul.mubr.msk.f32.vlgmr.msra.gmra.mxu1 %vm409_vm3, %v3353_v16  ;;  %3799 = vmatmul.mubr.msk.f32.vlgmr.msra.gmra.mxu0 %vm409_vm3, %v3353_v16 }
0x1155   :  { %3801 = vmatprep.subr.bf16.mxu1 %v3969_v31  ;;  %3821 = vmatprep.subr.bf16.mxu0 %v3969_v31 }
0x1156   :  { %3817 = vmatprep.mubr.msk.bf16.mxu1 %vm3970_vm2, %v3969_v31  ;;  %3837 = vmatprep.mubr.msk.bf16.mxu0 %vm3970_vm2, %v3969_v31 }
0x1214   :  { %v2401_v23 = vpop.f32.mrf.mxu1  ;;  %v2471_v17 = vpop.f32.mrf.mxu0 }
0x1215   :  { %v4533_v18 = vadd.f32 %v3354_v22, %v2401_v23  ;;  %v4535_v19 = vadd.f32 %v3354_v22, %v2471_v17 }
0x1216   :  { %v3795_v20 = vpop.f32.mrf.mxu1  ;;  %v3800_v21 = vpop.f32.mrf.mxu0 }
0x1217   :  { %v2480_v24 = vrot.slane %v4533_v18, %v4181_v49  ;;  %v2547_v34 = vrot.slane %v4535_v19, %v4181_v49  ;;  %v4543_v49 = vrot.slane %v4533_v18, %v4191_v58  ;;  %v4549_v30 = vrot.slane %v4535_v19, %v4191_v58 }
0x1219   :  { %2542 = vbcast.lane.b32.xlu0 %v2480_v24, 376  ;;  %2538 = vbcast.lane.b32.xlu1 %v2480_v24, 368 }
0x121d   :  { %2609 = vbcast.lane.b32.xlu0 %v2547_v34, 376  ;;  %2605 = vbcast.lane.b32.xlu1 %v2547_v34, 368 }
0x1221   :  { %2534 = vbcast.lane.b32.xlu0 %v2480_v24, 360  ;;  %2530 = vbcast.lane.b32.xlu1 %v2480_v24, 352 }
0x1225   :  { %2601 = vbcast.lane.b32.xlu0 %v2547_v34, 360  ;;  %2597 = vbcast.lane.b32.xlu1 %v2547_v34, 352 }
0x1229   :  { %2526 = vbcast.lane.b32.xlu0 %v2480_v24, 344  ;;  %2522 = vbcast.lane.b32.xlu1 %v2480_v24, 336 }
0x122d   :  { %2593 = vbcast.lane.b32.xlu0 %v2547_v34, 344  ;;  %2589 = vbcast.lane.b32.xlu1 %v2547_v34, 336 }
0x1231   :  { %2518 = vbcast.lane.b32.xlu0 %v2480_v24, 328  ;;  %2514 = vbcast.lane.b32.xlu1 %v2480_v24, 320 }
0x1235   :  { %2585 = vbcast.lane.b32.xlu0 %v2547_v34, 328  ;;  %2581 = vbcast.lane.b32.xlu1 %v2547_v34, 320 }
0x1239   :  { %2510 = vbcast.lane.b32.xlu0 %v2480_v24, 312  ;;  %2506 = vbcast.lane.b32.xlu1 %v2480_v24, 304 }
0x123d   :  { %2577 = vbcast.lane.b32.xlu0 %v2547_v34, 312  ;;  %2573 = vbcast.lane.b32.xlu1 %v2547_v34, 304 }
0x1241   :  { %2502 = vbcast.lane.b32.xlu0 %v2480_v24, 296  ;;  %2498 = vbcast.lane.b32.xlu1 %v2480_v24, 288 }
0x1245   :  { %2569 = vbcast.lane.b32.xlu0 %v2547_v34, 296  ;;  %2565 = vbcast.lane.b32.xlu1 %v2547_v34, 288 }
0x1249   :  { %2494 = vbcast.lane.b32.xlu0 %v2480_v24, 280  ;;  %2490 = vbcast.lane.b32.xlu1 %v2480_v24, 272 }
0x124d   :  { %2561 = vbcast.lane.b32.xlu0 %v2547_v34, 280  ;;  %2557 = vbcast.lane.b32.xlu1 %v2547_v34, 272 }
0x1251   :  { %2486 = vbcast.lane.b32.xlu0 %v2480_v24, 264  ;;  %2482 = vbcast.lane.b32.xlu1 %v2480_v24, 256 }
0x1255   :  { %2553 = vbcast.lane.b32.xlu0 %v2547_v34, 264  ;;  %2549 = vbcast.lane.b32.xlu1 %v2547_v34, 256 }
0x128b   :  { %v2543_v36 = vpop.permute.xlu0 %2542  ;;  %v2539_v25 = vpop.permute.xlu1 %2538 }
0x128c   :  { %v2634_v28 = vadd.f32 %v4543_v49, %v2543_v36  ;;  %v2633_v29 = vadd.f32 %v4543_v49, %v2539_v25 }
0x128e   :  { %v2666_v32 = vmax.f32 %v2634_v28, 0.0  ;;  %v2665_v35 = vmax.f32 %v2633_v29, 0.0 }
0x128f   :  { %v2610_v44 = vpop.permute.xlu0 %2609  ;;  %v2606_v33 = vpop.permute.xlu1 %2605 }
0x1290   :  { %v2690_v45 = vpack.c.bf16 %v2666_v32, %v2665_v35  ;;  %v2650_v26 = vadd.f32 %v4549_v30, %v2610_v44  ;;  %v2649_v39 = vadd.f32 %v4549_v30, %v2606_v33 }
0x1292   :  { %v2682_v38 = vmax.f32 %v2650_v26, 0.0  ;;  %v2681_v27 = vmax.f32 %v2649_v39, 0.0  ;;  %3802 = vmatpush3.bf16.msra.mxu1 %v2690_v45 }
0x1293   :  { %v2535_v41 = vpop.permute.xlu0 %2534  ;;  %v2531_v43 = vpop.permute.xlu1 %2530  ;;  %3803 = vmatprep.subr.bf16.mxu1 %v3969_v31 }
0x1294   :  { %v2698_v47 = vpack.c.bf16 %v2682_v38, %v2681_v27  ;;  %v2632_v58 = vadd.f32 %v4543_v49, %v2535_v41  ;;  %v2631_v48 = vadd.f32 %v4543_v49, %v2531_v43 }
0x1296   :  { %v2664_v40 = vmax.f32 %v2632_v58, 0.0  ;;  %v2663_v50 = vmax.f32 %v2631_v48, 0.0  ;;  %3822 = vmatpush3.bf16.msra.mxu0 %v2698_v47 }
0x1297   :  { %v2602_v52 = vpop.permute.xlu0 %2601  ;;  %v2598_v42 = vpop.permute.xlu1 %2597  ;;  %3823 = vmatprep.subr.bf16.mxu0 %v3969_v31 }
0x1298   :  { %v2689_v53 = vpack.c.bf16 %v2664_v40, %v2663_v50  ;;  %v2648_v55 = vadd.f32 %v4549_v30, %v2602_v52  ;;  %v2647_v57 = vadd.f32 %v4549_v30, %v2598_v42 }
0x129a   :  { %v2680_v46 = vmax.f32 %v2648_v55, 0.0  ;;  %v2679_v59 = vmax.f32 %v2647_v57, 0.0  ;;  %3804 = vmatpush3.bf16.msra.mxu1 %v2689_v53 }
0x129b   :  { %v2527_v60 = vpop.permute.xlu0 %2526  ;;  %v2523_v54 = vpop.permute.xlu1 %2522  ;;  %3805 = vmatprep.subr.bf16.mxu1 %v3969_v31 }
0x129c   :  { %v2697_v62 = vpack.c.bf16 %v2680_v46, %v2679_v59  ;;  %v2630_v63 = vadd.f32 %v4543_v49, %v2527_v60  ;;  %v2629_v56 = vadd.f32 %v4543_v49, %v2523_v54 }
0x129e   :  { %v2662_v0 = vmax.f32 %v2630_v63, 0.0  ;;  %v2661_v1 = vmax.f32 %v2629_v56, 0.0  ;;  %3824 = vmatpush3.bf16.msra.mxu0 %v2697_v62 }
0x129f   :  { %v2594_v2 = vpop.permute.xlu0 %2593  ;;  %v2590_v37 = vpop.permute.xlu1 %2589  ;;  %3825 = vmatprep.subr.bf16.mxu0 %v3969_v31 }
0x12a0   :  { %v2688_v3 = vpack.c.bf16 %v2662_v0, %v2661_v1  ;;  %v2646_v4 = vadd.f32 %v4549_v30, %v2594_v2  ;;  %v2645_v5 = vadd.f32 %v4549_v30, %v2590_v37 }
0x12a2   :  { %v2678_v61 = vmax.f32 %v2646_v4, 0.0  ;;  %v2677_v6 = vmax.f32 %v2645_v5, 0.0  ;;  %3806 = vmatpush3.bf16.msra.mxu1 %v2688_v3 }
0x12a3   :  { %v2519_v7 = vpop.permute.xlu0 %2518  ;;  %v2515_v8 = vpop.permute.xlu1 %2514  ;;  %3807 = vmatprep.subr.bf16.mxu1 %v3969_v31 }
0x12a4   :  { %v2696_v9 = vpack.c.bf16 %v2678_v61, %v2677_v6  ;;  %v2628_v10 = vadd.f32 %v4543_v49, %v2519_v7  ;;  %v2627_v11 = vadd.f32 %v4543_v49, %v2515_v8 }
0x12a6   :  { %v2660_v12 = vmax.f32 %v2628_v10, 0.0  ;;  %v2659_v13 = vmax.f32 %v2627_v11, 0.0  ;;  %3826 = vmatpush3.bf16.msra.mxu0 %v2696_v9 }
0x12a7   :  { %v2586_v14 = vpop.permute.xlu0 %2585  ;;  %v2582_v16 = vpop.permute.xlu1 %2581  ;;  %3827 = vmatprep.subr.bf16.mxu0 %v3969_v31 }
0x12a8   :  { %v2687_v22 = vpack.c.bf16 %v2660_v12, %v2659_v13  ;;  %v2644_v23 = vadd.f32 %v4549_v30, %v2586_v14  ;;  %v2643_v17 = vadd.f32 %v4549_v30, %v2582_v16 }
0x12aa   :  { %v2676_v20 = vmax.f32 %v2644_v23, 0.0  ;;  %v2675_v21 = vmax.f32 %v2643_v17, 0.0  ;;  %3808 = vmatpush3.bf16.msra.mxu1 %v2687_v22 }
0x12ab   :  { %v2511_v24 = vpop.permute.xlu0 %2510  ;;  %v2507_v34 = vpop.permute.xlu1 %2506  ;;  %3809 = vmatprep.subr.bf16.mxu1 %v3969_v31 }
0x12ac   :  { %v2695_v36 = vpack.c.bf16 %v2676_v20, %v2675_v21  ;;  %v2626_v25 = vadd.f32 %v4543_v49, %v2511_v24  ;;  %v2625_v28 = vadd.f32 %v4543_v49, %v2507_v34  ;;  %v2475_v21 = vpack.c.bf16 %v4533_v18, %v4533_v18  ;;  %v3357_v18 = vld [vmem:[%s4753_s6 + $0x18] sm:$0xff] }
0x12ad   :  { %v2476_v24 = vpack.c.bf16 %v4535_v19, %v4535_v19 }
0x12ae   :  { %v2658_v29 = vmax.f32 %v2626_v25, 0.0  ;;  %v2657_v32 = vmax.f32 %v2625_v28, 0.0  ;;  %3828 = vmatpush3.bf16.msra.mxu0 %v2695_v36 }
0x12af   :  { %v2578_v35 = vpop.permute.xlu0 %2577  ;;  %v2574_v44 = vpop.permute.xlu1 %2573  ;;  %3829 = vmatprep.subr.bf16.mxu0 %v3969_v31 }
0x12b0   :  { %v2686_v33 = vpack.c.bf16 %v2658_v29, %v2657_v32  ;;  %v2642_v45 = vadd.f32 %v4549_v30, %v2578_v35  ;;  %v2641_v26 = vadd.f32 %v4549_v30, %v2574_v44  ;;  %v3358_v32 = vld [vmem:[%s4754_s7 + $0x18] sm:$0xff] }
0x12b2   :  { %v2674_v39 = vmax.f32 %v2642_v45, 0.0  ;;  %v2673_v38 = vmax.f32 %v2641_v26, 0.0  ;;  %3810 = vmatpush3.bf16.msra.mxu1 %v2686_v33 }
0x12b3   :  { %v2503_v27 = vpop.permute.xlu0 %2502  ;;  %v2499_v41 = vpop.permute.xlu1 %2498  ;;  %3811 = vmatprep.subr.bf16.mxu1 %v3969_v31 }
0x12b4   :  { %v2694_v43 = vpack.c.bf16 %v2674_v39, %v2673_v38  ;;  %v2624_v47 = vadd.f32 %v4543_v49, %v2503_v27  ;;  %v2623_v58 = vadd.f32 %v4543_v49, %v2499_v41 }
0x12b6   :  { %v2656_v48 = vmax.f32 %v2624_v47, 0.0  ;;  %v2655_v40 = vmax.f32 %v2623_v58, 0.0  ;;  %3830 = vmatpush3.bf16.msra.mxu0 %v2694_v43  ;;  %v2984_v47 = vld [vmem:[%s4748_s1 + $0x158] sm:$0xff]  ;;  %v2983_v58 = vld [vmem:[%s4748_s1 + $0x150] sm:$0xff] }
0x12b7   :  { %v2570_v50 = vpop.permute.xlu0 %2569  ;;  %v2566_v52 = vpop.permute.xlu1 %2565  ;;  %3831 = vmatprep.subr.bf16.mxu0 %v3969_v31 }
0x12b8   :  { %v2685_v42 = vpack.c.bf16 %v2656_v48, %v2655_v40  ;;  %v2640_v53 = vadd.f32 %v4549_v30, %v2570_v50  ;;  %v2639_v55 = vadd.f32 %v4549_v30, %v2566_v52  ;;  %v2982_v48 = vld [vmem:[%s4748_s1 + $0x148] sm:$0xff]  ;;  %v2981_v40 = vld [vmem:[%s4748_s1 + $0x140] sm:$0xff]  ;;  %v2980_v50 = vld [vmem:[%s4748_s1 + $0x138] sm:$0xff] }
0x12b9   :  { %v2979_v52 = vld [vmem:[%s4748_s1 + $0x130] sm:$0xff] }
0x12ba   :  { %v2672_v57 = vmax.f32 %v2640_v53, 0.0  ;;  %v2671_v46 = vmax.f32 %v2639_v55, 0.0  ;;  %3812 = vmatpush3.bf16.msra.mxu1 %v2685_v42  ;;  %v2978_v42 = vld [vmem:[%s4748_s1 + $0x128] sm:$0xff]  ;;  %v2977_v53 = vld [vmem:[%s4748_s1 + $0x120] sm:$0xff]  ;;  %v2976_v55 = vld [vmem:[%s4748_s1 + $0x118] sm:$0xff] }
0x12bb   :  { %v2495_v59 = vpop.permute.xlu0 %2494  ;;  %v2491_v60 = vpop.permute.xlu1 %2490  ;;  %3813 = vmatprep.subr.bf16.mxu1 %v3969_v31 }
0x12bc   :  { %v2693_v54 = vpack.c.bf16 %v2672_v57, %v2671_v46  ;;  %v2622_v62 = vadd.f32 %v4543_v49, %v2495_v59  ;;  %v2621_v63 = vadd.f32 %v4543_v49, %v2491_v60  ;;  %v2975_v57 = vld [vmem:[%s4748_s1 + $0x110] sm:$0xff]  ;;  %v2974_v46 = vld [vmem:[%s4748_s1 + $0x108] sm:$0xff]  ;;  %v2973_v59 = vld [vmem:[%s4748_s1 + $0x100] sm:$0xff] }
0x12be   :  { %v2654_v56 = vmax.f32 %v2622_v62, 0.0  ;;  %v2653_v0 = vmax.f32 %v2621_v63, 0.0  ;;  %3832 = vmatpush3.bf16.msra.mxu0 %v2693_v54 }
0x12bf   :  { %v2562_v1 = vpop.permute.xlu0 %2561  ;;  %v2558_v2 = vpop.permute.xlu1 %2557  ;;  %3833 = vmatprep.subr.bf16.mxu0 %v3969_v31 }
0x12c0   :  { %v2684_v37 = vpack.c.bf16 %v2654_v56, %v2653_v0  ;;  %v2638_v3 = vadd.f32 %v4549_v30, %v2562_v1  ;;  %v2637_v4 = vadd.f32 %v4549_v30, %v2558_v2  ;;  %v3363_v2 = vld [vmem:[%s4755_s8 + $0x30] sm:$0xff] }
0x12c2   :  { %v2670_v5 = vmax.f32 %v2638_v3, 0.0  ;;  %v2669_v61 = vmax.f32 %v2637_v4, 0.0  ;;  %3814 = vmatpush3.bf16.msra.mxu1 %v2684_v37  ;;  %v2972_v37 = vld [vmem:[%s4748_s1 + $0xf8] sm:$0xff]  ;;  %v2971_v3 = vld [vmem:[%s4748_s1 + $0xf0] sm:$0xff] }
0x12c3   :  { %v2487_v6 = vpop.permute.xlu0 %2486  ;;  %v2483_v7 = vpop.permute.xlu1 %2482  ;;  %3815 = vmatprep.subr.bf16.mxu1 %v3969_v31 }
0x12c4   :  { %v2692_v8 = vpack.c.bf16 %v2670_v5, %v2669_v61  ;;  %v2620_v9 = vadd.f32 %v4543_v49, %v2487_v6  ;;  %v2619_v10 = vadd.f32 %v4543_v49, %v2483_v7  ;;  %v3364_v61 = vld [vmem:[%s4755_s8 + $0x38] sm:$0xff]  ;;  %v2970_v7 = vld [vmem:[%s4748_s1 + $0xe8] sm:$0xff] }
0x12c6   :  { %v2652_v11 = vmax.f32 %v2620_v9, 0.0  ;;  %v2651_v12 = vmax.f32 %v2619_v10, 0.0  ;;  %3834 = vmatpush3.bf16.msra.mxu0 %v2692_v8  ;;  %v2969_v9 = vld [vmem:[%s4748_s1 + $0xe0] sm:$0xff] }
0x12c7   :  { %v2554_v13 = vpop.permute.xlu0 %2553  ;;  %v2550_v14 = vpop.permute.xlu1 %2549  ;;  %3835 = vmatprep.subr.bf16.mxu0 %v3969_v31 }
0x12c8   :  { %v2683_v16 = vpack.c.bf16 %v2652_v11, %v2651_v12  ;;  %v2636_v22 = vadd.f32 %v4549_v30, %v2554_v13  ;;  %v2635_v23 = vadd.f32 %v4549_v30, %v2550_v14 }
0x12ca   :  { %v2668_v17 = vmax.f32 %v2636_v22, 0.0  ;;  %v2667_v20 = vmax.f32 %v2635_v23, 0.0  ;;  %3816 = vmatpush3.bf16.msra.mxu1 %v2683_v16 }
0x12cb   :  { %3841 = vmatprep.subr.mxu1 %v3969_v31 }
0x12cc   :  { %v2691_v49 = vpack.c.bf16 %v2668_v17, %v2667_v20  ;;  %v3365_v17 = vld [vmem:[%s4749_s2 + $0x3] ss:$0 sm:$0xff] }
0x12cd   :  { %3818 = vmatmul.mubr.bf16.vlgmr.msra.gmra.mxu1 %v2475_v21 }
0x12ce   :  { %3836 = vmatpush3.bf16.msra.mxu0 %v2691_v49  ;;  %3843 = vmatprep.mubr.msk.f32.mxu1 %vm3970_vm2, %v3969_v31 }
0x12cf   :  { %3846 = vmatprep.subr.mxu0 %v3969_v31 }
0x12d1   :  { %3838 = vmatmul.mubr.bf16.vlgmr.msra.gmra.mxu0 %v2476_v24 }
0x12d2   :  { %3848 = vmatprep.mubr.msk.f32.mxu0 %vm3970_vm2, %v3969_v31 }
0x138d   :  { %v2733_v30 = vpop.f32.mrf.mxu1 }
0x138e   :  { %3842 = vmatpush3.msk.msra.mxu1 %vm863_vm4, %v2733_v30 }
0x138f   :  { %v3819_v34 = vpop.f32.mrf.mxu1  ;;  %3844 = vmatmul.mubr.msk.f32.vlgmr.msra.gmra.mxu1 %vm859_vm5, %v3357_v18  ;;  %3851 = vmatprep.subr.mxu1 %v2984_v47 }
0x1390   :  { %3852 = vmatpush3.msra.mxu1 %v2984_v47 }
0x1391   :  { %v2736_v36 = vpop.f32.mrf.mxu1  ;;  %v2773_v25 = vpop.f32.mrf.mxu0  ;;  %3853 = vmatprep.subr.mxu1 %v2983_v58 }
0x1392   :  { %3847 = vmatpush3.msk.msra.mxu0 %vm863_vm4, %v2773_v25  ;;  %3854 = vmatpush3.msra.mxu1 %v2983_v58 }
0x1393   :  { %v3820_v19 = vpop.f32.mrf.mxu1  ;;  %v3839_v28 = vpop.f32.mrf.mxu0  ;;  %3849 = vmatmul.mubr.msk.f32.vlgmr.msra.gmra.mxu0 %vm859_vm5, %v3357_v18  ;;  %3855 = vmatprep.subr.mxu1 %v2982_v48 }
0x1394   :  { %3856 = vmatpush3.msra.mxu1 %v2982_v48  ;;  %v3113_v28 = vld [vmem:[%s4748_s1 + $0x198] sm:$0xff]  ;;  %v3367_v48 = vld [vmem:[%s4750_s3 + $0x28] sm:$0xff] }
0x1395   :  { %v2776_v29 = vpop.f32.mrf.mxu0  ;;  %3857 = vmatprep.subr.mxu1 %v2981_v40  ;;  %3886 = vmatprep.subr.mxu0 %v3113_v28 }
0x1396   :  { %3858 = vmatpush3.msra.mxu1 %v2981_v40  ;;  %v3112_v29 = vld [vmem:[%s4748_s1 + $0x190] sm:$0xff]  ;;  %3887 = vmatpush3.msra.mxu0 %v3113_v28 }
0x1397   :  { %v3840_v31 = vpop.f32.mrf.mxu0  ;;  %3859 = vmatprep.subr.mxu1 %v2980_v50  ;;  %3888 = vmatprep.subr.mxu0 %v3112_v29 }
0x1398   :  { %3860 = vmatpush3.msra.mxu1 %v2980_v50  ;;  %v3111_v31 = vld [vmem:[%s4748_s1 + $0x188] sm:$0xff]  ;;  %3889 = vmatpush3.msra.mxu0 %v3112_v29 }
0x1399   :  { %3861 = vmatprep.subr.mxu1 %v2979_v52  ;;  %3890 = vmatprep.subr.mxu0 %v3111_v31  ;;  %v3107_v50 = vld [vmem:[%s4748_s1 + $0x168] sm:$0xff] }
0x139a   :  { %3862 = vmatpush3.msra.mxu1 %v2979_v52  ;;  %3891 = vmatpush3.msra.mxu0 %v3111_v31 }
0x139b   :  { %3863 = vmatprep.subr.mxu1 %v2978_v42 }
0x139c   :  { %3864 = vmatpush3.msra.mxu1 %v2978_v42  ;;  %v3106_v42 = vld [vmem:[%s4748_s1 + $0x160] sm:$0xff] }
0x139d   :  { %3865 = vmatprep.subr.mxu1 %v2977_v53 }
0x139e   :  { %3866 = vmatpush3.msra.mxu1 %v2977_v53 }
0x139f   :  { %3867 = vmatprep.subr.mxu1 %v2976_v55 }
0x13a0   :  { %3868 = vmatpush3.msra.mxu1 %v2976_v55 }
0x13a1   :  { %3869 = vmatprep.subr.mxu1 %v2975_v57 }
0x13a2   :  { %3870 = vmatpush3.msra.mxu1 %v2975_v57 }
0x13a3   :  { %3871 = vmatprep.subr.mxu1 %v2974_v46 }
0x13a4   :  { %3872 = vmatpush3.msra.mxu1 %v2974_v46 }
0x13a5   :  { %3873 = vmatprep.subr.mxu1 %v2973_v59 }
0x13a6   :  { %3874 = vmatpush3.msra.mxu1 %v2973_v59 }
0x13a7   :  { %3875 = vmatprep.subr.mxu1 %v2972_v37 }
0x13a8   :  { %3876 = vmatpush3.msra.mxu1 %v2972_v37 }
0x13a9   :  { %3877 = vmatprep.subr.mxu1 %v2971_v3 }
0x13aa   :  { %3878 = vmatpush3.msra.mxu1 %v2971_v3 }
0x13ab   :  { %3879 = vmatprep.subr.mxu1 %v2970_v7 }
0x13ac   :  { %3880 = vmatpush3.msra.mxu1 %v2970_v7  ;;  %v3371_v7 = vld [vmem:[%s4749_s2 + $0x5] ss:$0 sm:$0xff] }
0x13ad   :  { %3881 = vmatprep.subr.mxu1 %v2969_v9 }
0x13ae   :  { %3882 = vmatpush3.msra.mxu1 %v2969_v9 }
0x144f   :  { %v2855_v35 = vpop.f32.mrf.mxu1 }
0x1450   :  { %v4615_v44 = vadd.f32 %v3358_v32, %v2855_v35 }
0x1451   :  { %v3845_v33 = vpop.f32.mrf.mxu1 }
0x1452   :  { %v2939_v26 = vmul.f32 %v4615_v44, %v4615_v44 }
0x1453   :  { %v2928_v45 = vpop.f32.mrf.mxu0 }
0x1454   :  { %v4619_v39 = vadd.f32 %v3358_v32, %v2928_v45  ;;  %v3110_v32 = vld [vmem:[%s4748_s1 + $0x180] sm:$0xff] }
0x1455   :  { %v3850_v38 = vpop.f32.mrf.mxu0  ;;  %3892 = vmatprep.subr.mxu0 %v3110_v32 }
0x1456   :  { %v2940_v27 = vmul.f32 %v4619_v39, %v4619_v39  ;;  %v2936_v41 = vadd.f32 %v4619_v39, %v4615_v44  ;;  %3893 = vmatpush3.msra.mxu0 %v3110_v32 }
0x1458   :  { %2937 = vadd.xlane.f32.xlu1 %v2936_v41  ;;  %v2941_v43 = vadd.f32 %v2940_v27, %v2939_v26  ;;  %v3366_v27 = vld [vmem:[%s4750_s3 + $0x20] sm:$0xff]  ;;  %v3109_v41 = vld [vmem:[%s4748_s1 + $0x178] sm:$0xff] }
0x1459   :  { %3894 = vmatprep.subr.mxu0 %v3109_v41 }
0x145a   :  { %2942 = vadd.xlane.f32.xlu0 %v2941_v43  ;;  %v3108_v43 = vld [vmem:[%s4748_s1 + $0x170] sm:$0xff]  ;;  %3895 = vmatpush3.msra.mxu0 %v3109_v41 }
0x145b   :  { %3896 = vmatprep.subr.mxu0 %v3108_v43 }
0x145c   :  { %3897 = vmatpush3.msra.mxu0 %v3108_v43 }
0x145d   :  { %3898 = vmatprep.subr.mxu0 %v3107_v50 }
0x145e   :  { %3899 = vmatpush3.msra.mxu0 %v3107_v50 }
0x145f   :  { %3900 = vmatprep.subr.mxu0 %v3106_v42 }
0x1460   :  { %3901 = vmatpush3.msra.mxu0 %v3106_v42 }
0x14e1   :  { %v2938_v60 = vpop.xlane.xlu1 %2937 }
0x14e2   :  { %v2944_v54 = vmul.f32 0.00390625, %v2938_v60 }
0x14e3   :  { %v2943_v62 = vpop.xlane.xlu0 %2942 }
0x14e4   :  { %v2946_v63 = vmul.f32 %v2944_v54, %v2944_v54  ;;  %v2945_v56 = vmul.f32 0.00390625, %v2943_v62 }
0x14e6   :  { %v2947_v0 = vsub.f32 %v2945_v56, %v2946_v63  ;;  %v3205_v63 = vld [vmem:[%s4748_s1 + $0x1b8] sm:$0xff]  ;;  %v3204_v56 = vld [vmem:[%s4748_s1 + $0x1b0] sm:$0xff] }
0x14e7   :  { %3905 = vmatprep.subr.mxu0 %v3205_v63 }
0x14e8   :  { %v2948_v1 = vadd.f32 1e-05, %v2947_v0  ;;  %v3203_v0 = vld [vmem:[%s4748_s1 + $0x1a8] sm:$0xff] }
0x14ea   :  { %3942 = vrsqrt.f32 %v2948_v1  ;;  %v3202_v1 = vld [vmem:[%s4748_s1 + $0x1a0] sm:$0xff]  ;;  %s3971_s1 = smov [#allocation2]  }
0x14eb   :  { %s3299_s27 = sshll.u32 %s3971_s1, 4  ;;  %s3300_s27 = int_to_ptr.vmem [resolvable:$true] %s3299_s27 }
0x14ec   :  { %s3946_s28 = scalar_lea.vmem %s3300_s27, 256  ;;  %p3951_p1 = scmp.lt.s32.totalorder %s3300_s27, %s3300_s27 }
0x14ed   :  { %p3947_p0 = scmp.ne.s32.totalorder %s3300_s27, %s3946_s28  ;;  %p3952_p2 = scmp.lt.s32.totalorder %s3946_s28, %s3946_s28 }
0x14ef   :  { %p3953_p3 = por %p3952_p2, %p3951_p1 }
0x14f1   :  { %p3954_p4 = pnand %p3953_p3, %p3947_p0 }
0x14f7   :  { %v3943_v4 = vpop.eup %3942 }
0x14f8   :  { %v2950_v5 = vmul.f32 %v3943_v4, %v3363_v2  ;;  %v3368_v2 = vld [vmem:[%s4749_s2 + $0x4] ss:$0 sm:$0xff] }
0x14fa   :  { %2955 = vperm.xlu0 %3923, %v2950_v5   ;;  %v2951_v6 = vmul.f32 %v2950_v5, %v2944_v54 }
0x14fc   :  { %v2952_v8 = vsub.f32 %v3364_v61, %v2951_v6 }
0x14fe   :  { %2962 = vperm.xlu1 %3922, %v2952_v8  }
0x1575   :  { %v2956_v10 = vpop.permute.xlu0 %2955 }
0x1576   :  { %v2958_v11 = vmul.f32 %v2956_v10, %v4615_v44  ;;  %v2959_v12 = vmul.f32 %v2956_v10, %v4619_v39 }
0x1579   :  { %v2963_v13 = vpop.permute.xlu1 %2962 }
0x157a   :  { %v2965_v14 = vadd.f32 %v2963_v13, %v2958_v11  ;;  %v2966_v16 = vadd.f32 %v2963_v13, %v2959_v12 }
0x157c   :  { %v2967_v22 = vadd.f32 %v2965_v14, %v4512_v51  ;;  %v2968_v23 = vadd.f32 %v2966_v16, %v4515_v15 }
0x157e   :  { %3883 = vmatprep.mubr.f32.mxu1 %v2967_v22 }
0x157f   :  { %3884 = vmatmul.mubr.f32.vlgmr.msra.gmra.mxu1 %v2968_v23 }
0x163f   :  { %v3885_v20 = vpop.f32.mrf.mxu1 }
0x1640   :  { %v3062_v21 = vadd.f32 %v3885_v20, %v3365_v17 }
0x1641   :  { %v3056_v49 = vpop.f32.mrf.mxu1 }
0x1642   :  { %v3075_v24 = vmul.f32 %v3062_v21, %v3062_v21  ;;  %v3057_v18 = vadd.f32 %v3365_v17, %v3056_v49  ;;  %v3070_v36 = vsel %vm130_vm1, %v3062_v21, 0.0 }
0x1644   :  { %v3074_v30 = vmul.f32 %v3057_v18, %v3057_v18  ;;  %v3069_v34 = vsel %vm130_vm1, %v3057_v18, 0.0  ;;  %v3077_v15 = vsel %vm130_vm1, %v3075_v24, 0.0 }
0x1645   :  { %v3071_v25 = vadd.f32 %v3070_v36, %v3069_v34 }
0x1646   :  { %v3076_v51 = vsel %vm130_vm1, %v3074_v30, 0.0 }
0x1647   :  { %3072 = vadd.xlane.f32.xlu1 %v3071_v25  ;;  %v3078_v19 = vadd.f32 %v3077_v15, %v3076_v51 }
0x1649   :  { %3079 = vadd.xlane.f32.xlu0 %v3078_v19 }
0x16d0   :  { %v3073_v35 = vpop.xlane.xlu1 %3072 }
0x16d1   :  { %v3081_v44 = vmul.f32 0.0078125, %v3073_v35 }
0x16d2   :  { %v3080_v33 = vpop.xlane.xlu0 %3079 }
0x16d3   :  { %v3083_v45 = vmul.f32 %v3081_v44, %v3081_v44  ;;  %v3082_v26 = vmul.f32 0.0078125, %v3080_v33 }
0x16d5   :  { %v3084_v39 = vsub.f32 %v3082_v26, %v3083_v45 }
0x16d7   :  { %v3085_v38 = vadd.f32 1e-05, %v3084_v39 }
0x16d9   :  { %3944 = vrsqrt.f32 %v3085_v38 }
0x16e6   :  { %v3945_v47 = vpop.eup %3944 }
0x16e7   :  { %v3087_v58 = vmul.f32 %v3945_v47, %v3366_v27 }
0x16e9   :  { %3092 = vperm.xlu0 %3923, %v3087_v58   ;;  %v3088_v40 = vmul.f32 %v3087_v58, %v3081_v44 }
0x16eb   :  { %v3089_v52 = vsub.f32 %v3367_v48, %v3088_v40 }
0x16ed   :  { %3099 = vperm.xlu1 %3922, %v3089_v52  }
0x1764   :  { %v3093_v53 = vpop.permute.xlu0 %3092 }
0x1765   :  { %v3095_v55 = vmul.f32 %v3093_v53, %v3057_v18  ;;  %v3096_v57 = vmul.f32 %v3093_v53, %v3062_v21 }
0x1768   :  { %v3100_v46 = vpop.permute.xlu1 %3099 }
0x1769   :  { %v3102_v59 = vadd.f32 %v3100_v46, %v3095_v55  ;;  %v3103_v60 = vadd.f32 %v3100_v46, %v3096_v57 }
0x176b   :  { %v3104_v54 = vmax.f32 %v3102_v59, 0.0  ;;  %v3105_v62 = vmax.f32 %v3103_v60, 0.0 }
0x176d   :  { %3902 = vmatprep.mubr.msk.f32.mxu0 %vm130_vm1, %v3104_v54 }
0x176e   :  { %3903 = vmatmul.mubr.msk.f32.vlgmr.msra.gmra.mxu0 %vm130_vm1, %v3105_v62 }
0x176f   :  { %3906 = vmatpush3.msra.mxu0 %v3205_v63 }
0x1770   :  { %3907 = vmatprep.subr.mxu0 %v3204_v56 }
0x1771   :  { %3908 = vmatpush3.msra.mxu0 %v3204_v56 }
0x1772   :  { %3909 = vmatprep.subr.mxu0 %v3203_v0 }
0x1773   :  { %3910 = vmatpush3.msra.mxu0 %v3203_v0 }
0x1774   :  { %3911 = vmatprep.subr.mxu0 %v3202_v1 }
0x1775   :  { %3912 = vmatpush3.msra.mxu0 %v3202_v1 }
0x182e   :  { %v3904_v37 = vpop.f32.mrf.mxu0 }
0x182f   :  { %v3197_v3 = vadd.f32 %v3904_v37, %v3368_v2 }
0x1830   :  { %v3191_v4 = vpop.f32.mrf.mxu0 }
0x1831   :  { %v3192_v5 = vadd.f32 %v3368_v2, %v3191_v4  ;;  %v3201_v6 = vmax.f32 %v3197_v3, 0.0 }
0x1833   :  { %v3200_v61 = vmax.f32 %v3192_v5, 0.0 }
0x1835   :  { %3913 = vmatprep.mubr.msk.f32.mxu0 %vm45_vm0, %v3200_v61 }
0x1836   :  { %3914 = vmatmul.mubr.msk.f32.vlgmr.msra.gmra.mxu0 %vm45_vm0, %v3201_v6 }
0x18f6   :  { %v3915_v8 = vpop.f32.mrf.mxu0 }
0x18f7   :  { %v3289_v9 = vadd.f32 %v3915_v8, %v3371_v7 }
0x18f8   :  { %v3283_v10 = vpop.f32.mrf.mxu0 }
0x18f9   :  { %3293 = vst.msk [vmem:[#allocation2 + $0x8] sm:$0xff] %vm45_vm0, %v3289_v9  ;;  %v3284_v11 = vadd.f32 %v3371_v7, %v3283_v10 }
0x18fb   :  { %3292 = vst.msk [vmem:[#allocation2] sm:$0xff] %vm45_vm0, %v3284_v11 }
0x18fc   :  { %3957 = shalt.err (!%p3954_p4)
}
0x18fd   :  { %s3972_s29 = smov 128   ;;  %s3973_s2 = smov 8  }
0x18fe   :  { %3305 = dma.vmem_to_hbm [thread:$0]  %s3300_s27, 256, %s4756_s9, [#allocation3], %s3972_s29, %s3972_s29, %s3973_s2  }
0x18ff   :  { %3966 = dma.done.wait [#allocation3], 256  }
0x1900   :  { %3967 = vsyncadd [#allocation3], 4294967040 }
0x1901   :  { %3309 = vsyncpa [#allocation3], 1 }

</bundles_post_ra>
